<compile_context>
chip_gen: v7x
topology: tpu7x:2x2x1
jax: 0.10.0
libtpu: 0.0.40
codegen_flags: <defaults>
</compile_context>

<pallas_src>
import jax
import jax.numpy as jnp
from jax import lax
from jax.experimental import pallas as pl
from jax.experimental.pallas import tpu as pltpu


def _dual_cross_att_kernel(
    gammas_ref,   # SMEM (2,)       f32: [gamma_sa, gamma_za]
    x2_ref,       # VMEM (CD, N)    f32: x_2d as (C, D, H*W)
    x3_ref,       # VMEM (CD, N)    f32: x_3d as (C, D, H*W)
    x3dcn_ref,    # VMEM (D, C*N)   bf16: x_3d as (D, C*H*W) for the depth gram
    wqk_ref,      # VMEM (2L, CD)   bf16: fused [query; key] 1x1x1 conv (block-diag expanded)
    bqk_ref,      # VMEM (2L, 1)    f32
    wv_ref,       # VMEM (CD+1, CD) bf16: value conv, extra last row of zeros (ones-row trick)
    bv_ref,       # VMEM (CD+1, 1)  f32: value bias, last entry 1.0
    sel_ref,      # VMEM (CD, D)    f32 constant: sel[c*D+d, e] = (d == e)
    mask_ref,     # VMEM (CD, CD)   f32 constant: mask[i, j] = (i//D == j//D)
    out_ref,      # VMEM (CD, N)    f32: result as (C, D, H*W)
):
    f32 = jnp.float32
    bf16 = jnp.bfloat16
    CD = out_ref.shape[0]
    L = wqk_ref.shape[0] // 2

    gamma_sa = gammas_ref[0]
    gamma_za = gammas_ref[1]

    x2 = x2_ref[...]
    x3 = x3_ref[...]
    x2b = x2.astype(bf16)
    x3b = x3.astype(bf16)

    # ---------------- PAM branch (spatial attention over H*W) ----------------
    # Fused query/key projection: one (2L, CD) x (CD, N) matmul, slice q / k.
    qk = jnp.dot(wqk_ref[...], x2b, preferred_element_type=f32) + bqk_ref[...]  # (2L, N)
    q = qk[:L, :]           # (L, N) f32
    k = qk[L:, :]           # (L, N) f32

    # energy[n, m] = sum_l q[l, n] * k[l, m]; q/k kept f32 (K=12, negligible).
    energy = lax.dot_general(q, k, (((0,), (0,)), ((), ())),
                             preferred_element_type=f32)                       # (N, N)
    e = jnp.exp(energy - jnp.max(energy, axis=-1, keepdims=True)).astype(bf16)  # (N, N) bf16

    # Value projection with an appended ones-row (weights 0 / bias 1), so the
    # attention*V matmul also produces the softmax denominators for free.
    v_ext = (jnp.dot(wv_ref[...], x2b, preferred_element_type=f32)
             + bv_ref[...]).astype(bf16)                                        # (CD+1, N)

    # out_ext[l, n] = sum_m v_ext[l, m] * e[n, m]; row CD is sum_m e[n, m].
    out_ext = lax.dot_general(v_ext, e, (((1,), (1,)), ((), ())),
                              preferred_element_type=f32)                       # (CD+1, N)
    inv_denom = pl.reciprocal(out_ext[CD:CD + 1, :], approx=True)                # (1, N)
    out_pam = out_ext[:CD, :] * inv_denom                                        # (CD, N)

    # ---------------- z-axis branch (attention over the depth axis) ----------
    # Direct depth gram from the (D, C*N) view: full 2560-deep contraction.
    x3d = x3dcn_ref[...]                                                         # (D, C*N) bf16
    ez = lax.dot_general(x3d, x3d, (((1,), (1,)), ((), ())),
                         preferred_element_type=f32)                             # (D, D)
    ez_new = jnp.max(ez, axis=-1, keepdims=True) - ez
    pz = jnp.exp(ez_new - jnp.max(ez_new, axis=-1, keepdims=True))
    z_att = pz * pl.reciprocal(jnp.sum(pz, axis=-1, keepdims=True), approx=True)  # (D, D)

    # Block-diagonal expansion Z = (S z_att S^T) o M applies the depth attention
    # to every channel directly in the (CD, N) layout with one big matmul.
    sel = sel_ref[...]
    zr = jnp.dot(sel, z_att, preferred_element_type=f32)                         # (CD, D)
    z_big = (lax.dot_general(zr, sel, (((1,), (1,)), ((), ())),
                             preferred_element_type=f32) * mask_ref[...]).astype(bf16)  # (CD, CD)
    out_z = jnp.dot(z_big, x3b, preferred_element_type=f32)                      # (CD, N)

    # (gamma_sa*PAM + x_3d) + (gamma_za*z_att + x_2d)  -- single fused store.
    out_ref[...] = gamma_sa * out_pam + gamma_za * out_z + x2 + x3


def dual_cross_att(x_2d, x_3d, params):
    """Pallas implementation of DualCrossAttModule.forward (inputs (B,C,H,W,D))."""
    B, C, H, W, D = x_2d.shape
    N = H * W
    CD = C * D
    Cq = params["wq"].shape[0]
    L = Cq * D
    f32 = jnp.float32
    bf16 = jnp.bfloat16

    # --- layout-only glue (see TODO above about pushing this onto producers) ---
    x2_cdn = jnp.transpose(x_2d, (0, 1, 4, 2, 3)).reshape(B, CD, N)
    x3_cdn = jnp.transpose(x_3d, (0, 1, 4, 2, 3)).reshape(B, CD, N)
    x3_dcn = jnp.transpose(x_3d, (0, 4, 1, 2, 3)).reshape(B, D, C * N).astype(bf16)

    # --- tiny batch-independent constants (big ones pre-cast to bf16) ---------
    eye_d = jnp.eye(D, dtype=f32)
    wq_big = jnp.kron(params["wq"], eye_d)                               # (L, CD)
    wk_big = jnp.kron(params["wk"], eye_d)                               # (L, CD)
    wqk_big = jnp.concatenate([wq_big, wk_big], axis=0).astype(bf16)     # (2L, CD)
    bqk_col = jnp.concatenate([jnp.repeat(params["bq"], D),
                               jnp.repeat(params["bk"], D)])[:, None]    # (2L, 1)
    wv_big = jnp.kron(params["wv"], eye_d)                               # (CD, CD)
    wv_ext = jnp.concatenate([wv_big, jnp.zeros((1, CD), f32)],
                             axis=0).astype(bf16)                        # (CD+1, CD)
    bv_ext = jnp.concatenate([jnp.repeat(params["bv"], D),
                              jnp.ones((1,), f32)])[:, None]             # (CD+1, 1)
    sel = jnp.tile(eye_d, (C, 1))                                        # (CD, D)
    bdmask = jnp.kron(jnp.eye(C, dtype=f32), jnp.ones((D, D), f32))      # (CD, CD)
    gammas = jnp.array([params["gamma_sa"], params["gamma_za"]], dtype=f32)

    out_flat = pl.pallas_call(
        _dual_cross_att_kernel,
        out_shape=jax.ShapeDtypeStruct((B, CD, N), f32),
        grid=(B,),
        in_specs=[
            pl.BlockSpec(memory_space=pltpu.MemorySpace.SMEM),       # gammas
            pl.BlockSpec((None, CD, N), lambda b: (b, 0, 0)),        # x2_cdn
            pl.BlockSpec((None, CD, N), lambda b: (b, 0, 0)),        # x3_cdn
            pl.BlockSpec((None, D, C * N), lambda b: (b, 0, 0)),     # x3_dcn
            pl.BlockSpec((2 * L, CD), lambda b: (0, 0)),             # wqk_big
            pl.BlockSpec((2 * L, 1), lambda b: (0, 0)),              # bqk
            pl.BlockSpec((CD + 1, CD), lambda b: (0, 0)),            # wv_ext
            pl.BlockSpec((CD + 1, 1), lambda b: (0, 0)),             # bv_ext
            pl.BlockSpec((CD, D), lambda b: (0, 0)),                 # sel
            pl.BlockSpec((CD, CD), lambda b: (0, 0)),                # bdmask
        ],
        out_specs=pl.BlockSpec((None, CD, N), lambda b: (b, 0, 0)),
        compiler_params=pltpu.CompilerParams(
            dimension_semantics=("parallel",)),
    )(gammas, x2_cdn, x3_cdn, x3_dcn, wqk_big, bqk_col, wv_ext, bv_ext, sel, bdmask)

    # lane-dense (B, C*D, N) result -> (B, C, H, W, D)
    return out_flat.reshape(B, C, D, H, W).transpose(0, 1, 3, 4, 2)


def reference(x_2d, x_3d, params):
    """Pure-JAX transliteration of the PyTorch forward (for validation)."""
    hp = lax.Precision.HIGHEST
    B, C, H, W, D = x_2d.shape
    N = H * W
    wq, bq = params["wq"], params["bq"]
    wk, bk = params["wk"], params["bk"]
    wv, bv = params["wv"], params["bv"]
    g_sa, g_za = params["gamma_sa"], params["gamma_za"]

    # PAM_Module
    x2p = jnp.transpose(x_2d, (0, 1, 4, 2, 3))                        # (B,C,D,H,W)
    q = jnp.einsum("oc,bcdhw->bodhw", wq, x2p, precision=hp) + bq[None, :, None, None, None]
    k = jnp.einsum("oc,bcdhw->bodhw", wk, x2p, precision=hp) + bk[None, :, None, None, None]
    v = jnp.einsum("oc,bcdhw->bodhw", wv, x2p, precision=hp) + bv[None, :, None, None, None]
    pq = q.reshape(B, -1, N).transpose(0, 2, 1)                       # (B,N,L)
    pk = k.reshape(B, -1, N)                                          # (B,L,N)
    energy = jnp.einsum("bnl,blm->bnm", pq, pk, precision=hp)
    attn = jax.nn.softmax(energy, axis=-1)
    pv = v.reshape(B, -1, N)                                          # (B,CD,N)
    out = jnp.einsum("blm,bnm->bln", pv, attn, precision=hp)
    out = out.reshape(B, C, D, H, W).transpose(0, 1, 3, 4, 2)
    sa = g_sa * out + x_3d

    # z_axis_Gate
    x3p = jnp.transpose(x_3d, (0, 4, 1, 2, 3)).reshape(B, D, -1)      # (B,D,C*H*W)
    ez = jnp.einsum("bdp,bep->bde", x3p, x3p, precision=hp)
    ezn = jnp.max(ez, axis=-1, keepdims=True) - ez
    zatt = jax.nn.softmax(ezn, axis=-1)
    outz = jnp.einsum("bde,bep->bdp", zatt, x3p, precision=hp)
    outz = outz.reshape(B, D, C, H, W).transpose(0, 2, 3, 4, 1)
    za = g_za * outz + x_2d
    return za + sa


if __name__ == "__main__":
    # gate_channels=10 (so query/key conv has 10//8 = 1 output channel),
    # depth D = in_dim = 12, small spatial 16x16, batch 2.
    B, C, H, W, D = 2, 10, 16, 16, 12
    Cq = C // 8

    key = jax.random.PRNGKey(0)
    ks = jax.random.split(key, 8)
    x_2d = jax.random.normal(ks[0], (B, C, H, W, D), jnp.float32)
    x_3d = 0.1 * jax.random.normal(ks[1], (B, C, H, W, D), jnp.float32)

    params = dict(
        wq=0.1 * jax.random.normal(ks[2], (Cq, C), jnp.float32),   # query_conv (1x1x1)
        bq=0.1 * jax.random.normal(ks[3], (Cq,), jnp.float32),
        wk=0.1 * jax.random.normal(ks[4], (Cq, C), jnp.float32),   # key_conv
        bk=0.1 * jax.random.normal(ks[5], (Cq,), jnp.float32),
        wv=0.1 * jax.random.normal(ks[6], (C, C), jnp.float32),    # value_conv
        bv=0.1 * jax.random.normal(ks[7], (C,), jnp.float32),
        # PyTorch initializes both gamma parameters to 0; deterministic non-zero
        # values are used here so the attention paths actually contribute.
        gamma_sa=jnp.float32(0.5),
        gamma_za=jnp.float32(0.5),
    )

    out = dual_cross_att(x_2d, x_3d, params)
    out = jax.block_until_ready(out)

    ref = reference(x_2d, x_3d, params)
    assert out.shape == (B, C, H, W, D)
    max_err = float(jnp.max(jnp.abs(out - ref)))
    if not bool(jnp.allclose(out, ref, atol=5e-2, rtol=5e-2)):
        raise AssertionError(f"kernel/reference mismatch, max_abs_err={max_err}")
    print("KERNEL_OK")
</pallas_src>

<mosaic_0001>
module attributes {stable_mosaic.version = 11 : i64} {
  func.func @_dual_cross_att_kernel(%arg0: i32, %arg1: memref<2xf32, #tpu.memory_space<smem>>, %arg2: memref<1x120x256xf32, #tpu.memory_space<vmem>>, %arg3: memref<1x120x256xf32, #tpu.memory_space<vmem>>, %arg4: memref<1x12x2560xbf16, #tpu.memory_space<vmem>>, %arg5: memref<24x120xbf16, #tpu.memory_space<vmem>>, %arg6: memref<24x1xf32, #tpu.memory_space<vmem>>, %arg7: memref<121x120xbf16, #tpu.memory_space<vmem>>, %arg8: memref<121x1xf32, #tpu.memory_space<vmem>>, %arg9: memref<120x12xf32, #tpu.memory_space<vmem>>, %arg10: memref<120x120xf32, #tpu.memory_space<vmem>>, %arg11: memref<1x120x256xf32, #tpu.memory_space<vmem>>) attributes {dimension_semantics = [#tpu.dimension_semantics<parallel>], iteration_bounds = array<i64: 2>, scalar_prefetch = 0 : i64, scratch_operands = 0 : i64, tpu.core_type = #tpu.core_type<tc>, window_params = [{transform_indices = @transform_0, window_bounds = array<i64: 2>}, {transform_indices = @transform_1, window_bounds = array<i64: 1, 120, 256>}, {transform_indices = @transform_2, window_bounds = array<i64: 1, 120, 256>}, {transform_indices = @transform_3, window_bounds = array<i64: 1, 12, 2560>}, {pipeline_mode = #tpu.pipeline_mode<synchronous>, transform_indices = @transform_4, window_bounds = array<i64: 24, 120>}, {pipeline_mode = #tpu.pipeline_mode<synchronous>, transform_indices = @transform_5, window_bounds = array<i64: 24, 1>}, {pipeline_mode = #tpu.pipeline_mode<synchronous>, transform_indices = @transform_6, window_bounds = array<i64: 121, 120>}, {pipeline_mode = #tpu.pipeline_mode<synchronous>, transform_indices = @transform_7, window_bounds = array<i64: 121, 1>}, {pipeline_mode = #tpu.pipeline_mode<synchronous>, transform_indices = @transform_8, window_bounds = array<i64: 120, 12>}, {pipeline_mode = #tpu.pipeline_mode<synchronous>, transform_indices = @transform_9, window_bounds = array<i64: 120, 120>}, {transform_indices = @transform_10, window_bounds = array<i64: 1, 120, 256>}]} {
    %c0 = arith.constant 0 : index
    %0 = memref.load %arg1[%c0] : memref<2xf32, #tpu.memory_space<smem>>
    %c1 = arith.constant 1 : index
    %1 = memref.load %arg1[%c1] : memref<2xf32, #tpu.memory_space<smem>>
    %c0_0 = arith.constant 0 : index
    %c0_1 = arith.constant 0 : index
    %c0_2 = arith.constant 0 : index
    %2 = vector.load %arg2[%c0_0, %c0_1, %c0_2] : memref<1x120x256xf32, #tpu.memory_space<vmem>>, vector<1x120x256xf32>
    %3 = vector.shape_cast %2 : vector<1x120x256xf32> to vector<120x256xf32>
    %c0_3 = arith.constant 0 : index
    %c0_4 = arith.constant 0 : index
    %c0_5 = arith.constant 0 : index
    %4 = vector.load %arg3[%c0_3, %c0_4, %c0_5] : memref<1x120x256xf32, #tpu.memory_space<vmem>>, vector<1x120x256xf32>
    %5 = vector.shape_cast %4 : vector<1x120x256xf32> to vector<120x256xf32>
    %6 = arith.truncf %3 : vector<120x256xf32> to vector<120x256xbf16>
    %7 = arith.truncf %5 : vector<120x256xf32> to vector<120x256xbf16>
    %c0_6 = arith.constant 0 : index
    %c0_7 = arith.constant 0 : index
    %8 = vector.load %arg5[%c0_6, %c0_7] : memref<24x120xbf16, #tpu.memory_space<vmem>>, vector<24x120xbf16>
    %cst = arith.constant dense<0.000000e+00> : vector<24x256xf32>
    %9 = tpu.matmul %8, %6, %cst {dimension_numbers = #tpu.dot_dimension_numbers<[1], [0], [0], [1], [0, 0, 1, 1], [], []>} : vector<24x120xbf16>, vector<120x256xbf16>, vector<24x256xf32> -> vector<24x256xf32>
    %c0_8 = arith.constant 0 : index
    %c0_9 = arith.constant 0 : index
    %10 = vector.load %arg6[%c0_8, %c0_9] : memref<24x1xf32, #tpu.memory_space<vmem>>, vector<24x1xf32>
    %11 = vector.broadcast %10 : vector<24x1xf32> to vector<24x256xf32>
    %12 = arith.addf %9, %11 : vector<24x256xf32>
    %13 = vector.extract_strided_slice %12 {offsets = [0, 0], sizes = [12, 256], strides = [1, 1]} : vector<24x256xf32> to vector<12x256xf32>
    %14 = vector.extract_strided_slice %12 {offsets = [12, 0], sizes = [12, 256], strides = [1, 1]} : vector<24x256xf32> to vector<12x256xf32>
    %cst_10 = arith.constant dense<0.000000e+00> : vector<256x256xf32>
    %15 = tpu.matmul %13, %14, %cst_10 {dimension_numbers = #tpu.dot_dimension_numbers<[0], [0], [1], [1], [0, 1, 1, 1], [], []>} : vector<12x256xf32>, vector<12x256xf32>, vector<256x256xf32> -> vector<256x256xf32>
    %cst_11 = arith.constant dense<0xFF800000> : vector<256xf32>
    %16 = vector.multi_reduction <maximumf>, %15, %cst_11 [1] : vector<256x256xf32> to vector<256xf32>
    %17 = vector.shape_cast %16 : vector<256xf32> to vector<256x1xf32>
    %18 = vector.broadcast %17 : vector<256x1xf32> to vector<256x256xf32>
    %19 = arith.subf %15, %18 : vector<256x256xf32>
    %20 = math.exp %19 : vector<256x256xf32>
    %21 = arith.truncf %20 : vector<256x256xf32> to vector<256x256xbf16>
    %c0_12 = arith.constant 0 : index
    %c0_13 = arith.constant 0 : index
    %22 = vector.load %arg7[%c0_12, %c0_13] : memref<121x120xbf16, #tpu.memory_space<vmem>>, vector<121x120xbf16>
    %cst_14 = arith.constant dense<0.000000e+00> : vector<121x256xf32>
    %23 = tpu.matmul %22, %6, %cst_14 {dimension_numbers = #tpu.dot_dimension_numbers<[1], [0], [0], [1], [0, 0, 1, 1], [], []>} : vector<121x120xbf16>, vector<120x256xbf16>, vector<121x256xf32> -> vector<121x256xf32>
    %c0_15 = arith.constant 0 : index
    %c0_16 = arith.constant 0 : index
    %24 = vector.load %arg8[%c0_15, %c0_16] : memref<121x1xf32, #tpu.memory_space<vmem>>, vector<121x1xf32>
    %25 = vector.broadcast %24 : vector<121x1xf32> to vector<121x256xf32>
    %26 = arith.addf %23, %25 : vector<121x256xf32>
    %27 = arith.truncf %26 : vector<121x256xf32> to vector<121x256xbf16>
    %cst_17 = arith.constant dense<0.000000e+00> : vector<121x256xf32>
    %28 = tpu.matmul %27, %21, %cst_17 {dimension_numbers = #tpu.dot_dimension_numbers<[1], [1], [0], [0], [0, 0, 1, 0], [], []>} : vector<121x256xbf16>, vector<256x256xbf16>, vector<121x256xf32> -> vector<121x256xf32>
    %29 = vector.extract_strided_slice %28 {offsets = [120, 0], sizes = [1, 256], strides = [1, 1]} : vector<121x256xf32> to vector<1x256xf32>
    %30 = tpu.reciprocal %29 {approx = true} : vector<1x256xf32> -> vector<1x256xf32>
    %31 = vector.extract_strided_slice %28 {offsets = [0, 0], sizes = [120, 256], strides = [1, 1]} : vector<121x256xf32> to vector<120x256xf32>
    %32 = vector.broadcast %30 : vector<1x256xf32> to vector<120x256xf32>
    %33 = arith.mulf %31, %32 : vector<120x256xf32>
    %c0_18 = arith.constant 0 : index
    %c0_19 = arith.constant 0 : index
    %c0_20 = arith.constant 0 : index
    %34 = vector.load %arg4[%c0_18, %c0_19, %c0_20] : memref<1x12x2560xbf16, #tpu.memory_space<vmem>>, vector<1x12x2560xbf16>
    %35 = vector.shape_cast %34 : vector<1x12x2560xbf16> to vector<12x2560xbf16>
    %cst_21 = arith.constant dense<0.000000e+00> : vector<12x12xf32>
    %36 = tpu.matmul %35, %35, %cst_21 {dimension_numbers = #tpu.dot_dimension_numbers<[1], [1], [0], [0], [0, 0, 1, 0], [], []>} : vector<12x2560xbf16>, vector<12x2560xbf16>, vector<12x12xf32> -> vector<12x12xf32>
    %cst_22 = arith.constant dense<0xFF800000> : vector<12xf32>
    %37 = vector.multi_reduction <maximumf>, %36, %cst_22 [1] : vector<12x12xf32> to vector<12xf32>
    %38 = vector.shape_cast %37 : vector<12xf32> to vector<12x1xf32>
    %39 = vector.broadcast %38 : vector<12x1xf32> to vector<12x12xf32>
    %40 = arith.subf %39, %36 : vector<12x12xf32>
    %cst_23 = arith.constant dense<0xFF800000> : vector<12xf32>
    %41 = vector.multi_reduction <maximumf>, %40, %cst_23 [1] : vector<12x12xf32> to vector<12xf32>
    %42 = vector.shape_cast %41 : vector<12xf32> to vector<12x1xf32>
    %43 = vector.broadcast %42 : vector<12x1xf32> to vector<12x12xf32>
    %44 = arith.subf %40, %43 : vector<12x12xf32>
    %45 = math.exp %44 : vector<12x12xf32>
    %cst_24 = arith.constant dense<0.000000e+00> : vector<12xf32>
    %46 = vector.multi_reduction <add>, %45, %cst_24 [1] : vector<12x12xf32> to vector<12xf32>
    %47 = vector.shape_cast %46 : vector<12xf32> to vector<12x1xf32>
    %48 = tpu.reciprocal %47 {approx = true} : vector<12x1xf32> -> vector<12x1xf32>
    %49 = vector.broadcast %48 : vector<12x1xf32> to vector<12x12xf32>
    %50 = arith.mulf %45, %49 : vector<12x12xf32>
    %c0_25 = arith.constant 0 : index
    %c0_26 = arith.constant 0 : index
    %51 = vector.load %arg9[%c0_25, %c0_26] : memref<120x12xf32, #tpu.memory_space<vmem>>, vector<120x12xf32>
    %cst_27 = arith.constant dense<0.000000e+00> : vector<120x12xf32>
    %52 = tpu.matmul %51, %50, %cst_27 {dimension_numbers = #tpu.dot_dimension_numbers<[1], [0], [0], [1], [0, 0, 1, 1], [], []>} : vector<120x12xf32>, vector<12x12xf32>, vector<120x12xf32> -> vector<120x12xf32>
    %cst_28 = arith.constant dense<0.000000e+00> : vector<120x120xf32>
    %53 = tpu.matmul %52, %51, %cst_28 {dimension_numbers = #tpu.dot_dimension_numbers<[1], [1], [0], [0], [0, 0, 1, 0], [], []>} : vector<120x12xf32>, vector<120x12xf32>, vector<120x120xf32> -> vector<120x120xf32>
    %c0_29 = arith.constant 0 : index
    %c0_30 = arith.constant 0 : index
    %54 = vector.load %arg10[%c0_29, %c0_30] : memref<120x120xf32, #tpu.memory_space<vmem>>, vector<120x120xf32>
    %55 = arith.mulf %53, %54 : vector<120x120xf32>
    %56 = arith.truncf %55 : vector<120x120xf32> to vector<120x120xbf16>
    %cst_31 = arith.constant dense<0.000000e+00> : vector<120x256xf32>
    %57 = tpu.matmul %56, %7, %cst_31 {dimension_numbers = #tpu.dot_dimension_numbers<[1], [0], [0], [1], [0, 0, 1, 1], [], []>} : vector<120x120xbf16>, vector<120x256xbf16>, vector<120x256xf32> -> vector<120x256xf32>
    %58 = vector.broadcast %0 : f32 to vector<120x256xf32>
    %59 = arith.mulf %58, %33 : vector<120x256xf32>
    %60 = vector.broadcast %1 : f32 to vector<120x256xf32>
    %61 = arith.mulf %60, %57 : vector<120x256xf32>
    %62 = arith.addf %59, %61 : vector<120x256xf32>
    %63 = arith.addf %62, %3 : vector<120x256xf32>
    %64 = arith.addf %63, %5 : vector<120x256xf32>
    %c0_32 = arith.constant 0 : index
    %c0_33 = arith.constant 0 : index
    %c0_34 = arith.constant 0 : index
    %65 = vector.load %arg11[%c0_32, %c0_33, %c0_34] : memref<1x120x256xf32, #tpu.memory_space<vmem>>, vector<1x120x256xf32>
    %66 = vector.shape_cast %65 : vector<1x120x256xf32> to vector<120x256xf32>
    %67 = vector.shape_cast %64 : vector<120x256xf32> to vector<1x120x256xf32>
    tpu.vector_store %arg11[%c0_32, %c0_33, %c0_34], %67 {strides = array<i32>} : memref<1x120x256xf32, #tpu.memory_space<vmem>>, vector<1x120x256xf32>,
    return
  }
  func.func @transform_0(%arg0: i32) -> i32 {
    %c0_i32 = arith.constant 0 : i32
    %c0_i32_0 = arith.constant 0 : i32
    return %c0_i32 : i32
  }
  func.func @transform_1(%arg0: i32) -> (i32, i32, i32) {
    %c0_i32 = arith.constant 0 : i32
    %c0_i32_0 = arith.constant 0 : i32
    %c0_i32_1 = arith.constant 0 : i32
    return %arg0, %c0_i32, %c0_i32_0 : i32, i32, i32
  }
  func.func @transform_2(%arg0: i32) -> (i32, i32, i32) {
    %c0_i32 = arith.constant 0 : i32
    %c0_i32_0 = arith.constant 0 : i32
    %c0_i32_1 = arith.constant 0 : i32
    return %arg0, %c0_i32, %c0_i32_0 : i32, i32, i32
  }
  func.func @transform_3(%arg0: i32) -> (i32, i32, i32) {
    %c0_i32 = arith.constant 0 : i32
    %c0_i32_0 = arith.constant 0 : i32
    %c0_i32_1 = arith.constant 0 : i32
    return %arg0, %c0_i32, %c0_i32_0 : i32, i32, i32
  }
  func.func @transform_4(%arg0: i32) -> (i32, i32) {
    %c0_i32 = arith.constant 0 : i32
    %c0_i32_0 = arith.constant 0 : i32
    %c0_i32_1 = arith.constant 0 : i32
    return %c0_i32, %c0_i32_0 : i32, i32
  }
  func.func @transform_5(%arg0: i32) -> (i32, i32) {
    %c0_i32 = arith.constant 0 : i32
    %c0_i32_0 = arith.constant 0 : i32
    %c0_i32_1 = arith.constant 0 : i32
    return %c0_i32, %c0_i32_0 : i32, i32
  }
  func.func @transform_6(%arg0: i32) -> (i32, i32) {
    %c0_i32 = arith.constant 0 : i32
    %c0_i32_0 = arith.constant 0 : i32
    %c0_i32_1 = arith.constant 0 : i32
    return %c0_i32, %c0_i32_0 : i32, i32
  }
  func.func @transform_7(%arg0: i32) -> (i32, i32) {
    %c0_i32 = arith.constant 0 : i32
    %c0_i32_0 = arith.constant 0 : i32
    %c0_i32_1 = arith.constant 0 : i32
    return %c0_i32, %c0_i32_0 : i32, i32
  }
  func.func @transform_8(%arg0: i32) -> (i32, i32) {
    %c0_i32 = arith.constant 0 : i32
    %c0_i32_0 = arith.constant 0 : i32
    %c0_i32_1 = arith.constant 0 : i32
    return %c0_i32, %c0_i32_0 : i32, i32
  }
  func.func @transform_9(%arg0: i32) -> (i32, i32) {
    %c0_i32 = arith.constant 0 : i32
    %c0_i32_0 = arith.constant 0 : i32
    %c0_i32_1 = arith.constant 0 : i32
    return %c0_i32, %c0_i32_0 : i32, i32
  }
  func.func @transform_10(%arg0: i32) -> (i32, i32, i32) {
    %c0_i32 = arith.constant 0 : i32
    %c0_i32_0 = arith.constant 0 : i32
    %c0_i32_1 = arith.constant 0 : i32
    return %arg0, %c0_i32, %c0_i32_0 : i32, i32, i32
  }
}

</mosaic_0001>

<bundles_post_ra>
// kernel: tpu_custom_call.1
= control target key start
LH: loop header
LB: loop body
LE: loop exit
PB: predicated region body
PF: predicated region fallthrough
CT: control target
= control target key end

     0   :  { %15 = vsyncpa [#allocation5], 0  ;;  %s5825_s0 = inlined_call_operand.hbm [shape: f32[2], index: 0, kind: input, shape index: {}]   ;;  %s5826_s1 = inlined_call_operand.vmem [shape: f32[2,120,256], index: 1, kind: input, shape index: {}]   ;;  %s5827_s2 = inlined_call_operand.vmem [shape: f32[2,120,256], index: 2, kind: input, shape index: {}]   ;;  %s5828_s3 = inlined_call_operand.vmem [shape: bf16[2,12,2560], index: 3, kind: input, shape index: {}]   ;;  %s5829_s4 = inlined_call_operand.hbm [shape: bf16[24,120], index: 4, kind: input, shape index: {}]   ;;  %s5830_s5 = inlined_call_operand.vmem [shape: f32[24,1], index: 5, kind: input, shape index: {}]   ;;  %s5831_s6 = inlined_call_operand.vmem [shape: bf16[121,120], index: 6, kind: input, shape index: {}]   ;;  %s5832_s7 = inlined_call_operand.vmem [shape: f32[121,1], index: 7, kind: input, shape index: {}]   ;;  %s5833_s8 = inlined_call_operand.vmem [shape: f32[120,12], index: 8, kind: input, shape index: {}]   ;;  %s5834_s9 = inlined_call_operand.hbm [shape: f32[120,120], index: 9, kind: input, shape index: {}]   ;;  %s5835_s10 = inlined_call_operand.hbm [shape: f32[2,120,256], index: 10, kind: output, shape index: {}]  }
   0x1   :  { %16 = vsyncpa [#allocation3], 0 }
   0x2   :  { %17 = vsyncpa [#allocation8], 0 }
   0x3   :  { %18 = vsyncpa [#allocation4], 0 }
   0x4   :  { %20 = vsyncpa [#allocation4 + $0x1], 0  ;;  %s4190_s13 = smov 0   ;;  %s4192_s14 = smov 0  }
   0x5   :  { %s4194_s15 = smov 0   ;;  %s4196_s16 = smov 0  }
   0x6 LB: > { %5892 = sst [smem:[#allocation14_spill]] %s4106_s13  ;;  %s4211_s17 = sadd.s32 4294967295, %s4118_s16   ;;  %s4118_s16 = sphi %s4196_s16, %s6052_s16   ;;  %s4114_s15 = sphi %s4194_s15, %s6054_s15   ;;  %s4110_s14 = sphi %s4192_s14, %s6056_s14   ;;  %s4106_s13 = sphi %s4190_s13, %s6055_s13  }
   0x7   : > { %5893 = sst [smem:[#allocation15_spill]] %s4114_s15  ;;  %s3285_s18 = sadd.s32 4294967294, %s4118_s16  }
   0x8   : > { %s4215_s19 = sadd.s32 1, %s4118_s16   ;;  %s258_s20 = sadd.s32 1, %s4114_s15 }
   0x9   : > { %5894 = sst [smem:[#allocation16_spill]] %s4215_s19  ;;  %s255_s21 = ssub.s32 %s4118_s16, %s4215_s19 }
   0xa   : > { %p268_p0 = scmp.ne.s32.totalorder %s4114_s15, %s4110_s14  ;;  %p256_p1 = scmp.eq.s32.totalorder %s255_s21, 0 }
   0xb   : > { %p269_p2 = scmp.eq.s32.totalorder %s4211_s17, 1  ;;  %p274_p3 = scmp.ne.s32.totalorder %s4110_s14, %s4106_s13 }
   0xc   : > { %p275_p4 = scmp.eq.s32.totalorder %s3285_s18, 1  ;;  %p3286_p7 = scmp.ge.s32.totalorder %s4118_s16, 1 }
   0xd   : > { %s4226_s22 = scalar_select %p256_p1, %s4114_s15, %s258_s20  }
   0xe   : > { %p4228_p5 = por %p269_p2, %p268_p0  ;;  %p4232_p6 = por %p275_p4, %p274_p3 }
   0xf   : > { %5895 = sst [smem:[#allocation17_spill]] %s4226_s22  ;;  %p282_p8 = scmp.lt.s32.totalorder %s4118_s16, 3 }
  0x10   : > { %s5897_s24 = scalar_select %p4232_p6, 1, 0 }
  0x11   : > { %p5841_p9 = scmp.eq.s32.totalorder %s4211_s17, 0  ;;  %p4239_p10 = pnand %p3286_p7, %p282_p8 }
  0x12   : > { %5898 = sst [smem:[#allocation18_spill]] %s5897_s24  ;;  %s4120_s26 = smov [#allocation6]  }
  0x13   : > { %p3696_p11 = pneg %p4239_p10  ;;  %s303_s27 = sshll.u32 %s4120_s26, 4  ;;  %s4245_s27 = int_to_ptr.vmem [resolvable:$true] %s303_s27 }
  0x14   : > { %s4121_s29 = smov [#allocation7]   ;;  %s3975_s18 = scalar_lea.hbm %s5825_s0, 16 }
  0x15   : > { %p4249_p12 = pnand %p5841_p9, %p3696_p11  ;;  %s328_s30 = sshll.u32 %s4121_s29, 4  ;;  %s4253_s30 = int_to_ptr.vmem [resolvable:$true] %s328_s30 }
  0x16   : > { %p3976_p13 = scmp.ne.s32.totalorder %s5825_s0, %s3975_s18  ;;  %p3982_p3 = scmp.lt.u32.totalorder %s3975_s18, %s5825_s0 }
  0x17   : > { %p4263_p0 = pneg %p4249_p12 }
  0x19   : > { %p3978_p1 = pnand %p4263_p0, %p3976_p13 }
  0x1b   : > { %p3979_p2 = pneg %p3978_p1 }
  0x1d   : > { %p3984_p4 = pnand %p3982_p3, %p3979_p2 }
  0x1f   : > { %3987 = shalt.err (!%p3984_p4)
}
  0x20   : > { %s4122_s11 = smov [#allocation2]   ;;  %s3988_s19 = scalar_lea.hbm %s5829_s4, 192 }
  0x21   : > { %3699 = dma.hbm_to_smem (!%p4249_p12), %s5825_s0, 16, %s4122_s11, [#allocation5]  }
  0x22   : > { %p3989_p7 = scmp.ne.s32.totalorder %s5829_s4, %s3988_s19  ;;  %p3995_p13 = scmp.lt.u32.totalorder %s3988_s19, %s5829_s4 }
  0x24   : > { %p3991_p8 = pnand %p3989_p7, %p4263_p0 }
  0x26   : > { %p3992_p11 = pneg %p3991_p8 }
  0x28   : > { %p3997_p1 = pnand %p3995_p13, %p3992_p11 }
  0x2a   : > { %4000 = shalt.err (!%p3997_p1)
}
  0x2b   : > { %s4001_s29 = scalar_lea.vmem %s4245_s27, 192  ;;  %p4009_p9 = scmp.lt.s32.totalorder %s4245_s27, %s4245_s27 }
  0x2c   : > { %p4002_p2 = scmp.ne.s32.totalorder %s4245_s27, %s4001_s29  ;;  %p4010_p6 = scmp.lt.s32.totalorder %s4001_s29, %s4001_s29 }
  0x2e   : > { %p4004_p3 = pnand %p4002_p2, %p4263_p0  ;;  %p4011_p7 = por %p4010_p6, %p4009_p9 }
  0x30   : > { %p4005_p4 = pneg %p4004_p3 }
  0x32   : > { %p4012_p8 = pnand %p4011_p7, %p4005_p4 }
  0x34   : > { %4015 = shalt.err (!%p4012_p8)
}
  0x35   : > { %s4123_s13 = smov 64   ;;  %s4124_s15 = smov 4  }
  0x36   : > { %3702 = dma.hbm_to_vmem [thread:$0]  (!%p4249_p12), %s5829_s4, 192, %s4245_s27, [#allocation3], %s4123_s13, %s4123_s13, %s4124_s15  }
  0x37   : > { %s4016_s20 = scalar_lea.hbm %s5834_s9, 1920 }
  0x38   : > { %p4017_p6 = scmp.ne.s32.totalorder %s5834_s9, %s4016_s20  ;;  %p4023_p13 = scmp.lt.u32.totalorder %s4016_s20, %s5834_s9 }
  0x3a   : > { %p4019_p9 = pnand %p4017_p6, %p4263_p0 }
  0x3c   : > { %p4020_p11 = pneg %p4019_p9 }
  0x3e   : > { %p4025_p1 = pnand %p4023_p13, %p4020_p11 }
  0x40   : > { %4028 = shalt.err (!%p4025_p1)
}
  0x41   : > { %s4029_s27 = scalar_lea.vmem %s4253_s30, 1920  ;;  %p4037_p7 = scmp.lt.s32.totalorder %s4253_s30, %s4253_s30 }
  0x42   : > { %p4030_p2 = scmp.ne.s32.totalorder %s4253_s30, %s4029_s27  ;;  %p4038_p8 = scmp.lt.s32.totalorder %s4029_s27, %s4029_s27 }
  0x44   : > { %p4032_p3 = pnand %p4030_p2, %p4263_p0  ;;  %p4039_p6 = por %p4038_p8, %p4037_p7 }
  0x46   : > { %p4033_p4 = pneg %p4032_p3 }
  0x48   : > { %p4040_p9 = pnand %p4039_p6, %p4033_p4 }
  0x4a   : > { %4043 = shalt.err (!%p4040_p9)
}
  0x4b   : > { %s4125_s13 = smov 128   ;;  %s4126_s15 = smov 8  }
  0x4c   : > { %3705 = dma.hbm_to_vmem [thread:$0]  (!%p4249_p12), %s5834_s9, 1920, %s4253_s30, [#allocation8], %s4125_s13, %s4125_s13, %s4126_s15  }
  0x4d   : > { %368 = sbr.rel (%p4239_p10) target bundleno = 1827 (0x723), region = 60 }
  0x54   : > { %p5902_p0 = scmp.eq.s32.totalorder %s4211_s17, 0 }
  0x56   : > { %4089 = dma.done.wait (%p5902_p0), [#allocation5], 16   ;;  %p5903_p11 = pmov %p5902_p0 }
  0x57   : > { %p5904_p13 = pmov %p5902_p0 }
  0x58   : > { %4091 = vsyncadd (%p5903_p11), [#allocation5], 4294967280 }
  0x59   : > { %4093 = dma.done.wait (%p5904_p13), [#allocation3], 192   ;;  %p5905_p1 = pmov %p5902_p0 }
  0x5a   : > { %p5906_p2 = pmov %p5902_p0 }
  0x5b   : > { %4095 = vsyncadd (%p5905_p1), [#allocation3], 4294967104 }
  0x5c   : > { %4097 = dma.done.wait (%p5906_p2), [#allocation8], 1920   ;;  %p5907_p12 = pmov %p5902_p0 }
  0x5e   : > { %4099 = vsyncadd (%p5907_p12), [#allocation8], 4294965376 }
  0x5f   : > { %382 = sfence }
  0x60   : > { %p425_p10 = scmp.lt.s32.totalorder %s4211_s17, 1  ;;  %v5842_v0 = vmov 0   ;;  %v538_v27 = vld [vmem:[%s5830_s5] sm:$0xff]  ;;  %v539_v32 = vld [vmem:[%s5830_s5 + $0x8] sm:$0xff]  ;;  %v540_v34 = vld [vmem:[%s5830_s5 + $0x10] sm:$0xff]  ;;  %vm571_vm0 = vcmask 1043456  }
  0x61   : > { %610 = vmatprep.mubr.bf16.mxu0 %v5842_v0  ;;  %3763 = vset.pattern.permute.xlu0 %v5842_v0  ;;  %v3765_v51 = vld [vmem:[#allocation6] sm:$0xff]   ;;  %vm564_vm1 = vcmask 982016   ;;  %v3766_v52 = vld [vmem:[#allocation6 + $0x8] ss:$0 sps:$4 sm:$0xff]   ;;  %v3769_v58 = vld [vmem:[%s5831_s6 + $0x10] sm:$0xff]   ;;  %vm4129_vm2 = vmmov 1  }
  0x62   : > { %s4341_s25 = scalar_select %p425_p10, %s4211_s17, 1  ;;  %3764 = vset.pattern.permute.xlu1 %v5842_v0  ;;  %543 = vperm.xlu0 %3763, %v538_v27   ;;  %v3767_v54 = vld [vmem:[%s5831_s6] sm:$0xff]   ;;  %v3768_v57 = vld [vmem:[%s5831_s6 + $0x8] sm:$0xff]   ;;  %v3770_v59 = vld [vmem:[%s5831_s6 + $0x18] sm:$0xff]   ;;  %vm705_vm4 = vcmask 97280   ;;  %vm2374_vm5 = vcmask 93184  }
  0x63   : > { %553 = vperm.xlu1 %3764, %v540_v34   ;;  %v3771_v60 = vld [vmem:[%s5831_s6 + $0x20] sm:$0xff]   ;;  %v3772_v61 = vld [vmem:[%s5831_s6 + $0x28] sm:$0xff]   ;;  %v3773_v62 = vld [vmem:[%s5831_s6 + $0x30] sm:$0xff]   ;;  %vm4131_vm6 = vmmov 0   ;;  %s3681_s22 = smul.u32 3840, %s4211_s17  ;;  %s4132_s19 = smov [#allocation9]  }
  0x64   : > { %s3679_s28 = smul.u32 240, %s4341_s25  ;;  %v3774_v63 = vld [vmem:[%s5831_s6 + $0x38] sm:$0x1f]   ;;  %vm4488_vm3 = vmpackc.low %vm571_vm0, %vm4129_vm2  ;;  %s4048_s24 = sshll.u32 %s4132_s19, 4  ;;  %s4049_s24 = int_to_ptr.vmem [resolvable:$false] %s4048_s24 }
  0x65   : > { %s3680_s12 = smul.u32 160, %s4341_s25  ;;  %vm5223_vm7 = vmpackc.low %vm705_vm4, %vm705_vm4  ;;  %s441_s25 = sld [smem:[#allocation2]] }
  0x66   : > { %s4350_s11 = scalar_lea.vmem %s5826_s1, %s3679_s28  ;;  %548 = vperm.xlu0 %3763, %v539_v32   ;;  %s5775_s15 = scalar_lea.hbm %s5835_s10, %s3681_s22 }
  0x67   : > { %v444_v1 = vld [vmem:[%s4350_s11 + $0x8] sm:$0xff]  ;;  %v446_v2 = vld [vmem:[%s4350_s11 + $0x18] sm:$0xff]  ;;  %v443_v3 = vld [vmem:[%s4350_s11] sm:$0xff]  ;;  %s4395_s29 = scalar_lea.vmem %s5828_s3, %s3680_s12  ;;  %s5304_s12 = scalar_lea.vmem %s5827_s2, %s3679_s28 }
  0x68   : > { %v4355_v4 = vpack.c.bf16 %v446_v2, %v444_v1  ;;  %v445_v5 = vld [vmem:[%s4350_s11 + $0x10] sm:$0xff]  ;;  %v448_v6 = vld [vmem:[%s4350_s11 + $0x28] sm:$0xff]  ;;  %v450_v7 = vld [vmem:[%s4350_s11 + $0x38] sm:$0xff]  ;;  %s3298_s28 = sld [smem:[#allocation2 + $0x1]]  ;;  %s4050_s30 = scalar_lea.vmem %s4049_s24, 7680 }
  0x69   : > { %v4360_v8 = vpack.c.bf16 %v445_v5, %v443_v3  ;;  %v4362_v9 = vpack.c.bf16 %v450_v7, %v448_v6  ;;  %v447_v10 = vld [vmem:[%s4350_s11 + $0x20] sm:$0xff]  ;;  %v449_v11 = vld [vmem:[%s4350_s11 + $0x30] sm:$0xff]  ;;  %v452_v12 = vld [vmem:[%s4350_s11 + $0x48] sm:$0xff] }
  0x6a   : > { %578 = vmatprep.subr.bf16.mxu0 %v4355_v4  ;;  %v454_v13 = vld [vmem:[%s4350_s11 + $0x58] sm:$0xff]  ;;  %v4370_v14 = vpack.c.bf16 %v449_v11, %v447_v10  ;;  %v451_v16 = vld [vmem:[%s4350_s11 + $0x40] sm:$0xff]  ;;  %v453_v17 = vld [vmem:[%s4350_s11 + $0x50] sm:$0xff] }
  0x6b   : > { %579 = vmatpush1.bf16.msra.mxu0 %v4360_v8  ;;  %v4373_v15 = vpack.c.bf16 %v454_v13, %v452_v12  ;;  %v456_v18 = vld [vmem:[%s4350_s11 + $0x68] sm:$0xff]  ;;  %v458_v19 = vld [vmem:[%s4350_s11 + $0x78] sm:$0xff]  ;;  %v507_v20 = vpack.c.bf16 %v453_v17, %v451_v16  ;;  %v455_v22 = vld [vmem:[%s4350_s11 + $0x60] sm:$0xff] }
  0x6c   : > { %580 = vmatprep.subr.bf16.mxu0 %v4362_v9  ;;  %v510_v21 = vpack.c.bf16 %v458_v19, %v456_v18  ;;  %v457_v23 = vld [vmem:[%s4350_s11 + $0x70] sm:$0xff]  ;;  %v460_v24 = vld [vmem:[%s4350_s11 + $0x88] sm:$0xff]  ;;  %v462_v25 = vld [vmem:[%s4350_s11 + $0x98] sm:$0xff]  ;;  %v5844_v18 = vmov 0.0  }
  0x6d   : > { %v459_v26 = vld [vmem:[%s4350_s11 + $0x80] sm:$0xff]  ;;  %v509_v28 = vpack.c.bf16 %v457_v23, %v455_v22  ;;  %v461_v29 = vld [vmem:[%s4350_s11 + $0x90] sm:$0xff]  ;;  %v464_v30 = vld [vmem:[%s4350_s11 + $0xa8] sm:$0xff]  ;;  %v512_v31 = vpack.c.bf16 %v462_v25, %v460_v24  ;;  %870 = vmatprep.mubr.f32.mxu1 %v5844_v18 }
  0x6e   : > { %v466_v33 = vld [vmem:[%s4350_s11 + $0xb8] sm:$0xff]  ;;  %v511_v35 = vpack.c.bf16 %v461_v29, %v459_v26  ;;  %v463_v36 = vld [vmem:[%s4350_s11 + $0xa0] sm:$0xff]  ;;  %v465_v37 = vld [vmem:[%s4350_s11 + $0xb0] sm:$0xff] }
  0x6f   : > { %581 = vmatpush1.bf16.msra.mxu0 %v4370_v14  ;;  %v514_v38 = vpack.c.bf16 %v466_v33, %v464_v30  ;;  %v468_v39 = vld [vmem:[%s4350_s11 + $0xc8] sm:$0xff]  ;;  %v470_v40 = vld [vmem:[%s4350_s11 + $0xd8] sm:$0xff]  ;;  %v467_v41 = vld [vmem:[%s4350_s11 + $0xc0] sm:$0xff]  ;;  %v513_v43 = vpack.c.bf16 %v465_v37, %v463_v36 }
  0x70   : > { %582 = vmatprep.subr.bf16.mxu0 %v4373_v15  ;;  %v469_v42 = vld [vmem:[%s4350_s11 + $0xd0] sm:$0xff]  ;;  %v472_v44 = vld [vmem:[%s4350_s11 + $0xe8] sm:$0xff]  ;;  %v471_v45 = vld [vmem:[%s4350_s11 + $0xe0] sm:$0xff]  ;;  %v516_v46 = vpack.c.bf16 %v470_v40, %v468_v39 }
  0x71   : > { %v515_v47 = vpack.c.bf16 %v469_v42, %v467_v41  ;;  %v518_v48 = vpack.c.bf16 %v472_v44, %v472_v44  ;;  %v517_v49 = vpack.c.bf16 %v471_v45, %v471_v45  ;;  %v3777_v53 = vld [vmem:[%s4395_s29 + $0x4] ss:$80 sps:$4 sm:$0x3f]   ;;  %v3775_v55 = vld [vmem:[%s4395_s29] ss:$80 sps:$4 sm:$0x3f]  }
  0x72   : > { %v3780_v56 = vld [vmem:[%s4395_s29 + $0xc] ss:$80 sps:$4 sm:$0x3f]   ;;  %v3778_v1 = vld [vmem:[%s4395_s29 + $0x8] ss:$80 sps:$4 sm:$0x3f]  }
  0x73   : > { %583 = vmatpush1.bf16.msra.mxu0 %v507_v20  ;;  %v573_v50 = vsel %vm571_vm0, %v517_v49, 0  ;;  %v3783_v2 = vld [vmem:[%s4395_s29 + $0x14] ss:$80 sps:$4 sm:$0x3f]  }
  0x74   : > { %584 = vmatprep.subr.bf16.mxu0 %v510_v21  ;;  %v3781_v3 = vld [vmem:[%s4395_s29 + $0x10] ss:$80 sps:$4 sm:$0x3f]   ;;  %v3784_v5 = vld [vmem:[%s4395_s29 + $0x18] ss:$80 sps:$4 sm:$0x3f]  }
  0x75   : > { %v3789_v6 = vld [vmem:[%s4395_s29 + $0x24] ss:$80 sps:$4 sm:$0x3f]   ;;  %v3787_v7 = vld [vmem:[%s4395_s29 + $0x20] ss:$80 sps:$4 sm:$0x3f]  }
  0x76   : > { %v3795_v10 = vld [vmem:[%s4395_s29 + $0x34] ss:$80 sps:$4 sm:$0x3f]   ;;  %v3793_v11 = vld [vmem:[%s4395_s29 + $0x30] ss:$80 sps:$4 sm:$0x3f]  }
  0x77   : > { %585 = vmatpush1.bf16.msra.mxu0 %v509_v28  ;;  %v3798_v12 = vld [vmem:[%s4395_s29 + $0x3c] ss:$80 sps:$4 sm:$0x3f]   ;;  %v3796_v13 = vld [vmem:[%s4395_s29 + $0x38] ss:$80 sps:$4 sm:$0x3f]  }
  0x78   : > { %586 = vmatprep.subr.bf16.mxu0 %v512_v31  ;;  %v3804_v16 = vld [vmem:[%s4395_s29 + $0x4c] ss:$80 sps:$4 sm:$0x3f]   ;;  %v3802_v17 = vld [vmem:[%s4395_s29 + $0x48] ss:$80 sps:$4 sm:$0x3f]  }
  0x7b   : > { %587 = vmatpush1.bf16.msra.mxu0 %v511_v35 }
  0x7c   : > { %588 = vmatprep.subr.bf16.mxu0 %v514_v38 }
  0x7f   : > { %589 = vmatpush1.bf16.msra.mxu0 %v513_v43 }
  0x80   : > { %590 = vmatprep.subr.bf16.mxu0 %v516_v46 }
  0x83   : > { %591 = vmatpush1.bf16.msra.mxu0 %v515_v47 }
  0x84   : > { %3301 = vmatprep.subr.msk.bf16.mxu0 %vm571_vm0, %v518_v48 }
  0x87   : > { %593 = vmatpush1.bf16.msra.mxu0 %v573_v50 }
  0x88   : > { %1559 = vmatprep.subr.bf16.mxu0 %v4355_v4  ;;  %v3786_v4 = vld [vmem:[%s4395_s29 + $0x1c] ss:$80 sps:$4 sm:$0x3f]  }
  0x8a   : > { %3302 = vmatmul.mubr.msk.bf16.vlgmr.msra.gmra.mrb[0].mxu0 %vm564_vm1, %v3765_v51 }
  0x8b   : > { %1560 = vmatpush1.bf16.msra.mxu0 %v4360_v8  ;;  %620 = vmatprep.mubr.bf16.mxu0 %v5842_v0  ;;  %v3792_v8 = vld [vmem:[%s4395_s29 + $0x2c] ss:$80 sps:$4 sm:$0x3f]  }
  0x8c   : > { %1561 = vmatprep.subr.bf16.mxu0 %v4362_v9  ;;  %v3790_v9 = vld [vmem:[%s4395_s29 + $0x28] ss:$80 sps:$4 sm:$0x3f]  }
  0x8f   : > { %1562 = vmatpush1.bf16.msra.mxu0 %v4370_v14  ;;  %v3801_v14 = vld [vmem:[%s4395_s29 + $0x44] ss:$80 sps:$4 sm:$0x3f]  }
  0x90   : > { %1563 = vmatprep.subr.bf16.mxu0 %v4373_v15  ;;  %v3799_v15 = vld [vmem:[%s4395_s29 + $0x40] ss:$80 sps:$4 sm:$0x3f]   ;;  %s422_s29 = sand.u32 1, %s4110_s14  }
  0x91   : > { %s3678_s20 = smul.u32 240, %s422_s29  ;;  %s5784_s17 = scalar_lea.sflag [#allocation4], %s422_s29 }
  0x92   : > { %3303 = vmatmul.mubr.msk.bf16.gmra.mrb[4].mxu0 %vm564_vm1, %v3766_v52 }
  0x93   : > { %1564 = vmatpush1.bf16.msra.mxu0 %v507_v20  ;;  %1591 = vmatprep.mubr.bf16.mxu0 %v5842_v0  ;;  %s5609_s21 = scalar_lea.vmem [#allocation9], %s3678_s20 }
  0x94   : > { %1565 = vmatprep.subr.bf16.mxu0 %v510_v21  ;;  %s3165_s18 = sshll.u32 %s5609_s21, 4  ;;  %s5778_s18 = int_to_ptr.vmem [resolvable:$true] %s3165_s18 }
  0x95   : > { %p4051_p8 = scmp.lt.s32.totalorder %s5778_s18, %s4049_s24 }
  0x97   : > { %1566 = vmatpush1.bf16.msra.mxu0 %v509_v28 }
  0x98   : > { %1567 = vmatprep.subr.bf16.mxu0 %v512_v31 }
  0x9b   : > { %1568 = vmatpush1.bf16.msra.mxu0 %v511_v35 }
  0x9c   : > { %1569 = vmatprep.subr.bf16.mxu0 %v514_v38 }
  0x9f   : > { %1570 = vmatpush1.bf16.msra.mxu0 %v513_v43  ;;  %v5908_v43 = vmov 0 }
  0xa0   : > { %1571 = vmatprep.subr.bf16.mxu0 %v516_v46  ;;  %v5909_v43 = vsel %vm4488_vm3, 4294967295, %v5908_v43 }
  0xa1   : > { %5910 = vst [vmem:[#allocation19_spill] sm:$0xff] %v5909_v43 }
  0xa3   : > { %1572 = vmatpush1.bf16.msra.mxu0 %v515_v47 }
  0xa4   : > { %3346 = vmatprep.subr.msk.bf16.mxu0 %vm571_vm0, %v518_v48 }
  0xa7   : > { %1574 = vmatpush1.bf16.msra.mxu0 %v573_v50 }
  0xa8   : > { %1961 = vmatprep.subr.bf16.mxu0 %v3777_v53 }
  0xaa   : > { %3347 = vmatmul.mubr.msk.bf16.vlgmr.msra.gmra.mrb[8].mxu0 %vm564_vm1, %v3767_v54 }
  0xab   : > { %1601 = vmatprep.mubr.bf16.mxu0 %v5842_v0 }
  0xb0   : > { %1962 = vmatpush1.bf16.xpose.msra.mxu0 %v3775_v55 }
  0xb1   : > { %2002 = vmatprep.subr.bf16.mxu0 %v3780_v56 }
  0xb2   : > { %3348 = vmatmul.mubr.msk.bf16.gmra.mrb[12].mxu0 %vm564_vm1, %v3768_v57 }
  0xb3   : > { %1611 = vmatprep.mubr.bf16.mxu0 %v5842_v0 }
  0xba   : > { %3349 = vmatmul.mubr.msk.bf16.gmra.mrb[16].mxu0 %vm564_vm1, %v3769_v58 }
  0xbb   : > { %1621 = vmatprep.mubr.bf16.mxu0 %v5842_v0 }
  0xc2   : > { %3350 = vmatmul.mubr.msk.bf16.gmra.mrb[20].mxu0 %vm564_vm1, %v3770_v59 }
  0xc3   : > { %1631 = vmatprep.mubr.bf16.mxu0 %v5842_v0 }
  0xca   : > { %3351 = vmatmul.mubr.msk.bf16.gmra.mrb[24].mxu0 %vm564_vm1, %v3771_v60 }
  0xcb   : > { %1641 = vmatprep.mubr.bf16.mxu0 %v5842_v0 }
  0xd2   : > { %3352 = vmatmul.mubr.msk.bf16.gmra.mrb[28].mxu0 %vm564_vm1, %v3772_v61 }
  0xd3   : > { %1651 = vmatprep.mubr.bf16.mxu0 %v5842_v0 }
  0xda   : > { %3353 = vmatmul.mubr.msk.bf16.gmra.mrb[32].mxu0 %vm564_vm1, %v3773_v62 }
  0xdb   : > { %1661 = vmatprep.mubr.bf16.mxu0 %v5842_v0 }
  0xe1   : > { %v544_v19 = vpop.permute.xlu0 %543 }
  0xe2   : > { %3354 = vmatmul.mubr.msk.bf16.gmra.mrb[36].mxu0 %vm564_vm1, %v3774_v63  ;;  %v554_v29 = vpop.permute.xlu1 %553 }
  0xe3   : > { %1993 = vmatprep.mubr.bf16.mxu0 %v3777_v53 }
  0xe5   : > { %v549_v26 = vpop.permute.xlu0 %548 }
  0xea   : > { %1994 = vmatmul.mubr.bf16.vlgmr.msra.gmra.mrb[40].mxu0 %v3775_v55 }
  0xeb   : > { %2003 = vmatpush1.bf16.xpose.msra.mxu0 %v3778_v1  ;;  %2034 = vmatprep.mubr.bf16.mxu0 %v3780_v56 }
  0xec   : > { %2043 = vmatprep.subr.bf16.mxu0 %v3783_v2 }
  0xf6   : > { %2035 = vmatmul.mubr.bf16.vlgmr.msra.gmra.mrb[40].mxu0 %v3778_v1 }
  0xf7   : > { %2044 = vmatpush1.bf16.xpose.msra.mxu0 %v3781_v3  ;;  %2075 = vmatprep.mubr.bf16.mxu0 %v3783_v2 }
  0xf8   : > { %2084 = vmatprep.subr.bf16.mxu0 %v3786_v4 }
 0x102   : > { %2076 = vmatmul.mubr.bf16.vlgmr.msra.gmra.mrb[40].mxu0 %v3781_v3 }
 0x103   : > { %2085 = vmatpush1.bf16.xpose.msra.mxu0 %v3784_v5  ;;  %2116 = vmatprep.mubr.bf16.mxu0 %v3786_v4 }
 0x104   : > { %2125 = vmatprep.subr.bf16.mxu0 %v3789_v6 }
 0x10e   : > { %2117 = vmatmul.mubr.bf16.vlgmr.msra.gmra.mrb[40].mxu0 %v3784_v5 }
 0x10f   : > { %2126 = vmatpush1.bf16.xpose.msra.mxu0 %v3787_v7  ;;  %2157 = vmatprep.mubr.bf16.mxu0 %v3789_v6 }
 0x110   : > { %2166 = vmatprep.subr.bf16.mxu0 %v3792_v8 }
 0x11a   : > { %2158 = vmatmul.mubr.bf16.vlgmr.msra.gmra.mrb[40].mxu0 %v3787_v7 }
 0x11b   : > { %2167 = vmatpush1.bf16.xpose.msra.mxu0 %v3790_v9  ;;  %2198 = vmatprep.mubr.bf16.mxu0 %v3792_v8 }
 0x11c   : > { %2207 = vmatprep.subr.bf16.mxu0 %v3795_v10 }
 0x126   : > { %2199 = vmatmul.mubr.bf16.vlgmr.msra.gmra.mrb[40].mxu0 %v3790_v9 }
 0x127   : > { %2208 = vmatpush1.bf16.xpose.msra.mxu0 %v3793_v11  ;;  %2239 = vmatprep.mubr.bf16.mxu0 %v3795_v10 }
 0x128   : > { %2248 = vmatprep.subr.bf16.mxu0 %v3798_v12 }
 0x132   : > { %2240 = vmatmul.mubr.bf16.vlgmr.msra.gmra.mrb[40].mxu0 %v3793_v11 }
 0x133   : > { %2249 = vmatpush1.bf16.xpose.msra.mxu0 %v3796_v13  ;;  %2280 = vmatprep.mubr.bf16.mxu0 %v3798_v12  ;;  %v1400_v12 = vld [vmem:[%s5832_s7 + $0x8] sm:$0xff] }
 0x134   : > { %2289 = vmatprep.subr.bf16.mxu0 %v3801_v14 }
 0x13e   : > { %2281 = vmatmul.mubr.bf16.vlgmr.msra.gmra.mrb[40].mxu0 %v3796_v13 }
 0x13f   : > { %2290 = vmatpush1.bf16.xpose.msra.mxu0 %v3799_v15  ;;  %2321 = vmatprep.mubr.bf16.mxu0 %v3801_v14 }
 0x140   : > { %2330 = vmatprep.subr.bf16.mxu0 %v3804_v16 }
 0x14a   : > { %2322 = vmatmul.mubr.bf16.vlgmr.msra.gmra.mrb[40].mxu0 %v3799_v15  ;;  %v1401_v15 = vld [vmem:[%s5832_s7 + $0x10] sm:$0xff] }
 0x14b   : > { %2331 = vmatpush1.bf16.xpose.msra.mxu0 %v3802_v17  ;;  %2362 = vmatprep.mubr.bf16.mxu0 %v3804_v16  ;;  %v1403_v16 = vld [vmem:[%s5832_s7 + $0x20] sm:$0xff] }
 0x156   : > { %2363 = vmatmul.mubr.bf16.vlgmr.msra.gmra.mrb[40].mxu0 %v3802_v17  ;;  %v1399_v17 = vld [vmem:[%s5832_s7] sm:$0xff] }
 0x157   : > { %2890 = vmatprep.mubr.bf16.mxu0 %v5842_v0  ;;  %v1408_v0 = vld [vmem:[%s5832_s7 + $0x48] sm:$0xff] }
 0x15d   : > { %v612_v20 = vpop.f32.mrb[0].mxu0 }
 0x15e   : > { %v613_v21 = vadd.f32 %v612_v20, %v544_v19  ;;  %v614_v22 = vpop.f32.mrb[1].mxu0  ;;  %v1402_v20 = vld [vmem:[%s5832_s7 + $0x18] sm:$0xff] }
 0x15f   : > { %v615_v23 = vadd.f32 %v614_v22, %v544_v19  ;;  %v616_v24 = vpop.f32.mrb[2].mxu0  ;;  %v1405_v19 = vld [vmem:[%s5832_s7 + $0x30] sm:$0xff]  ;;  %v1406_v22 = vld [vmem:[%s5832_s7 + $0x38] sm:$0xff] }
 0x160   : > { %v618_v25 = vpop.f32.mrb[3].mxu0  ;;  %629 = vxpose.xlu1.b32.start [1/2] (short) %v613_v21, 128  ;;  %v617_v27 = vadd.f32 %v616_v24, %v549_v26  ;;  %v1404_v21 = vld [vmem:[%s5832_s7 + $0x28] sm:$0xff] }
 0x161   : > { %661 = vxpose.xlu0.b32.start [1/2] (short) %v615_v23, 128  ;;  %v619_v28 = vadd.f32 %v618_v25, %v549_v26 }
 0x162   : > { %v697_v35 = vrot.slane %v617_v27, 4 }
 0x163   : > { %v700_v38 = vrot.slane %v619_v28, 4 }
 0x164   : > { %630 = vxpose.xlu1.b32.end [2/2] (short) %v617_v27, 128 }
 0x165   : > { %v622_v30 = vpop.f32.mrb[4].mxu0  ;;  %662 = vxpose.xlu0.b32.end [2/2] (short) %v619_v28, 128 }
 0x166   : > { %v623_v31 = vadd.f32 %v622_v30, %v554_v29  ;;  %v624_v32 = vpop.f32.mrb[5].mxu0 }
 0x167   : > { %v625_v33 = vadd.f32 %v624_v32, %v554_v29  ;;  %v626_v34 = vpop.f32.mrb[6].mxu0 }
 0x168   : > { %v698_v36 = vrot.slane %v623_v31, 4  ;;  %v627_v37 = vpop.f32.mrb[7].mxu0 }
 0x169   : > { %v701_v39 = vrot.slane %v625_v33, 4 }
 0x16a   : > { %v699_v40 = vsel %vm571_vm0, %v697_v35, %v698_v36 }
 0x16b   : > { %v3607_v41 = vpack.c.bf16 %v698_v36, %v699_v40  ;;  %v702_v42 = vsel %vm571_vm0, %v700_v38, %v701_v39 }
 0x16c   : > { %v3604_v44 = vpack.c.bf16 %v701_v39, %v702_v42 }
 0x16e   : > { %3606 = vmatprep.subr.msk.bf16.mxu1 %vm4488_vm3, %v3604_v44 }
 0x16f   : > { %3609 = vmatpush1.bf16.msk.msra.mxu1 %vm4488_vm3, %v3607_v41 }
 0x17d   : > { %v4496_v45 = vpop.f32.mrb[8].mxu0 }
 0x17e   : > { %v4498_v46 = vpop.f32.mrb[9].mxu0 }
 0x17f   : > { %v4500_v47 = vpop.f32.mrb[10].mxu0 }
 0x180   : > { %v4502_v48 = vpop.f32.mrb[11].mxu0 }
 0x185   : > { %v4504_v49 = vpop.f32.mrb[12].mxu0 }
 0x186   : > { %v4506_v50 = vpop.f32.mrb[13].mxu0 }
 0x187   : > { %v4508_v51 = vpop.f32.mrb[14].mxu0 }
 0x188   : > { %v4510_v52 = vpop.f32.mrb[15].mxu0 }
 0x18d   : > { %v4512_v53 = vpop.f32.mrb[16].mxu0 }
 0x18e   : > { %v4514_v54 = vpop.f32.mrb[17].mxu0 }
 0x18f   : > { %v4516_v55 = vpop.f32.mrb[18].mxu0 }
 0x190   : > { %v4518_v56 = vpop.f32.mrb[19].mxu0 }
 0x195   : > { %v4520_v57 = vpop.f32.mrb[20].mxu0 }
 0x196   : > { %v4522_v58 = vpop.f32.mrb[21].mxu0 }
 0x197   : > { %v4524_v59 = vpop.f32.mrb[22].mxu0 }
 0x198   : > { %v4526_v60 = vpop.f32.mrb[23].mxu0 }
 0x19d   : > { %v4528_v61 = vpop.f32.mrb[24].mxu0 }
 0x19e   : > { %v4530_v62 = vpop.f32.mrb[25].mxu0 }
 0x19f   : > { %v4532_v63 = vpop.f32.mrb[26].mxu0 }
 0x1a0   : > { %v4534_v1 = vpop.f32.mrb[27].mxu0 }
 0x1a5   : > { %v4536_v2 = vpop.f32.mrb[28].mxu0 }
 0x1a6   : > { %5911 = vst [vmem:[#allocation20_spill] sm:$0xff] %v4536_v2  ;;  %v4538_v3 = vpop.f32.mrb[29].mxu0 }
 0x1a7   : > { %5912 = vst [vmem:[#allocation21_spill] sm:$0xff] %v4538_v3  ;;  %v4540_v4 = vpop.f32.mrb[30].mxu0 }
 0x1a8   : > { %5913 = vst [vmem:[#allocation22_spill] sm:$0xff] %v4540_v4  ;;  %v4542_v5 = vpop.f32.mrb[31].mxu0 }
 0x1a9   : > { %5914 = vst [vmem:[#allocation23_spill] sm:$0xff] %v4542_v5 }
 0x1ad   : > { %v4544_v6 = vpop.f32.mrb[32].mxu0 }
 0x1ae   : > { %5915 = vst [vmem:[#allocation24_spill] sm:$0xff] %v4544_v6  ;;  %v4546_v7 = vpop.f32.mrb[33].mxu0 }
 0x1af   : > { %5916 = vst [vmem:[#allocation25_spill] sm:$0xff] %v4546_v7  ;;  %v4548_v8 = vpop.f32.mrb[34].mxu0 }
 0x1b0   : > { %5917 = vst [vmem:[#allocation26_spill] sm:$0xff] %v4548_v8  ;;  %v4550_v9 = vpop.f32.mrb[35].mxu0 }
 0x1b1   : > { %5918 = vst [vmem:[#allocation27_spill] sm:$0xff] %v4550_v9 }
 0x1b5   : > { %v4552_v10 = vpop.f32.mrb[36].mxu0 }
 0x1b6   : > { %5919 = vst [vmem:[#allocation28_spill] sm:$0xff] %v4552_v10  ;;  %v4554_v11 = vpop.f32.mrb[37].mxu0 }
 0x1b7   : > { %5920 = vst [vmem:[#allocation29_spill] sm:$0xff] %v4554_v11  ;;  %v4559_v13 = vpop.f32.mrb[38].mxu0 }
 0x1b8   : > { %5921 = vst [vmem:[#allocation30_spill] sm:$0xff] %v4559_v13  ;;  %v4561_v14 = vpop.f32.mrb[39].mxu0 }
 0x1b9   : > { %5922 = vst [vmem:[#allocation31_spill] sm:$0xff] %v4561_v14 }
 0x1ba   : > { %1422 = vperm.xlu1 %3764, %v1400_v12  }
 0x1be   : > { %1427 = vperm.xlu1 %3764, %v1401_v15  }
 0x1c2   : > { %1437 = vperm.xlu1 %3764, %v1403_v16  }
 0x1c6   : > { %1417 = vperm.xlu0 %3763, %v1399_v17   ;;  %1447 = vperm.xlu1 %3764, %v1405_v19  }
 0x1ca   : > { %1432 = vperm.xlu0 %3763, %v1402_v20  }
 0x1ce   : > { %1442 = vperm.xlu0 %3763, %v1404_v21  }
 0x1d2   : > { %1452 = vperm.xlu0 %3763, %v1406_v22  }
 0x1e0   : > { %v645_v23 = vpop.trf.xlu1 }
 0x1e1   : > { %3306 = vmatmul.mubr.msk.f32.vlgmr.msra.gmra.mrb[0].mxu1 %vm705_vm4, %v645_v23  ;;  %v677_v25 = vpop.trf.xlu0 }
 0x1e2   : > { %876 = vmatprep.mubr.f32.mxu1 %v5844_v18 }
 0x1e4   : > { %v646_v24 = vpop.trf.xlu1 }
 0x1e5   : > { %3307 = vmatmul.mubr.msk.f32.gmra.mrb[2].mxu1 %vm705_vm4, %v646_v24  ;;  %v678_v27 = vpop.trf.xlu0 }
 0x1e6   : > { %882 = vmatprep.mubr.f32.mxu1 %v5844_v18 }
 0x1e8   : > { %v647_v26 = vpop.trf.xlu1 }
 0x1e9   : > { %3308 = vmatmul.mubr.msk.f32.gmra.mrb[4].mxu1 %vm705_vm4, %v647_v26  ;;  %v679_v30 = vpop.trf.xlu0 }
 0x1ea   : > { %888 = vmatprep.mubr.f32.mxu1 %v5844_v18 }
 0x1ec   : > { %v648_v28 = vpop.trf.xlu1 }
 0x1ed   : > { %3309 = vmatmul.mubr.msk.f32.gmra.mrb[6].mxu1 %vm705_vm4, %v648_v28  ;;  %v680_v32 = vpop.trf.xlu0 }
 0x1ee   : > { %894 = vmatprep.mubr.f32.mxu1 %v5844_v18 }
 0x1f0   : > { %v649_v29 = vpop.trf.xlu1 }
 0x1f1   : > { %3310 = vmatmul.mubr.msk.f32.gmra.mrb[8].mxu1 %vm705_vm4, %v649_v29  ;;  %v681_v35 = vpop.trf.xlu0 }
 0x1f2   : > { %900 = vmatprep.mubr.f32.mxu1 %v5844_v18 }
 0x1f4   : > { %v650_v31 = vpop.trf.xlu1 }
 0x1f5   : > { %3311 = vmatmul.mubr.msk.f32.gmra.mrb[10].mxu1 %vm705_vm4, %v650_v31  ;;  %v682_v37 = vpop.trf.xlu0 }
 0x1f6   : > { %906 = vmatprep.mubr.f32.mxu1 %v5844_v18 }
 0x1f8   : > { %v651_v33 = vpop.trf.xlu1 }
 0x1f9   : > { %3312 = vmatmul.mubr.msk.f32.gmra.mrb[12].mxu1 %vm705_vm4, %v651_v33  ;;  %v683_v40 = vpop.trf.xlu0 }
 0x1fa   : > { %912 = vmatprep.mubr.f32.mxu1 %v5844_v18 }
 0x1fc   : > { %v652_v34 = vpop.trf.xlu1 }
 0x1fd   : > { %3313 = vmatmul.mubr.msk.f32.gmra.mrb[14].mxu1 %vm705_vm4, %v652_v34  ;;  %v684_v42 = vpop.trf.xlu0 }
 0x1fe   : > { %918 = vmatprep.mubr.f32.mxu1 %v5844_v18 }
 0x200   : > { %v653_v36 = vpop.trf.xlu1 }
 0x201   : > { %3314 = vmatmul.mubr.msk.f32.gmra.mrb[16].mxu1 %vm705_vm4, %v653_v36  ;;  %v685_v15 = vpop.trf.xlu0 }
 0x202   : > { %924 = vmatprep.mubr.f32.mxu1 %v5844_v18 }
 0x204   : > { %v654_v38 = vpop.trf.xlu1 }
 0x205   : > { %3315 = vmatmul.mubr.msk.f32.gmra.mrb[18].mxu1 %vm705_vm4, %v654_v38  ;;  %v686_v17 = vpop.trf.xlu0 }
 0x206   : > { %930 = vmatprep.mubr.f32.mxu1 %v5844_v18 }
 0x208   : > { %v655_v39 = vpop.trf.xlu1 }
 0x209   : > { %3316 = vmatmul.mubr.msk.f32.gmra.mrb[20].mxu1 %vm705_vm4, %v655_v39  ;;  %v687_v20 = vpop.trf.xlu0 }
 0x20a   : > { %936 = vmatprep.mubr.f32.mxu1 %v5844_v18 }
 0x20c   : > { %v656_v41 = vpop.trf.xlu1 }
 0x20d   : > { %3317 = vmatmul.mubr.msk.f32.gmra.mrb[22].mxu1 %vm705_vm4, %v656_v41  ;;  %v688_v21 = vpop.trf.xlu0 }
 0x20e   : > { %942 = vmatprep.mubr.f32.mxu1 %v5844_v18 }
 0x210   : > { %v657_v44 = vpop.trf.xlu1 }
 0x211   : > { %3318 = vmatmul.mubr.msk.f32.gmra.mrb[24].mxu1 %vm705_vm4, %v657_v44  ;;  %v689_v28 = vpop.trf.xlu0 }
 0x212   : > { %948 = vmatprep.mubr.f32.mxu1 %v5844_v18 }
 0x214   : > { %v658_v12 = vpop.trf.xlu1 }
 0x215   : > { %3319 = vmatmul.mubr.msk.f32.gmra.mrb[26].mxu1 %vm705_vm4, %v658_v12  ;;  %v690_v29 = vpop.trf.xlu0 }
 0x216   : > { %954 = vmatprep.mubr.f32.mxu1 %v5844_v18 }
 0x218   : > { %v659_v16 = vpop.trf.xlu1 }
 0x219   : > { %3320 = vmatmul.mubr.msk.f32.gmra.mrb[28].mxu1 %vm705_vm4, %v659_v16  ;;  %v691_v31 = vpop.trf.xlu0 }
 0x21a   : > { %960 = vmatprep.mubr.f32.mxu1 %v5844_v18 }
 0x21c   : > { %v660_v19 = vpop.trf.xlu1 }
 0x21d   : > { %3321 = vmatmul.mubr.msk.f32.gmra.mrb[30].mxu1 %vm705_vm4, %v660_v19  ;;  %v692_v36 = vpop.trf.xlu0 }
 0x21e   : > { %966 = vmatprep.mubr.f32.mxu1 %v5844_v18 }
 0x221   : > { %3322 = vmatmul.mubr.msk.f32.gmra.mrb[32].mxu1 %vm705_vm4, %v677_v25 }
 0x222   : > { %972 = vmatprep.mubr.f32.mxu1 %v5844_v18 }
 0x225   : > { %3323 = vmatmul.mubr.msk.f32.gmra.mrb[34].mxu1 %vm705_vm4, %v678_v27 }
 0x226   : > { %978 = vmatprep.mubr.f32.mxu1 %v5844_v18 }
 0x229   : > { %v4620_v22 = vpop.f32.mrb[40].mxu0  ;;  %3324 = vmatmul.mubr.msk.f32.gmra.mrb[36].mxu1 %vm705_vm4, %v679_v30 }
 0x22a   : > { %v2366_v23 = vpop.f32.mrb[41].mxu0  ;;  %v2371_v24 = vsel %vm705_vm4, %v4620_v22, -inf  ;;  %984 = vmatprep.mubr.f32.mxu1 %v5844_v18 }
 0x22b   : > { %v4626_v25 = vpop.f32.mrb[42].mxu0  ;;  %2372 = vmax.xlane.f32.xlu0 %v2371_v24 }
 0x22c   : > { %v2369_v26 = vpop.f32.mrb[43].mxu0  ;;  %v2375_v27 = vsel %vm2374_vm5, %v4626_v25, -inf }
 0x22d   : > { %2376 = vmax.xlane.f32.xlu1 %v2375_v27  ;;  %3325 = vmatmul.mubr.msk.f32.gmra.mrb[38].mxu1 %vm705_vm4, %v680_v32 }
 0x22e   : > { %990 = vmatprep.mubr.f32.mxu1 %v5844_v18 }
 0x231   : > { %3326 = vmatmul.mubr.msk.f32.gmra.mrb[40].mxu1 %vm705_vm4, %v681_v35 }
 0x232   : > { %996 = vmatprep.mubr.f32.mxu1 %v5844_v18 }
 0x235   : > { %3327 = vmatmul.mubr.msk.f32.gmra.mrb[42].mxu1 %vm705_vm4, %v682_v37 }
 0x236   : > { %1002 = vmatprep.mubr.f32.mxu1 %v5844_v18 }
 0x239   : > { %3328 = vmatmul.mubr.msk.f32.gmra.mrb[44].mxu1 %vm705_vm4, %v683_v40  ;;  %v1423_v30 = vpop.permute.xlu1 %1422 }
 0x23a   : > { %v4638_v33 = vadd.f32 %v4500_v47, %v1423_v30  ;;  %1008 = vmatprep.mubr.f32.mxu1 %v5844_v18 }
 0x23c   : > { %5923 = vst [vmem:[#allocation32_spill] sm:$0xff] %v4638_v33 }
 0x23d   : > { %3329 = vmatmul.mubr.msk.f32.gmra.mrb[46].mxu1 %vm705_vm4, %v684_v42  ;;  %v1428_v32 = vpop.permute.xlu1 %1427 }
 0x23e   : > { %v4643_v34 = vadd.f32 %v4504_v49, %v1428_v32  ;;  %v4646_v35 = vadd.f32 %v4506_v50, %v1428_v32  ;;  %1014 = vmatprep.mubr.f32.mxu1 %v5844_v18  ;;  %v1600_v49 = vadd.f32 %v4502_v48, %v1423_v30 }
 0x240   : > { %5924 = vst [vmem:[#allocation33_spill] sm:$0xff] %v4643_v34  ;;  %5925 = vst [vmem:[#allocation34_spill] sm:$0xff] %v4646_v35 }
 0x241   : > { %3330 = vmatmul.mubr.msk.f32.gmra.mrb[48].mxu1 %vm705_vm4, %v685_v15  ;;  %v1438_v37 = vpop.permute.xlu1 %1437 }
 0x242   : > { %v4651_v47 = vadd.f32 %v4512_v53, %v1438_v37  ;;  %v4654_v38 = vadd.f32 %v4514_v54, %v1438_v37  ;;  %1020 = vmatprep.mubr.f32.mxu1 %v5844_v18 }
 0x244   : > { %5926 = vst [vmem:[#allocation35_spill] sm:$0xff] %v4651_v47  ;;  %5927 = vst [vmem:[#allocation36_spill] sm:$0xff] %v4654_v38 }
 0x245   : > { %v1418_v39 = vpop.permute.xlu0 %1417  ;;  %3331 = vmatmul.mubr.msk.f32.gmra.mrb[50].mxu1 %vm705_vm4, %v686_v17 }
 0x246   : > { %v4660_v50 = vadd.f32 %v4496_v45, %v1418_v39  ;;  %v1596_v40 = vadd.f32 %v4498_v46, %v1418_v39  ;;  %1026 = vmatprep.mubr.f32.mxu1 %v5844_v18 }
 0x248   : > { %5928 = vst [vmem:[#allocation37_spill] sm:$0xff] %v4660_v50  ;;  %v1673_v41 = vpack.c.bf16 %v1600_v49, %v1596_v40 }
 0x249   : > { %v1433_v54 = vpop.permute.xlu0 %1432  ;;  %3332 = vmatmul.mubr.msk.f32.gmra.mrb[52].mxu1 %vm705_vm4, %v687_v20 }
 0x24a   : > { %v4668_v42 = vadd.f32 %v4508_v51, %v1433_v54  ;;  %v4671_v44 = vadd.f32 %v4510_v52, %v1433_v54  ;;  %1032 = vmatprep.mubr.f32.mxu1 %v5844_v18  ;;  %v1448_v52 = vpop.permute.xlu1 %1447 }
 0x24b   : > { %v4692_v19 = vadd.f32 %v4520_v57, %v1448_v52 }
 0x24c   : > { %5929 = vst [vmem:[#allocation38_spill] sm:$0xff] %v4668_v42  ;;  %5930 = vst [vmem:[#allocation39_spill] sm:$0xff] %v4671_v44 }
 0x24d   : > { %v1443_v48 = vpop.permute.xlu0 %1442  ;;  %3333 = vmatmul.mubr.msk.f32.gmra.mrb[54].mxu1 %vm705_vm4, %v688_v21  ;;  %5933 = vst [vmem:[#allocation42_spill] sm:$0xff] %v4692_v19 }
 0x24e   : > { %v4680_v12 = vadd.f32 %v4516_v55, %v1443_v48  ;;  %v4683_v51 = vadd.f32 %v4518_v56, %v1443_v48  ;;  %1038 = vmatprep.mubr.f32.mxu1 %v5844_v18  ;;  %v4695_v55 = vadd.f32 %v4522_v58, %v1448_v52 }
 0x250   : > { %5931 = vst [vmem:[#allocation40_spill] sm:$0xff] %v4680_v12  ;;  %5932 = vst [vmem:[#allocation41_spill] sm:$0xff] %v4683_v51 }
 0x251   : > { %v1453_v17 = vpop.permute.xlu0 %1452  ;;  %3334 = vmatmul.mubr.msk.f32.gmra.mrb[56].mxu1 %vm705_vm4, %v689_v28  ;;  %5934 = vst [vmem:[#allocation43_spill] sm:$0xff] %v4695_v55 }
 0x252   : > { %v4698_v56 = vadd.f32 %v4524_v59, %v1453_v17  ;;  %v4701_v20 = vadd.f32 %v4526_v60, %v1453_v17  ;;  %1044 = vmatprep.mubr.f32.mxu1 %v5844_v18 }
 0x254   : > { %5935 = vst [vmem:[#allocation44_spill] sm:$0xff] %v4698_v56  ;;  %5936 = vst [vmem:[#allocation45_spill] sm:$0xff] %v4701_v20 }
 0x255   : > { %3335 = vmatmul.mubr.msk.f32.gmra.mrb[58].mxu1 %vm705_vm4, %v690_v29 }
 0x256   : > { %1050 = vmatprep.mubr.f32.mxu1 %v5844_v18 }
 0x259   : > { %3336 = vmatmul.mubr.msk.f32.gmra.mrb[60].mxu1 %vm705_vm4, %v691_v31 }
 0x25a   : > { %1056 = vmatprep.mubr.f32.mxu1 %v5844_v18 }
 0x25d   : > { %3337 = vmatmul.mubr.msk.f32.gmra.mrb[62].mxu1 %vm705_vm4, %v692_v36 }
 0x25e   : > { %1720 = vmatprep.mubr.bf16.mxu1 %v1673_v41  ;;  %v1407_v41 = vld [vmem:[%s5832_s7 + $0x40] sm:$0xff] }
 0x2b4   : > { %v4713_v57 = vpop.f32.mrb[0].mxu1 }
 0x2b5   : > { %v4715_v58 = vpop.f32.mrb[1].mxu1 }
 0x2b6   : > { %v1063_v59 = vmax.f32 %v4713_v57, %v4715_v58 }
 0x2b8   : > { %1064 = vmax.xlane.f32.xlu0 %v1063_v59  ;;  %v4719_v60 = vpop.f32.mrb[2].mxu1  ;;  %v2373_v9 = vpop.xlane.xlu0 %2372 }
 0x2b9   : > { %v4721_v24 = vpop.f32.mrb[3].mxu1  ;;  %v4846_v4 = vsub.f32 %v2373_v9, %v4620_v22 }
 0x2ba   : > { %v1066_v26 = vmax.f32 %v4719_v60, %v4721_v24  ;;  %v2377_v5 = vpop.xlane.xlu1 %2376 }
 0x2bc   : > { %1067 = vmax.xlane.f32.xlu1 %v1066_v26  ;;  %v4725_v27 = vpop.f32.mrb[4].mxu1 }
 0x2bd   : > { %v4727_v28 = vpop.f32.mrb[5].mxu1 }
 0x2be   : > { %v1069_v29 = vmax.f32 %v4725_v27, %v4727_v28 }
 0x2c0   : > { %1070 = vmax.xlane.f32.xlu0 %v1069_v29  ;;  %v4731_v30 = vpop.f32.mrb[6].mxu1 }
 0x2c1   : > { %v4733_v31 = vpop.f32.mrb[7].mxu1 }
 0x2c2   : > { %v1072_v32 = vmax.f32 %v4731_v30, %v4733_v31 }
 0x2c4   : > { %v4737_v36 = vpop.f32.mrb[8].mxu1 }
 0x2c5   : > { %v4739_v37 = vpop.f32.mrb[9].mxu1 }
 0x2c6   : > { %v1075_v39 = vmax.f32 %v4737_v36, %v4739_v37 }
 0x2c8   : > { %v4743_v49 = vpop.f32.mrb[10].mxu1 }
 0x2c9   : > { %v4745_v40 = vpop.f32.mrb[11].mxu1 }
 0x2ca   : > { %v1078_v54 = vmax.f32 %v4743_v49, %v4745_v40 }
 0x2cc   : > { %v4752_v48 = vpop.f32.mrb[12].mxu1 }
 0x2cd   : > { %1457 = vperm.xlu1 %3764, %v1407_v41   ;;  %v4754_v52 = vpop.f32.mrb[13].mxu1 }
 0x2ce   : > { %v1081_v17 = vmax.f32 %v4752_v48, %v4754_v52 }
 0x2d0   : > { %v4758_v59 = vpop.f32.mrb[14].mxu1 }
 0x2d1   : > { %v4760_v26 = vpop.f32.mrb[15].mxu1 }
 0x2d2   : > { %v1084_v29 = vmax.f32 %v4758_v59, %v4760_v26 }
 0x2d4   : > { %v4767_v18 = vpop.f32.mrb[16].mxu1 }
 0x2d5   : > { %v4769_v21 = vpop.f32.mrb[17].mxu1 }
 0x2d6   : > { %1462 = vperm.xlu0 %3763, %v1408_v0   ;;  %v1087_v41 = vmax.f32 %v4767_v18, %v4769_v21 }
 0x2d8   : > { %v4773_v23 = vpop.f32.mrb[18].mxu1 }
 0x2d9   : > { %v4775_v15 = vpop.f32.mrb[19].mxu1 }
 0x2da   : > { %v1090_v16 = vmax.f32 %v4773_v23, %v4775_v15 }
 0x2dc   : > { %v4779_v45 = vpop.f32.mrb[20].mxu1 }
 0x2dd   : > { %v4781_v46 = vpop.f32.mrb[21].mxu1 }
 0x2de   : > { %v1093_v53 = vmax.f32 %v4779_v45, %v4781_v46 }
 0x2e0   : > { %v4785_v43 = vpop.f32.mrb[22].mxu1 }
 0x2e1   : > { %v4787_v0 = vpop.f32.mrb[23].mxu1 }
 0x2e2   : > { %v1096_v14 = vmax.f32 %v4785_v43, %v4787_v0 }
 0x2e4   : > { %v4791_v13 = vpop.f32.mrb[24].mxu1 }
 0x2e5   : > { %v4793_v11 = vpop.f32.mrb[25].mxu1 }
 0x2e6   : > { %v1099_v10 = vmax.f32 %v4791_v13, %v4793_v11 }
 0x2e8   : > { %v4797_v19 = vpop.f32.mrb[26].mxu1 }
 0x2e9   : > { %v4799_v56 = vpop.f32.mrb[27].mxu1 }
 0x2ea   : > { %v1102_v55 = vmax.f32 %v4797_v19, %v4799_v56 }
 0x2ec   : > { %v4803_v20 = vpop.f32.mrb[28].mxu1 }
 0x2ed   : > { %v4805_v47 = vpop.f32.mrb[29].mxu1 }
 0x2ee   : > { %v1105_v12 = vmax.f32 %v4803_v20, %v4805_v47 }
 0x2f0   : > { %v4809_v38 = vpop.f32.mrb[30].mxu1 }
 0x2f1   : > { %1073 = vmax.xlane.f32.xlu1 %v1072_v32  ;;  %v4811_v51 = vpop.f32.mrb[31].mxu1 }
 0x2f2   : > { %v1108_v34 = vmax.f32 %v4809_v38, %v4811_v51 }
 0x2f4   : > { %v4815_v42 = vpop.f32.mrb[32].mxu1 }
 0x2f5   : > { %1076 = vmax.xlane.f32.xlu0 %v1075_v39  ;;  %1079 = vmax.xlane.f32.xlu1 %v1078_v54  ;;  %v4817_v35 = vpop.f32.mrb[33].mxu1 }
 0x2f6   : > { %v1111_v44 = vmax.f32 %v4815_v42, %v4817_v35 }
 0x2f8   : > { %v4821_v50 = vpop.f32.mrb[34].mxu1 }
 0x2f9   : > { %1082 = vmax.xlane.f32.xlu0 %v1081_v17  ;;  %1085 = vmax.xlane.f32.xlu1 %v1084_v29  ;;  %v4823_v33 = vpop.f32.mrb[35].mxu1 }
 0x2fa   : > { %v1114_v32 = vmax.f32 %v4821_v50, %v4823_v33 }
 0x2fc   : > { %v4827_v7 = vpop.f32.mrb[36].mxu1 }
 0x2fd   : > { %1088 = vmax.xlane.f32.xlu0 %v1087_v41  ;;  %1091 = vmax.xlane.f32.xlu1 %v1090_v16  ;;  %v4829_v39 = vpop.f32.mrb[37].mxu1 }
 0x2fe   : > { %v1117_v54 = vmax.f32 %v4827_v7, %v4829_v39 }
 0x300   : > { %v4833_v6 = vpop.f32.mrb[38].mxu1 }
 0x301   : > { %1094 = vmax.xlane.f32.xlu0 %v1093_v53  ;;  %1097 = vmax.xlane.f32.xlu1 %v1096_v14  ;;  %v4835_v17 = vpop.f32.mrb[39].mxu1  ;;  %v4849_v14 = vsub.f32 %v2377_v5, %v4626_v25 }
 0x302   : > { %v1120_v29 = vmax.f32 %v4833_v6, %v4835_v17 }
 0x303   : > { %v2383_v2 = vsel %vm2374_vm5, %v4849_v14, -inf }
 0x304   : > { %v4839_v8 = vpop.f32.mrb[40].mxu1 }
 0x305   : > { %1100 = vmax.xlane.f32.xlu0 %v1099_v10  ;;  %1103 = vmax.xlane.f32.xlu1 %v1102_v55  ;;  %v4841_v16 = vpop.f32.mrb[41].mxu1  ;;  %v2380_v55 = vsel %vm705_vm4, %v4846_v4, -inf }
 0x306   : > { %v1123_v41 = vmax.f32 %v4839_v8, %v4841_v16 }
 0x308   : > { %v4851_v53 = vpop.f32.mrb[42].mxu1 }
 0x309   : > { %5937 = vst [vmem:[#allocation46_spill] sm:$0xff] %v4851_v53  ;;  %1106 = vmax.xlane.f32.xlu0 %v1105_v12  ;;  %1109 = vmax.xlane.f32.xlu1 %v1108_v34  ;;  %v4853_v3 = vpop.f32.mrb[43].mxu1 }
 0x30a   : > { %5938 = vst [vmem:[#allocation47_spill] sm:$0xff] %v4853_v3  ;;  %v1126_v10 = vmax.f32 %v4851_v53, %v4853_v3 }
 0x30c   : > { %v4861_v9 = vpop.f32.mrb[44].mxu1 }
 0x30d   : > { %2381 = vmax.xlane.f32.xlu0 %v2380_v55  ;;  %2384 = vmax.xlane.f32.xlu1 %v2383_v2  ;;  %v4863_v5 = vpop.f32.mrb[45].mxu1 }
 0x30e   : > { %5939 = vst [vmem:[#allocation48_spill] sm:$0xff] %v4863_v5  ;;  %v1129_v22 = vmax.f32 %v4861_v9, %v4863_v5 }
 0x310   : > { %v4867_v25 = vpop.f32.mrb[46].mxu1 }
 0x311   : > { %5940 = vst [vmem:[#allocation49_spill] sm:$0xff] %v4867_v25  ;;  %1112 = vmax.xlane.f32.xlu0 %v1111_v44  ;;  %1115 = vmax.xlane.f32.xlu1 %v1114_v32  ;;  %v4869_v34 = vpop.f32.mrb[47].mxu1 }
 0x312   : > { %5941 = vst [vmem:[#allocation50_spill] sm:$0xff] %v4869_v34  ;;  %v1132_v12 = vmax.f32 %v4867_v25, %v4869_v34 }
 0x314   : > { %v4873_v3 = vpop.f32.mrb[48].mxu1 }
 0x315   : > { %5942 = vst [vmem:[#allocation51_spill] sm:$0xff] %v4873_v3  ;;  %1118 = vmax.xlane.f32.xlu0 %v1117_v54  ;;  %1121 = vmax.xlane.f32.xlu1 %v1120_v29  ;;  %v4875_v55 = vpop.f32.mrb[49].mxu1 }
 0x316   : > { %5943 = vst [vmem:[#allocation52_spill] sm:$0xff] %v4875_v55  ;;  %v1135_v2 = vmax.f32 %v4873_v3, %v4875_v55 }
 0x318   : > { %v4879_v53 = vpop.f32.mrb[50].mxu1 }
 0x319   : > { %5944 = vst [vmem:[#allocation53_spill] sm:$0xff] %v4879_v53  ;;  %1124 = vmax.xlane.f32.xlu0 %v1123_v41  ;;  %1127 = vmax.xlane.f32.xlu1 %v1126_v10  ;;  %v4881_v44 = vpop.f32.mrb[51].mxu1 }
 0x31a   : > { %5945 = vst [vmem:[#allocation54_spill] sm:$0xff] %v4881_v44  ;;  %v1138_v32 = vmax.f32 %v4879_v53, %v4881_v44 }
 0x31c   : > { %v4885_v5 = vpop.f32.mrb[52].mxu1 }
 0x31d   : > { %5946 = vst [vmem:[#allocation55_spill] sm:$0xff] %v4885_v5  ;;  %1130 = vmax.xlane.f32.xlu0 %v1129_v22  ;;  %1133 = vmax.xlane.f32.xlu1 %v1132_v12  ;;  %v4887_v54 = vpop.f32.mrb[53].mxu1 }
 0x31e   : > { %5947 = vst [vmem:[#allocation56_spill] sm:$0xff] %v4887_v54  ;;  %v1141_v29 = vmax.f32 %v4885_v5, %v4887_v54 }
 0x320   : > { %v4891_v34 = vpop.f32.mrb[54].mxu1 }
 0x321   : > { %5948 = vst [vmem:[#allocation57_spill] sm:$0xff] %v4891_v34  ;;  %1136 = vmax.xlane.f32.xlu0 %v1135_v2  ;;  %1139 = vmax.xlane.f32.xlu1 %v1138_v32  ;;  %v4893_v41 = vpop.f32.mrb[55].mxu1 }
 0x322   : > { %5949 = vst [vmem:[#allocation58_spill] sm:$0xff] %v4893_v41  ;;  %v1144_v10 = vmax.f32 %v4891_v34, %v4893_v41 }
 0x324   : > { %v4897_v55 = vpop.f32.mrb[56].mxu1 }
 0x325   : > { %5950 = vst [vmem:[#allocation59_spill] sm:$0xff] %v4897_v55  ;;  %1142 = vmax.xlane.f32.xlu0 %v1141_v29  ;;  %1145 = vmax.xlane.f32.xlu1 %v1144_v10  ;;  %v4899_v22 = vpop.f32.mrb[57].mxu1 }
 0x326   : > { %5951 = vst [vmem:[#allocation60_spill] sm:$0xff] %v4899_v22  ;;  %v1147_v12 = vmax.f32 %v4897_v55, %v4899_v22 }
 0x328   : > { %v4903_v44 = vpop.f32.mrb[58].mxu1 }
 0x329   : > { %5952 = vst [vmem:[#allocation61_spill] sm:$0xff] %v4903_v44  ;;  %1148 = vmax.xlane.f32.xlu0 %v1147_v12  ;;  %v4905_v54 = vpop.f32.mrb[59].mxu1  ;;  %v1409_v12 = vld [vmem:[%s5832_s7 + $0x50] sm:$0xff] }
 0x32a   : > { %5953 = vst [vmem:[#allocation62_spill] sm:$0xff] %v4905_v54  ;;  %v1150_v2 = vmax.f32 %v4903_v44, %v4905_v54  ;;  %v1410_v54 = vld [vmem:[%s5832_s7 + $0x58] sm:$0xff] }
 0x32c   : > { %v4909_v32 = vpop.f32.mrb[60].mxu1 }
 0x32d   : > { %5954 = vst [vmem:[#allocation63_spill] sm:$0xff] %v4909_v32  ;;  %v4911_v41 = vpop.f32.mrb[61].mxu1 }
 0x32e   : > { %5955 = vst [vmem:[#allocation64_spill] sm:$0xff] %v4911_v41  ;;  %v1153_v29 = vmax.f32 %v4909_v32, %v4911_v41 }
 0x330   : > { %v4915_v10 = vpop.f32.mrb[62].mxu1 }
 0x331   : > { %5956 = vst [vmem:[#allocation65_spill] sm:$0xff] %v4915_v10  ;;  %v4917_v34 = vpop.f32.mrb[63].mxu1 }
 0x332   : > { %5957 = vst [vmem:[#allocation66_spill] sm:$0xff] %v4917_v34  ;;  %v1156_v22 = vmax.f32 %v4915_v10, %v4917_v34 }
 0x336   : > { %1467 = vperm.xlu1 %3764, %v1409_v12  }
 0x33f   : > { %1472 = vperm.xlu0 %3763, %v1410_v54  }
 0x345   : > { %v1065_v44 = vpop.xlane.xlu0 %1064 }
 0x346   : > { %v1159_v41 = vsub.f32 %v4713_v57, %v1065_v44  ;;  %v1160_v32 = vsub.f32 %v4715_v58, %v1065_v44 }
 0x348   : > { %v1223_v55 = vmul.f32 1.442695, %v1159_v41  ;;  %v1225_v5 = vmul.f32 1.442695, %v1160_v32 }
 0x349   : > { %v1068_v53 = vpop.xlane.xlu1 %1067 }
 0x34a   : > { %v1161_v34 = vsub.f32 %v4719_v60, %v1068_v53  ;;  %v1162_v10 = vsub.f32 %v4721_v24, %v1068_v53  ;;  %3805 = vpow2.f32 %v1223_v55 }
 0x34b   : > { %3807 = vpow2.f32 %v1225_v5 }
 0x34c   : > { %v1227_v3 = vmul.f32 1.442695, %v1161_v34  ;;  %v1229_v12 = vmul.f32 1.442695, %v1162_v10 }
 0x34d   : > { %v1458_v25 = vpop.permute.xlu1 %1457  ;;  %v1071_v58 = vpop.xlane.xlu0 %1070 }
 0x34e   : > { %3809 = vpow2.f32 %v1227_v3  ;;  %v4932_v54 = vadd.f32 %v4528_v61, %v1458_v25  ;;  %v4935_v57 = vadd.f32 %v4530_v62, %v1458_v25  ;;  %v1163_v55 = vsub.f32 %v4725_v27, %v1071_v58 }
 0x34f   : > { %3811 = vpow2.f32 %v1229_v12  ;;  %v1164_v32 = vsub.f32 %v4727_v28, %v1071_v58 }
 0x354   : > { %v3806_v41 = vpop.eup %3805 }
 0x355   : > { %v1463_v44 = vpop.permute.xlu0 %1462  ;;  %v3808_v53 = vpop.eup %3807 }
 0x356   : > { %v4938_v60 = vadd.f32 %v4532_v63, %v1463_v44  ;;  %v4941_v24 = vadd.f32 %v4534_v1, %v1463_v44  ;;  %v1412_v63 = vld [vmem:[%s5832_s7 + $0x68] sm:$0xff]  ;;  %v1411_v1 = vld [vmem:[%s5832_s7 + $0x60] sm:$0xff] }
 0x358   : > { %v3810_v5 = vpop.eup %3809  ;;  %v1680_v3 = vpack.c.bf16 %v4938_v60, %v4932_v54  ;;  %v1681_v61 = vpack.c.bf16 %v4941_v24, %v4935_v57  ;;  %v6009_v60 = vld [vmem:[#allocation29_spill] sm:$0xff] }
 0x359   : > { %v3812_v34 = vpop.eup %3811  ;;  %v1351_v62 = vpack.c.bf16 %v3810_v5, %v3806_v41 }
 0x35a   : > { %1151 = vmax.xlane.f32.xlu1 %v1150_v2  ;;  %v1352_v25 = vpack.c.bf16 %v3812_v34, %v3808_v53  ;;  %v1231_v2 = vmul.f32 1.442695, %v1163_v55 }
 0x35c   : > { %1688 = vmatprep.subr.bf16.mxu1 %v1352_v25  ;;  %3813 = vpow2.f32 %v1231_v2 }
 0x35d   : > { %1689 = vmatpush1.bf16.xpose.msra.mxu1 %v1351_v62 }
 0x35e   : > { %1154 = vmax.xlane.f32.xlu0 %v1153_v29  ;;  %1157 = vmax.xlane.f32.xlu1 %v1156_v22  ;;  %v1233_v29 = vmul.f32 1.442695, %v1164_v32 }
 0x36f   : > { %1482 = vperm.xlu1 %3764, %v1412_v63  }
 0x374   : > { %1477 = vperm.xlu0 %3763, %v1411_v1  }
 0x37e   : > { %v1074_v10 = vpop.xlane.xlu1 %1073 }
 0x37f   : > { %v1165_v12 = vsub.f32 %v4731_v30, %v1074_v10  ;;  %v1166_v22 = vsub.f32 %v4733_v31, %v1074_v10 }
 0x381   : > { %v1235_v44 = vmul.f32 1.442695, %v1165_v12  ;;  %v1237_v41 = vmul.f32 1.442695, %v1166_v22 }
 0x382   : > { %v1077_v53 = vpop.xlane.xlu0 %1076  ;;  %v1080_v5 = vpop.xlane.xlu1 %1079 }
 0x383   : > { %3815 = vpow2.f32 %v1235_v44  ;;  %v1167_v34 = vsub.f32 %v4737_v36, %v1077_v53  ;;  %v1168_v62 = vsub.f32 %v4739_v37, %v1077_v53  ;;  %v1169_v27 = vsub.f32 %v4743_v49, %v1080_v5  ;;  %v3814_v44 = vpop.eup %3813 }
 0x384   : > { %3817 = vpow2.f32 %v1237_v41  ;;  %v1170_v28 = vsub.f32 %v4745_v40, %v1080_v5 }
 0x385   : > { %3819 = vpow2.f32 %v1233_v29  ;;  %v1239_v30 = vmul.f32 1.442695, %v1167_v34  ;;  %v1241_v58 = vmul.f32 1.442695, %v1168_v62  ;;  %v1243_v31 = vmul.f32 1.442695, %v1169_v27 }
 0x386   : > { %v1245_v25 = vmul.f32 1.442695, %v1170_v28  ;;  %v1083_v63 = vpop.xlane.xlu0 %1082  ;;  %v1086_v1 = vpop.xlane.xlu1 %1085 }
 0x387   : > { %3821 = vpow2.f32 %v1239_v30  ;;  %v1171_v55 = vsub.f32 %v4752_v48, %v1083_v63  ;;  %v1172_v32 = vsub.f32 %v4754_v52, %v1083_v63  ;;  %v1173_v36 = vsub.f32 %v4758_v59, %v1086_v1 }
 0x388   : > { %3823 = vpow2.f32 %v1241_v58  ;;  %v1174_v37 = vsub.f32 %v4760_v26, %v1086_v1 }
 0x389   : > { %3825 = vpow2.f32 %v1243_v31  ;;  %v1247_v49 = vmul.f32 1.442695, %v1171_v55  ;;  %v1249_v40 = vmul.f32 1.442695, %v1172_v32  ;;  %v1251_v2 = vmul.f32 1.442695, %v1173_v36 }
 0x38a   : > { %3827 = vpow2.f32 %v1245_v25  ;;  %v1253_v10 = vmul.f32 1.442695, %v1174_v37  ;;  %v1089_v12 = vpop.xlane.xlu0 %1088  ;;  %v1092_v22 = vpop.xlane.xlu1 %1091 }
 0x38b   : > { %3829 = vpow2.f32 %v1247_v49  ;;  %v1175_v29 = vsub.f32 %v4767_v18, %v1089_v12  ;;  %v1176_v48 = vsub.f32 %v4769_v21, %v1089_v12  ;;  %v1177_v52 = vsub.f32 %v4773_v23, %v1092_v22 }
 0x38c   : > { %3831 = vpow2.f32 %v1249_v40  ;;  %v1178_v59 = vsub.f32 %v4775_v15, %v1092_v22 }
 0x38d   : > { %v3816_v26 = vpop.eup %3815  ;;  %3833 = vpow2.f32 %v1251_v2  ;;  %v1255_v41 = vmul.f32 1.442695, %v1175_v29  ;;  %v1257_v53 = vmul.f32 1.442695, %v1176_v48  ;;  %v1259_v5 = vmul.f32 1.442695, %v1177_v52 }
 0x38e   : > { %v3818_v34 = vpop.eup %3817  ;;  %3835 = vpow2.f32 %v1253_v10  ;;  %v1261_v62 = vmul.f32 1.442695, %v1178_v59  ;;  %v1095_v27 = vpop.xlane.xlu0 %1094  ;;  %v1353_v30 = vpack.c.bf16 %v3816_v26, %v3814_v44 }
 0x38f   : > { %v1098_v28 = vpop.xlane.xlu1 %1097  ;;  %v3820_v18 = vpop.eup %3819  ;;  %3837 = vpow2.f32 %v1255_v41  ;;  %v1179_v21 = vsub.f32 %v4779_v45, %v1095_v27  ;;  %v1180_v23 = vsub.f32 %v4781_v46, %v1095_v27 }
 0x390   : > { %v1181_v58 = vsub.f32 %v4785_v43, %v1098_v28  ;;  %3839 = vpow2.f32 %v1257_v53  ;;  %v1182_v15 = vsub.f32 %v4787_v0, %v1098_v28  ;;  %v1354_v31 = vpack.c.bf16 %v3818_v34, %v3820_v18 }
 0x391   : > { %v3822_v25 = vpop.eup %3821  ;;  %3841 = vpow2.f32 %v1259_v5  ;;  %v1263_v63 = vmul.f32 1.442695, %v1179_v21  ;;  %v1265_v1 = vmul.f32 1.442695, %v1180_v23 }
 0x392   : > { %v1267_v55 = vmul.f32 1.442695, %v1181_v58  ;;  %v3824_v32 = vpop.eup %3823  ;;  %3843 = vpow2.f32 %v1261_v62  ;;  %v1269_v36 = vmul.f32 1.442695, %v1182_v15  ;;  %1690 = vmatprep.subr.bf16.mxu1 %v1354_v31  ;;  %v1101_v37 = vpop.xlane.xlu0 %1100 }
 0x393   : > { %v1104_v49 = vpop.xlane.xlu1 %1103  ;;  %v3826_v45 = vpop.eup %3825  ;;  %3845 = vpow2.f32 %v1263_v63  ;;  %1691 = vmatpush1.bf16.xpose.msra.mxu1 %v1353_v30  ;;  %v1183_v43 = vsub.f32 %v4791_v13, %v1101_v37  ;;  %v1184_v46 = vsub.f32 %v4793_v11, %v1101_v37 }
 0x394   : > { %v1185_v0 = vsub.f32 %v4797_v19, %v1104_v49  ;;  %v3828_v40 = vpop.eup %3827  ;;  %3847 = vpow2.f32 %v1265_v1  ;;  %v1186_v2 = vsub.f32 %v4799_v56, %v1104_v49  ;;  %v1355_v10 = vpack.c.bf16 %v3826_v45, %v3822_v25 }
 0x395   : > { %v4977_v12 = vpop.eup %3829  ;;  %3849 = vpow2.f32 %v1267_v55  ;;  %v1271_v22 = vmul.f32 1.442695, %v1183_v43  ;;  %v1273_v29 = vmul.f32 1.442695, %v1184_v46  ;;  %v1356_v59 = vpack.c.bf16 %v3828_v40, %v3824_v32 }
 0x396   : > { %v1275_v48 = vmul.f32 1.442695, %v1185_v0  ;;  %v3832_v52 = vpop.eup %3831  ;;  %3851 = vpow2.f32 %v1269_v36  ;;  %v1277_v44 = vmul.f32 1.442695, %v1186_v2  ;;  %v1107_v13 = vpop.xlane.xlu0 %1106 }
 0x397   : > { %v1110_v26 = vpop.xlane.xlu1 %1109  ;;  %v3834_v11 = vpop.eup %3833  ;;  %3853 = vpow2.f32 %v1271_v22  ;;  %v1187_v19 = vsub.f32 %v4803_v20, %v1107_v13  ;;  %v1188_v41 = vsub.f32 %v4805_v47, %v1107_v13  ;;  %1692 = vmatprep.subr.bf16.mxu1 %v1356_v59 }
 0x398   : > { %v1189_v56 = vsub.f32 %v4809_v38, %v1110_v26  ;;  %v3836_v53 = vpop.eup %3835  ;;  %3855 = vpow2.f32 %v1273_v29  ;;  %v1190_v5 = vsub.f32 %v4811_v51, %v1110_v26  ;;  %v1357_v34 = vpack.c.bf16 %v3834_v11, %v4977_v12 }
 0x399   : > { %v4984_v62 = vpop.eup %3837  ;;  %3857 = vpow2.f32 %v1275_v48  ;;  %v1279_v27 = vmul.f32 1.442695, %v1187_v19  ;;  %v1281_v28 = vmul.f32 1.442695, %v1188_v41  ;;  %v1358_v47 = vpack.c.bf16 %v3836_v53, %v3832_v52 }
 0x39a   : > { %v1283_v30 = vmul.f32 1.442695, %v1189_v56  ;;  %v3840_v18 = vpop.eup %3839  ;;  %3859 = vpow2.f32 %v1277_v44  ;;  %v1285_v20 = vmul.f32 1.442695, %v1190_v5  ;;  %v2382_v21 = vpop.xlane.xlu0 %2381 }
 0x39b   : > { %v2385_v23 = vpop.xlane.xlu1 %2384  ;;  %v4986_v38 = vpop.eup %3841  ;;  %3861 = vpow2.f32 %v1279_v27  ;;  %1693 = vmatpush1.bf16.xpose.msra.mxu1 %v1355_v10  ;;  %v2386_v51 = vsub.f32 %v4846_v4, %v2382_v21 }
 0x39c   : > { %v2387_v58 = vsub.f32 %v4849_v14, %v2385_v23  ;;  %v3844_v15 = vpop.eup %3843  ;;  %3863 = vpow2.f32 %v1281_v28  ;;  %1694 = vmatprep.subr.bf16.mxu1 %v1358_v47  ;;  %v1359_v31 = vpack.c.bf16 %v4986_v38, %v4984_v62  ;;  %v5958_v28 = vld [vmem:[#allocation46_spill] sm:$0xff] }
 0x39d   : > { %v4992_v25 = vpop.eup %3845  ;;  %3865 = vpow2.f32 %v1283_v30  ;;  %v2388_v63 = vmul.f32 1.442695, %v2386_v51  ;;  %v1360_v55 = vpack.c.bf16 %v3844_v15, %v3840_v18 }
 0x39e   : > { %v2390_v1 = vmul.f32 1.442695, %v2387_v58  ;;  %v4994_v32 = vpop.eup %3847  ;;  %3867 = vpow2.f32 %v1285_v20  ;;  %v1113_v36 = vpop.xlane.xlu0 %1112  ;;  %v5959_v20 = vld [vmem:[#allocation47_spill] sm:$0xff] }
 0x39f   : > { %v1116_v37 = vpop.xlane.xlu1 %1115  ;;  %v4996_v4 = vpop.eup %3849  ;;  %3869 = vpow2.f32 %v2388_v63  ;;  %v1191_v14 = vsub.f32 %v4815_v42, %v1113_v36  ;;  %v1192_v49 = vsub.f32 %v4817_v35, %v1113_v36 }
 0x3a0   : > { %v1193_v45 = vsub.f32 %v4821_v50, %v1116_v37  ;;  %v5001_v43 = vpop.eup %3851  ;;  %3871 = vpow2.f32 %v2390_v1  ;;  %v1194_v46 = vsub.f32 %v4823_v33, %v1116_v37  ;;  %v1361_v0 = vpack.c.bf16 %v4996_v4, %v4992_v25  ;;  %v5960_v37 = vld [vmem:[#allocation48_spill] sm:$0xff] }
 0x3a1   : > { %v5006_v40 = vpop.eup %3853  ;;  %v1287_v2 = vmul.f32 1.442695, %v1191_v14  ;;  %v1289_v10 = vmul.f32 1.442695, %v1192_v49  ;;  %v1362_v42 = vpack.c.bf16 %v5001_v43, %v4994_v32  ;;  %v5961_v49 = vld [vmem:[#allocation49_spill] sm:$0xff]  ;;  %v5962_v43 = vld [vmem:[#allocation50_spill] sm:$0xff] }
 0x3a2   : > { %v1291_v12 = vmul.f32 1.442695, %v1193_v45  ;;  %v5010_v22 = vpop.eup %3855  ;;  %v1293_v35 = vmul.f32 1.442695, %v1194_v46  ;;  %v1119_v50 = vpop.xlane.xlu0 %1118 }
 0x3a3   : > { %v1122_v29 = vpop.xlane.xlu1 %1121  ;;  %v5012_v48 = vpop.eup %3857  ;;  %3873 = vpow2.f32 %v1287_v2  ;;  %1695 = vmatpush1.bf16.xpose.msra.mxu1 %v1357_v34  ;;  %v1195_v33 = vsub.f32 %v4827_v7, %v1119_v50  ;;  %v1196_v52 = vsub.f32 %v4829_v39, %v1119_v50 }
 0x3a4   : > { %v1197_v44 = vsub.f32 %v4833_v6, %v1122_v29  ;;  %v5017_v59 = vpop.eup %3859  ;;  %3875 = vpow2.f32 %v1289_v10  ;;  %1696 = vmatprep.subr.bf16.mxu1 %v1360_v55  ;;  %v1198_v13 = vsub.f32 %v4835_v17, %v1122_v29  ;;  %v1363_v26 = vpack.c.bf16 %v5012_v48, %v5006_v40  ;;  %v1414_v48 = vld [vmem:[%s5832_s7 + $0x78] sm:$0x1] }
 0x3a5   : > { %v5022_v11 = vpop.eup %3861  ;;  %3877 = vpow2.f32 %v1291_v12  ;;  %v1295_v19 = vmul.f32 1.442695, %v1195_v33  ;;  %v1297_v41 = vmul.f32 1.442695, %v1196_v52  ;;  %v1364_v5 = vpack.c.bf16 %v5017_v59, %v5010_v22  ;;  %v5964_v52 = vld [vmem:[#allocation52_spill] sm:$0xff] }
 0x3a6   : > { %v1299_v56 = vmul.f32 1.442695, %v1197_v44  ;;  %v5024_v7 = vpop.eup %3863  ;;  %3879 = vpow2.f32 %v1293_v35  ;;  %v1301_v39 = vmul.f32 1.442695, %v1198_v13  ;;  %v1125_v6 = vpop.xlane.xlu0 %1124  ;;  %v5965_v13 = vld [vmem:[#allocation53_spill] sm:$0xff]  ;;  %v5971_v22 = vld [vmem:[#allocation20_spill] sm:$0xff] }
 0x3a7   : > { %v1128_v53 = vpop.xlane.xlu1 %1127  ;;  %v5028_v34 = vpop.eup %3865  ;;  %3881 = vpow2.f32 %v1295_v19  ;;  %v1199_v17 = vsub.f32 %v4839_v8, %v1125_v6  ;;  %v1200_v27 = vsub.f32 %v4841_v16, %v1125_v6 }
 0x3a8   : > { %v1201_v30 = vsub.f32 %v5958_v28, %v1128_v53  ;;  %v5033_v18 = vpop.eup %3867  ;;  %3883 = vpow2.f32 %v1297_v41  ;;  %v1202_v21 = vsub.f32 %v5959_v20, %v1128_v53  ;;  %v1365_v47 = vpack.c.bf16 %v5028_v34, %v5022_v11 }
 0x3a9   : > { %v5038_v23 = vpop.eup %3869  ;;  %3885 = vpow2.f32 %v1299_v56  ;;  %v1303_v51 = vmul.f32 1.442695, %v1199_v17  ;;  %v1305_v58 = vmul.f32 1.442695, %v1200_v27  ;;  %v1366_v32 = vpack.c.bf16 %v5033_v18, %v5024_v7  ;;  %v5966_v56 = vld [vmem:[#allocation54_spill] sm:$0xff] }
 0x3aa   : > { %v1307_v15 = vmul.f32 1.442695, %v1201_v30  ;;  %v5040_v63 = vpop.eup %3871  ;;  %3887 = vpow2.f32 %v1301_v39  ;;  %v1309_v8 = vmul.f32 1.442695, %v1202_v21  ;;  %v1131_v16 = vpop.xlane.xlu0 %1130  ;;  %v2392_v55 = vsel %vm705_vm4, %v5038_v23, 0.0 }
 0x3ab   : > { %v1134_v1 = vpop.xlane.xlu1 %1133  ;;  %3889 = vpow2.f32 %v1303_v51  ;;  %1697 = vmatpush1.bf16.xpose.msra.mxu1 %v1359_v31  ;;  %v1203_v36 = vsub.f32 %v4861_v9, %v1131_v16  ;;  %v1204_v14 = vsub.f32 %v5960_v37, %v1131_v16  ;;  %2393 = vadd.xlane.f32.xlu1 %v2392_v55  ;;  %v2395_v2 = vsel %vm2374_vm5, %v5040_v63, 0.0 }
 0x3ac   : > { %v1205_v45 = vsub.f32 %v5961_v49, %v1134_v1  ;;  %3891 = vpow2.f32 %v1305_v58  ;;  %1698 = vmatprep.subr.bf16.mxu1 %v1362_v42  ;;  %v1206_v46 = vsub.f32 %v5962_v43, %v1134_v1  ;;  %2396 = vadd.xlane.f32.xlu0 %v2395_v2  ;;  %v5963_v42 = vld [vmem:[#allocation51_spill] sm:$0xff]  ;;  %v5968_v1 = vld [vmem:[#allocation56_spill] sm:$0xff]  ;;  %v5970_v49 = vld [vmem:[#allocation58_spill] sm:$0xff] }
 0x3ad   : > { %v5055_v10 = vpop.eup %3873  ;;  %3893 = vpow2.f32 %v1307_v15  ;;  %v1311_v12 = vmul.f32 1.442695, %v1203_v36  ;;  %v1313_v62 = vmul.f32 1.442695, %v1204_v14  ;;  %v5969_v36 = vld [vmem:[#allocation57_spill] sm:$0xff] }
 0x3ae   : > { %v1315_v38 = vmul.f32 1.442695, %v1205_v45  ;;  %v5057_v9 = vpop.eup %3875  ;;  %3895 = vpow2.f32 %v1309_v8  ;;  %v1317_v31 = vmul.f32 1.442695, %v1206_v46  ;;  %v1137_v35 = vpop.xlane.xlu0 %1136  ;;  %v5967_v8 = vld [vmem:[#allocation55_spill] sm:$0xff] }
 0x3af   : > { %v1140_v50 = vpop.xlane.xlu1 %1139  ;;  %v5059_v29 = vpop.eup %3877  ;;  %3897 = vpow2.f32 %v1311_v12  ;;  %v1207_v33 = vsub.f32 %v5963_v42, %v1137_v35  ;;  %v1208_v44 = vsub.f32 %v5964_v52, %v1137_v35 }
 0x3b0   : > { %v1209_v19 = vsub.f32 %v5965_v13, %v1140_v50  ;;  %v5064_v41 = vpop.eup %3879  ;;  %3899 = vpow2.f32 %v1313_v62  ;;  %v1210_v39 = vsub.f32 %v5966_v56, %v1140_v50  ;;  %v1367_v6 = vpack.c.bf16 %v5059_v29, %v5055_v10 }
 0x3b1   : > { %v5069_v53 = vpop.eup %3881  ;;  %3901 = vpow2.f32 %v1315_v38  ;;  %v1319_v17 = vmul.f32 1.442695, %v1207_v33  ;;  %v1321_v27 = vmul.f32 1.442695, %v1208_v44  ;;  %v1368_v58 = vpack.c.bf16 %v5064_v41, %v5057_v9  ;;  %v1413_v33 = vld [vmem:[%s5832_s7 + $0x70] sm:$0xff] }
 0x3b2   : > { %v1323_v28 = vmul.f32 1.442695, %v1209_v19  ;;  %v5071_v30 = vpop.eup %3883  ;;  %3903 = vpow2.f32 %v1317_v31  ;;  %v1325_v20 = vmul.f32 1.442695, %v1210_v39  ;;  %v1143_v21 = vpop.xlane.xlu0 %1142  ;;  %v5972_v31 = vld [vmem:[#allocation21_spill] sm:$0xff] }
 0x3b3   : > { %v1146_v51 = vpop.xlane.xlu1 %1145  ;;  %v5075_v15 = vpop.eup %3885  ;;  %3905 = vpow2.f32 %v1319_v17  ;;  %1699 = vmatpush1.bf16.xpose.msra.mxu1 %v1361_v0  ;;  %v1211_v16 = vsub.f32 %v5967_v8, %v1143_v21  ;;  %v1212_v55 = vsub.f32 %v5968_v1, %v1143_v21  ;;  %v5974_v21 = vld [vmem:[#allocation23_spill] sm:$0xff] }
 0x3b4   : > { %v1213_v37 = vsub.f32 %v5969_v36, %v1146_v51  ;;  %v3888_v14 = vpop.eup %3887  ;;  %3907 = vpow2.f32 %v1321_v27  ;;  %1700 = vmatprep.subr.bf16.mxu1 %v1364_v5  ;;  %v1214_v45 = vsub.f32 %v5970_v49, %v1146_v51  ;;  %v1369_v43 = vpack.c.bf16 %v5075_v15, %v5069_v53  ;;  %v5976_v49 = vld [vmem:[#allocation60_spill] sm:$0xff] }
 0x3b5   : > { %v3890_v46 = vpop.eup %3889  ;;  %3909 = vpow2.f32 %v1323_v28  ;;  %v1327_v25 = vmul.f32 1.442695, %v1211_v16  ;;  %v1329_v4 = vmul.f32 1.442695, %v1212_v55  ;;  %v1370_v38 = vpack.c.bf16 %v3888_v14, %v5071_v30  ;;  %v5973_v30 = vld [vmem:[#allocation22_spill] sm:$0xff] }
 0x3b6   : > { %v1331_v0 = vmul.f32 1.442695, %v1213_v37  ;;  %v3892_v2 = vpop.eup %3891  ;;  %3911 = vpow2.f32 %v1325_v20  ;;  %v1333_v12 = vmul.f32 1.442695, %v1214_v45  ;;  %v1149_v13 = vpop.xlane.xlu0 %1148  ;;  %v5975_v37 = vld [vmem:[#allocation59_spill] sm:$0xff] }
 0x3b7   : > { %v1468_v62 = vpop.permute.xlu1 %1467  ;;  %v3894_v9 = vpop.eup %3893  ;;  %3913 = vpow2.f32 %v1327_v25  ;;  %v1215_v14 = vsub.f32 %v5975_v37, %v1149_v13  ;;  %v1216_v45 = vsub.f32 %v5976_v49, %v1149_v13  ;;  %v5978_v25 = vld [vmem:[#allocation62_spill] sm:$0xff]  ;;  %v5987_v49 = vld [vmem:[#allocation32_spill] sm:$0xff] }
 0x3b8   : > { %v5091_v59 = vadd.f32 %v5971_v22, %v1468_v62  ;;  %v3896_v5 = vpop.eup %3895  ;;  %3915 = vpow2.f32 %v1329_v4  ;;  %v5094_v35 = vadd.f32 %v5972_v31, %v1468_v62  ;;  %v1371_v50 = vpack.c.bf16 %v3894_v9, %v3890_v46  ;;  %v5982_v22 = vld [vmem:[#allocation66_spill] sm:$0xff] }
 0x3b9   : > { %v3898_v42 = vpop.eup %3897  ;;  %3917 = vpow2.f32 %v1331_v0  ;;  %v1372_v52 = vpack.c.bf16 %v3896_v5, %v3892_v2  ;;  %v1335_v11 = vmul.f32 1.442695, %v1215_v14  ;;  %v1337_v34 = vmul.f32 1.442695, %v1216_v45  ;;  %v5979_v0 = vld [vmem:[#allocation63_spill] sm:$0xff]  ;;  %v5988_v45 = vld [vmem:[#allocation37_spill] sm:$0xff] }
 0x3ba   : > { %v3900_v44 = vpop.eup %3899  ;;  %3919 = vpow2.f32 %v1333_v12  ;;  %v5980_v12 = vld [vmem:[#allocation64_spill] sm:$0xff]  ;;  %v4130_v14 = vmov 0.0|0.0  }
 0x3bb   : > { %v3902_v19 = vpop.eup %3901  ;;  %1701 = vmatpush1.bf16.xpose.msra.mxu1 %v1363_v26  ;;  %3921 = vpow2.f32 %v1335_v11  ;;  %v5989_v11 = vpack.c.bf16 %v5987_v49, %v5988_v45 }
 0x3bc   : > { %v3904_v41 = vpop.eup %3903  ;;  %1702 = vmatprep.subr.bf16.mxu1 %v1366_v32  ;;  %1487 = vperm.xlu1 %3764, %v1413_v33   ;;  %v1373_v56 = vpack.c.bf16 %v3902_v19, %v3898_v42  ;;  %3923 = vpow2.f32 %v1337_v34  ;;  %v5983_v19 = vld [vmem:[#allocation26_spill] sm:$0xff]  ;;  %v5990_v34 = vld [vmem:[#allocation39_spill] sm:$0xff] }
 0x3bd   : > { %v3906_v39 = vpop.eup %3905  ;;  %v1374_v53 = vpack.c.bf16 %v3904_v41, %v3900_v44 }
 0x3be   : > { %v3908_v17 = vpop.eup %3907  ;;  %v1473_v27 = vpop.permute.xlu0 %1472 }
 0x3bf   : > { %v3910_v28 = vpop.eup %3909  ;;  %v5106_v20 = vadd.f32 %v5973_v30, %v1473_v27  ;;  %v5109_v51 = vadd.f32 %v5974_v21, %v1473_v27  ;;  %v5986_v27 = vld [vmem:[#allocation25_spill] sm:$0xff] }
 0x3c0   : > { %v3912_v40 = vpop.eup %3911  ;;  %v1375_v26 = vpack.c.bf16 %v3910_v28, %v3906_v39 }
 0x3c1   : > { %v3914_v7 = vpop.eup %3913  ;;  %v1682_v18 = vpack.c.bf16 %v5106_v20, %v5091_v59  ;;  %v1683_v32 = vpack.c.bf16 %v5109_v51, %v5094_v35  ;;  %v1376_v15 = vpack.c.bf16 %v3912_v40, %v3908_v17  ;;  %v6011_v51 = vld [vmem:[#allocation31_spill] sm:$0xff] }
 0x3c2   : > { %v3916_v8 = vpop.eup %3915  ;;  %1492 = vperm.xlu0 %3763, %v1414_v48  }
 0x3c3   : > { %v3918_v16 = vpop.eup %3917  ;;  %1703 = vmatpush1.bf16.xpose.msra.mxu1 %v1365_v47 }
 0x3c4   : > { %v3920_v1 = vpop.eup %3919  ;;  %1704 = vmatprep.subr.bf16.mxu1 %v1368_v58  ;;  %v1377_v55 = vpack.c.bf16 %v3918_v16, %v3914_v7  ;;  %v5977_v58 = vld [vmem:[#allocation61_spill] sm:$0xff] }
 0x3c5   : > { %v1378_v36 = vpack.c.bf16 %v3920_v1, %v3916_v8  ;;  %v3922_v13 = vpop.eup %3921 }
 0x3c6   : > { %v3924_v30 = vpop.eup %3923 }
 0x3cb   : > { %1705 = vmatpush1.bf16.xpose.msra.mxu1 %v1367_v6 }
 0x3cc   : > { %1706 = vmatprep.subr.bf16.mxu1 %v1370_v38  ;;  %v5981_v38 = vld [vmem:[#allocation65_spill] sm:$0xff] }
 0x3d3   : > { %1707 = vmatpush1.bf16.xpose.msra.mxu1 %v1369_v43 }
 0x3d4   : > { %1708 = vmatprep.subr.bf16.mxu1 %v1372_v52 }
 0x3db   : > { %1709 = vmatpush1.bf16.xpose.msra.mxu1 %v1371_v50 }
 0x3dc   : > { %1710 = vmatprep.subr.bf16.mxu1 %v1374_v53  ;;  %v5985_v53 = vld [vmem:[#allocation24_spill] sm:$0xff] }
 0x3e3   : > { %1711 = vmatpush1.bf16.xpose.msra.mxu1 %v1373_v56  ;;  %v5984_v56 = vld [vmem:[#allocation27_spill] sm:$0xff] }
 0x3e4   : > { %1712 = vmatprep.subr.bf16.mxu1 %v1376_v15 }
 0x3e7   : > { %v1152_v47 = vpop.xlane.xlu1 %1151 }
 0x3e8   : > { %v1217_v46 = vsub.f32 %v5977_v58, %v1152_v47  ;;  %v1218_v4 = vsub.f32 %v5978_v25, %v1152_v47  ;;  %v5991_v47 = vld [vmem:[#allocation34_spill] sm:$0xff]  ;;  %v5994_v25 = vld [vmem:[#allocation33_spill] sm:$0xff] }
 0x3e9   : > { %v5992_v58 = vpack.c.bf16 %v5990_v34, %v5991_v47  ;;  %v5312_v34 = vld [vmem:[%s5304_s12 + $0x18] sm:$0xff]  ;;  %v5315_v47 = vld [vmem:[%s5304_s12] sm:$0xff] }
 0x3ea   : > { %v1339_v10 = vmul.f32 1.442695, %v1217_v46  ;;  %v1341_v29 = vmul.f32 1.442695, %v1218_v4  ;;  %v5993_v46 = vld [vmem:[#allocation38_spill] sm:$0xff] }
 0x3eb   : > { %1713 = vmatpush1.bf16.xpose.msra.mxu1 %v1375_v26  ;;  %v1155_v6 = vpop.xlane.xlu0 %1154  ;;  %v1158_v43 = vpop.xlane.xlu1 %1157  ;;  %v5995_v4 = vpack.c.bf16 %v5993_v46, %v5994_v25  ;;  %v5322_v25 = vld [vmem:[%s5304_s12 + $0x10] sm:$0xff] }
 0x3ec   : > { %3925 = vpow2.f32 %v1339_v10  ;;  %1714 = vmatprep.subr.bf16.mxu1 %v1378_v36  ;;  %v1219_v2 = vsub.f32 %v5979_v0, %v1155_v6  ;;  %v1220_v62 = vsub.f32 %v5980_v12, %v1155_v6  ;;  %v1221_v9 = vsub.f32 %v5981_v38, %v1158_v43  ;;  %v5996_v10 = vld [vmem:[#allocation41_spill] sm:$0xff]  ;;  %v6000_v0 = vld [vmem:[#allocation35_spill] sm:$0xff] }
 0x3ed   : > { %3927 = vpow2.f32 %v1341_v29  ;;  %v1222_v5 = vsub.f32 %v5982_v22, %v1158_v43  ;;  %v5997_v29 = vld [vmem:[#allocation36_spill] sm:$0xff]  ;;  %v6002_v12 = vld [vmem:[#allocation45_spill] sm:$0xff]  ;;  %v6006_v22 = vld [vmem:[#allocation42_spill] sm:$0xff] }
 0x3ee   : > { %v1343_v31 = vmul.f32 1.442695, %v1219_v2  ;;  %v1345_v50 = vmul.f32 1.442695, %v1220_v62  ;;  %v1347_v42 = vmul.f32 1.442695, %v1221_v9  ;;  %v5998_v6 = vpack.c.bf16 %v5996_v10, %v5997_v29 }
 0x3ef   : > { %v1349_v33 = vmul.f32 1.442695, %v1222_v5  ;;  %v1483_v52 = vpop.permute.xlu1 %1482  ;;  %v5999_v43 = vld [vmem:[#allocation40_spill] sm:$0xff]  ;;  %v6003_v62 = vld [vmem:[#allocation43_spill] sm:$0xff]  ;;  %v5328_v10 = vld [vmem:[%s5304_s12 + $0x38] sm:$0xff] }
 0x3f0   : > { %3929 = vpow2.f32 %v1343_v31  ;;  %v1658_v41 = vadd.f32 %v5983_v19, %v1483_v52  ;;  %v1660_v39 = vadd.f32 %v5984_v56, %v1483_v52  ;;  %v6001_v2 = vpack.c.bf16 %v5999_v43, %v6000_v0  ;;  %v6005_v9 = vld [vmem:[#allocation44_spill] sm:$0xff]  ;;  %v5337_v0 = vld [vmem:[%s5304_s12 + $0x20] sm:$0xff] }
 0x3f1   : > { %3931 = vpow2.f32 %v1345_v50  ;;  %v6004_v38 = vpack.c.bf16 %v6002_v12, %v6003_v62  ;;  %v6007_v5 = vpack.c.bf16 %v6005_v9, %v6006_v22  ;;  %v6012_v19 = vmov 0.0   ;;  %v2404_v56 = vld [vmem:[%s5833_s8 + $0x10] sm:$0xff]  ;;  %v5343_v12 = vld [vmem:[%s5304_s12 + $0x48] sm:$0xff] }
 0x3f2   : > { %3933 = vpow2.f32 %v1347_v42  ;;  %v6008_v42 = vld [vmem:[#allocation28_spill] sm:$0xff] }
 0x3f3   : > { %3935 = vpow2.f32 %v1349_v33  ;;  %1715 = vmatpush1.bf16.xpose.msra.mxu1 %v1377_v55  ;;  %v1478_v44 = vpop.permute.xlu0 %1477  ;;  %v6010_v33 = vld [vmem:[#allocation30_spill] sm:$0xff] }
 0x3f4   : > { %v1654_v17 = vadd.f32 %v5985_v53, %v1478_v44  ;;  %v1656_v28 = vadd.f32 %v5986_v27, %v1478_v44  ;;  %v2406_v53 = vld [vmem:[%s5833_s8 + $0x20] sm:$0xff] }
 0x3f6   : > { %v3926_v21 = vpop.eup %3925  ;;  %v1684_v40 = vpack.c.bf16 %v1658_v41, %v1654_v17  ;;  %v1685_v48 = vpack.c.bf16 %v1660_v39, %v1656_v28  ;;  %v2405_v39 = vld [vmem:[%s5833_s8 + $0x18] sm:$0xff]  ;;  %v2407_v17 = vld [vmem:[%s5833_s8 + $0x28] sm:$0xff]  ;;  %v2408_v28 = vld [vmem:[%s5833_s8 + $0x30] sm:$0xff] }
 0x3f7   : > { %v3928_v26 = vpop.eup %3927  ;;  %v1379_v7 = vpack.c.bf16 %v3926_v21, %v3922_v13  ;;  %v2409_v21 = vld [vmem:[%s5833_s8 + $0x38] sm:$0xff] }
 0x3f8   : > { %v1380_v15 = vpack.c.bf16 %v3928_v26, %v3924_v30  ;;  %v2411_v26 = vld [vmem:[%s5833_s8 + $0x48] sm:$0xff] }
 0x3fa   : > { %v3930_v8 = vpop.eup %3929  ;;  %1716 = vmatprep.subr.bf16.mxu1 %v1380_v15  ;;  %v2412_v15 = vld [vmem:[%s5833_s8 + $0x50] sm:$0xff] }
 0x3fb   : > { %v3932_v16 = vpop.eup %3931  ;;  %1717 = vmatpush1.bf16.xpose.msra.mxu1 %v1379_v7  ;;  %v3623_v7 = vpack.c.bf16 %v2407_v17, %v2406_v53 }
 0x3fc   : > { %v3934_v1 = vpop.eup %3933 }
 0x3fd   : > { %v3936_v55 = vpop.eup %3935  ;;  %v1381_v36 = vpack.c.bf16 %v3934_v1, %v3930_v8  ;;  %v2413_v8 = vld [vmem:[%s5833_s8 + $0x58] sm:$0xff]  ;;  %v2414_v1 = vld [vmem:[%s5833_s8 + $0x60] sm:$0xff] }
 0x3fe   : > { %v1382_v37 = vpack.c.bf16 %v3936_v55, %v3932_v16  ;;  %v3627_v16 = vpack.c.bf16 %v2409_v21, %v2408_v28  ;;  %v2415_v55 = vld [vmem:[%s5833_s8 + $0x68] sm:$0xff]  ;;  %v3635_v49 = vpack.c.bf16 %v2413_v8, %v2412_v15 }
 0x3ff   : > { %v3639_v45 = vpack.c.bf16 %v2415_v55, %v2414_v1 }
 0x400   : > { %1718 = vmatprep.subr.bf16.mxu1 %v1382_v37  ;;  %v2416_v37 = vld [vmem:[%s5833_s8 + $0x70] sm:$0xff] }
 0x403   : > { %1719 = vmatpush1.bf16.xpose.msra.mxu1 %v1381_v36 }
 0x404   : > { %3610 = vmatprep.subr.bf16.mxu1 %v4130_v14 }
 0x40a   : > { %1721 = vmatmul.mubr.bf16.vlgmr.msra.gmra.mrb[64].mxu1 %v5989_v11  ;;  %v5309_v11 = vld [vmem:[%s5304_s12 + $0x8] sm:$0xff] }
 0x40b   : > { %1730 = vmatprep.mubr.bf16.mxu1 %v5992_v58  ;;  %v520_v46 = vpack.c.bf16 %v5312_v34, %v5309_v11 }
 0x40d   : > { %2858 = vmatprep.subr.bf16.mxu0 %v520_v46 }
 0x412   : > { %1731 = vmatmul.mubr.bf16.gmra.mrb[68].mxu1 %v5995_v4  ;;  %v5325_v4 = vld [vmem:[%s5304_s12 + $0x28] sm:$0xff] }
 0x413   : > { %1740 = vmatprep.mubr.bf16.mxu1 %v5998_v6  ;;  %v519_v6 = vpack.c.bf16 %v5322_v25, %v5315_v47  ;;  %v522_v43 = vpack.c.bf16 %v5328_v10, %v5325_v4 }
 0x415   : > { %2859 = vmatpush1.bf16.msra.mxu0 %v519_v6 }
 0x416   : > { %2860 = vmatprep.subr.bf16.mxu0 %v522_v43 }
 0x41a   : > { %1741 = vmatmul.mubr.bf16.gmra.mrb[72].mxu1 %v6001_v2  ;;  %v5340_v2 = vld [vmem:[%s5304_s12 + $0x30] sm:$0xff] }
 0x41b   : > { %1750 = vmatprep.mubr.bf16.mxu1 %v6004_v38  ;;  %v5348_v38 = vld [vmem:[%s5304_s12 + $0x58] sm:$0xff]  ;;  %v521_v9 = vpack.c.bf16 %v5340_v2, %v5337_v0 }
 0x41c   : > { %v524_v22 = vpack.c.bf16 %v5348_v38, %v5343_v12 }
 0x41d   : > { %2861 = vmatpush1.bf16.msra.mxu0 %v521_v9 }
 0x41e   : > { %2862 = vmatprep.subr.bf16.mxu0 %v524_v22 }
 0x422   : > { %1751 = vmatmul.mubr.bf16.gmra.mrb[76].mxu1 %v6007_v5  ;;  %v5355_v5 = vld [vmem:[%s5304_s12 + $0x40] sm:$0xff] }
 0x423   : > { %1760 = vmatprep.mubr.bf16.mxu1 %v1681_v61 }
 0x42a   : > { %1761 = vmatmul.mubr.bf16.gmra.mrb[80].mxu1 %v1680_v3 }
 0x42b   : > { %1770 = vmatprep.mubr.bf16.mxu1 %v1683_v32 }
 0x432   : > { %1771 = vmatmul.mubr.bf16.gmra.mrb[84].mxu1 %v1682_v18 }
 0x433   : > { %1780 = vmatprep.mubr.bf16.mxu1 %v1685_v48  ;;  %v2410_v48 = vld [vmem:[%s5833_s8 + $0x40] sm:$0xff] }
 0x434   : > { %v3631_v36 = vpack.c.bf16 %v2411_v26, %v2410_v48 }
 0x438   : > { %v2394_v31 = vpop.xlane.xlu1 %2393 }
 0x439   : > { %3937 = vrcp.f32 %v2394_v31  ;;  %v2397_v50 = vpop.xlane.xlu0 %2396  ;;  %v5358_v31 = vld [vmem:[%s5304_s12 + $0x50] sm:$0xff] }
 0x43a   : > { %1781 = vmatmul.mubr.bf16.gmra.mrb[88].mxu1 %v1684_v40  ;;  %3939 = vrcp.f32 %v2397_v50  ;;  %v3619_v40 = vpack.c.bf16 %v2405_v39, %v2404_v56  ;;  %v5361_v50 = vld [vmem:[%s5304_s12 + $0x68] sm:$0xff] }
 0x43c   : > { %v1488_v57 = vpop.permute.xlu1 %1487 }
 0x43d   : > { %v1664_v54 = vadd.f32 %v6008_v42, %v1488_v57  ;;  %v1666_v3 = vadd.f32 %v6009_v60, %v1488_v57  ;;  %v5364_v57 = vld [vmem:[%s5304_s12 + $0x78] sm:$0xff]  ;;  %v5375_v60 = vld [vmem:[%s5304_s12 + $0x60] sm:$0xff] }
 0x441   : > { %v1493_v24 = vpop.permute.xlu0 %1492 }
 0x442   : > { %v1668_v35 = vadd.f32 %v6010_v33, %v1493_v24  ;;  %v1670_v32 = vadd.f32 %v6011_v51, %v1493_v24  ;;  %v5386_v51 = vld [vmem:[%s5304_s12 + $0x98] sm:$0xff] }
 0x443   : > { %v3938_v61 = vpop.eup %3937 }
 0x444   : > { %v2400_v59 = vmul.f32 %v3938_v61, %v5038_v23  ;;  %v3940_v20 = vpop.eup %3939  ;;  %v1686_v18 = vpack.c.bf16 %v1668_v35, %v1664_v54  ;;  %v1687_v52 = vpack.c.bf16 %v1670_v32, %v1666_v3  ;;  %v2402_v23 = vld [vmem:[%s5833_s8] sm:$0xff]  ;;  %v523_v61 = vpack.c.bf16 %v5358_v31, %v5355_v5  ;;  %v5378_v3 = vld [vmem:[%s5304_s12 + $0x70] sm:$0xff]  ;;  %v5383_v35 = vld [vmem:[%s5304_s12 + $0x88] sm:$0xff] }
 0x445   : > { %v2401_v44 = vmul.f32 %v3940_v20, %v5040_v63  ;;  %v2403_v63 = vld [vmem:[%s5833_s8 + $0x8] sm:$0xff]  ;;  %v526_v54 = vpack.c.bf16 %v5364_v57, %v5361_v50  ;;  %v528_v20 = vpack.c.bf16 %v5386_v51, %v5383_v35 }
 0x446   : > { %1790 = vmatprep.mubr.bf16.mxu1 %v1687_v52  ;;  %v3615_v27 = vpack.c.bf16 %v2403_v63, %v2402_v23  ;;  %2863 = vmatpush1.bf16.msra.mxu0 %v523_v61  ;;  %v5398_v52 = vld [vmem:[%s5304_s12 + $0x90] sm:$0xff] }
 0x447   : > { %1791 = vmatmul.mubr.bf16.gmra.mrb[92].mxu1 %v1686_v18  ;;  %v3611_v13 = vpack.c.bf16 %v2401_v44, %v2400_v59  ;;  %v525_v59 = vpack.c.bf16 %v5378_v3, %v5375_v60  ;;  %2864 = vmatprep.subr.bf16.mxu0 %v526_v54  ;;  %v5395_v18 = vld [vmem:[%s5304_s12 + $0x80] sm:$0xff]  ;;  %v5401_v44 = vld [vmem:[%s5304_s12 + $0xa8] sm:$0xff] }
 0x448   : > { %3484 = vmatprep.mubr.msk.f32.mxu1 %vm4131_vm6, %v6012_v19  ;;  %6016 = vst [vmem:[#allocation46_spill] sm:$0xff] %v5401_v44 }
 0x449   : > { %3613 = vmatpush3.bf16.msk.msra.mxu1 %vm4488_vm3, %v3611_v13  ;;  %v5404_v13 = vld [vmem:[%s5304_s12 + $0xb8] sm:$0xff] }
 0x44a   : > { %3614 = vmatprep.subr.bf16.mxu1 %v4130_v14  ;;  %6017 = vst [vmem:[#allocation47_spill] sm:$0xff] %v5404_v13  ;;  %2865 = vmatpush1.bf16.msra.mxu0 %v525_v59  ;;  %v1803_v59 = vlaneseq }
 0x44b   : > { %2866 = vmatprep.subr.bf16.mxu0 %v528_v20 }
 0x44f   : > { %3485 = vmatmul.mubr.msk.f32.vlgmr.msra.gmra.mrb[96].mxu1 %vm705_vm4, %v2402_v23  ;;  %v527_v23 = vpack.c.bf16 %v5398_v52, %v5395_v18 }
 0x450   : > { %3487 = vmatprep.mubr.msk.f32.mxu1 %vm4131_vm6, %v6012_v19 }
 0x451   : > { %2867 = vmatpush1.bf16.msra.mxu0 %v527_v23  ;;  %v1804_v23 = vshrl.u32 %v1803_v59, 7 }
 0x452   : > { %3617 = vmatpush3.bf16.xpose.msk.msra.mxu1 %vm5223_vm7, %v3615_v27  ;;  %v5421_v27 = vld [vmem:[%s5304_s12 + $0xc8] sm:$0xff] }
 0x453   : > { %3488 = vmatmul.mubr.msk.f32.gmra.mrb[98].mxu1 %vm705_vm4, %v2403_v63  ;;  %3618 = vmatprep.subr.bf16.mxu1 %v4130_v14  ;;  %6020 = vst [vmem:[#allocation50_spill] sm:$0xff] %v5421_v27 }
 0x454   : > { %3490 = vmatprep.mubr.msk.f32.mxu1 %vm4131_vm6, %v6012_v19 }
 0x457   : > { %3491 = vmatmul.mubr.msk.f32.gmra.mrb[100].mxu1 %vm705_vm4, %v2404_v56  ;;  %v530_v56 = vpack.c.bf16 %v5404_v13, %v5401_v44 }
 0x458   : > { %3493 = vmatprep.mubr.msk.f32.mxu1 %vm4131_vm6, %v6012_v19 }
 0x459   : > { %2868 = vmatprep.subr.bf16.mxu0 %v530_v56 }
 0x45a   : > { %3621 = vmatpush3.bf16.xpose.msk.msra.mxu1 %vm5223_vm7, %v3619_v40 }
 0x45b   : > { %3494 = vmatmul.mubr.msk.f32.gmra.mrb[102].mxu1 %vm705_vm4, %v2405_v39  ;;  %3622 = vmatprep.subr.bf16.mxu1 %v4130_v14  ;;  %v5415_v39 = vld [vmem:[%s5304_s12 + $0xa0] sm:$0xff] }
 0x45c   : > { %3496 = vmatprep.mubr.msk.f32.mxu1 %vm4131_vm6, %v6012_v19  ;;  %6018 = vst [vmem:[#allocation48_spill] sm:$0xff] %v5415_v39 }
 0x45f   : > { %3497 = vmatmul.mubr.msk.f32.gmra.mrb[104].mxu1 %vm705_vm4, %v2406_v53  ;;  %v5418_v53 = vld [vmem:[%s5304_s12 + $0xb0] sm:$0xff] }
 0x460   : > { %3499 = vmatprep.mubr.msk.f32.mxu1 %vm4131_vm6, %v6012_v19  ;;  %6019 = vst [vmem:[#allocation49_spill] sm:$0xff] %v5418_v53 }
 0x462   : > { %3625 = vmatpush3.bf16.xpose.msk.msra.mxu1 %vm5223_vm7, %v3623_v7 }
 0x463   : > { %3500 = vmatmul.mubr.msk.f32.gmra.mrb[106].mxu1 %vm705_vm4, %v2407_v17  ;;  %3626 = vmatprep.subr.bf16.mxu1 %v4130_v14 }
 0x464   : > { %3502 = vmatprep.mubr.msk.f32.mxu1 %vm4131_vm6, %v6012_v19 }
 0x467   : > { %3503 = vmatmul.mubr.msk.f32.gmra.mrb[108].mxu1 %vm705_vm4, %v2408_v28  ;;  %v5424_v28 = vld [vmem:[%s5304_s12 + $0xd8] sm:$0xff] }
 0x468   : > { %3505 = vmatprep.mubr.msk.f32.mxu1 %vm4131_vm6, %v6012_v19  ;;  %6021 = vst [vmem:[#allocation51_spill] sm:$0xff] %v5424_v28  ;;  %v532_v40 = vpack.c.bf16 %v5424_v28, %v5421_v27 }
 0x46a   : > { %3629 = vmatpush3.bf16.xpose.msk.msra.mxu1 %vm5223_vm7, %v3627_v16 }
 0x46b   : > { %3506 = vmatmul.mubr.msk.f32.gmra.mrb[110].mxu1 %vm705_vm4, %v2409_v21  ;;  %3630 = vmatprep.subr.bf16.mxu1 %v4130_v14  ;;  %v529_v21 = vpack.c.bf16 %v5418_v53, %v5415_v39 }
 0x46c   : > { %3508 = vmatprep.mubr.msk.f32.mxu1 %vm4131_vm6, %v6012_v19 }
 0x46d   : > { %2869 = vmatpush1.bf16.msra.mxu0 %v529_v21 }
 0x46e   : > { %2870 = vmatprep.subr.bf16.mxu0 %v532_v40  ;;  %v1805_v40 = vsub.s32 0, %v1804_v23 }
 0x46f   : > { %3509 = vmatmul.mubr.msk.f32.gmra.mrb[112].mxu1 %vm705_vm4, %v2410_v48 }
 0x470   : > { %3511 = vmatprep.mubr.msk.f32.mxu1 %vm4131_vm6, %v6012_v19 }
 0x472   : > { %3633 = vmatpush3.bf16.xpose.msk.msra.mxu1 %vm5223_vm7, %v3631_v36 }
 0x473   : > { %3512 = vmatmul.mubr.msk.f32.gmra.mrb[114].mxu1 %vm705_vm4, %v2411_v26  ;;  %3634 = vmatprep.subr.bf16.mxu1 %v4130_v14 }
 0x474   : > { %3514 = vmatprep.mubr.msk.f32.mxu1 %vm4131_vm6, %v6012_v19 }
 0x477   : > { %3515 = vmatmul.mubr.msk.f32.gmra.mrb[116].mxu1 %vm705_vm4, %v2412_v15 }
 0x478   : > { %3517 = vmatprep.mubr.msk.f32.mxu1 %vm4131_vm6, %v6012_v19 }
 0x47a   : > { %3637 = vmatpush3.bf16.xpose.msk.msra.mxu1 %vm5223_vm7, %v3635_v49 }
 0x47b   : > { %3518 = vmatmul.mubr.msk.f32.gmra.mrb[118].mxu1 %vm705_vm4, %v2413_v8  ;;  %3638 = vmatprep.subr.bf16.mxu1 %v4130_v14 }
 0x47c   : > { %3520 = vmatprep.mubr.msk.f32.mxu1 %vm4131_vm6, %v6012_v19 }
 0x47f   : > { %3521 = vmatmul.mubr.msk.f32.gmra.mrb[120].mxu1 %vm705_vm4, %v2414_v1 }
 0x480   : > { %3523 = vmatprep.mubr.msk.f32.mxu1 %vm4131_vm6, %v6012_v19 }
 0x482   : > { %3641 = vmatpush3.bf16.xpose.msk.msra.mxu1 %vm5223_vm7, %v3639_v45 }
 0x483   : > { %3524 = vmatmul.mubr.msk.f32.gmra.mrb[122].mxu1 %vm705_vm4, %v2415_v55  ;;  %3557 = vmatprep.subr.mxu1 %v6012_v19 }
 0x484   : > { %3526 = vmatprep.mubr.msk.f32.mxu1 %vm4131_vm6, %v6012_v19 }
 0x487   : > { %3527 = vmatmul.mubr.msk.f32.gmra.mrb[124].mxu1 %vm705_vm4, %v2416_v37 }
 0x488   : > { %3559 = vmatprep.mubr.msk.f32.mxu1 %vm4131_vm6, %v6012_v19 }
 0x48a   : > { %3558 = vmatpush3.xpose.msk.msra.mxu1 %vm705_vm4, %v2416_v37 }
 0x4dd   : > { %v5306_v14 = vpop.f32.mrb[64].mxu1 }
 0x4de   : > { %v5317_v58 = vpop.f32.mrb[65].mxu1 }
 0x4df   : > { %v5330_v29 = vpop.f32.mrb[66].mxu1 }
 0x4e0   : > { %v5345_v62 = vpop.f32.mrb[67].mxu1 }
 0x4e5   : > { %v5366_v24 = vpop.f32.mrb[68].mxu1 }
 0x4e6   : > { %v5370_v42 = vpop.f32.mrb[69].mxu1 }
 0x4e7   : > { %v5380_v33 = vpop.f32.mrb[70].mxu1 }
 0x4e8   : > { %v5388_v32 = vpop.f32.mrb[71].mxu1 }
 0x4ed   : > { %v5406_v41 = vpop.f32.mrb[72].mxu1 }
 0x4ee   : > { %v5410_v63 = vpop.f32.mrb[73].mxu1 }
 0x4ef   : > { %v1746_v17 = vpop.f32.mrb[74].mxu1 }
 0x4f0   : > { %v1748_v30 = vpop.f32.mrb[75].mxu1 }
 0x4f5   : > { %v1752_v48 = vpop.f32.mrb[76].mxu1 }
 0x4f6   : > { %v1754_v26 = vpop.f32.mrb[77].mxu1 }
 0x4f7   : > { %v1756_v7 = vpop.f32.mrb[78].mxu1 }
 0x4f8   : > { %v1758_v15 = vpop.f32.mrb[79].mxu1 }
 0x4fd   : > { %v1762_v8 = vpop.f32.mrb[80].mxu1 }
 0x4fe   : > { %v1764_v16 = vpop.f32.mrb[81].mxu1 }
 0x4ff   : > { %v1766_v1 = vpop.f32.mrb[82].mxu1 }
 0x500   : > { %v1768_v55 = vpop.f32.mrb[83].mxu1 }
 0x505   : > { %v1772_v36 = vpop.f32.mrb[84].mxu1 }
 0x506   : > { %v1774_v37 = vpop.f32.mrb[85].mxu1 }
 0x507   : > { %v1776_v49 = vpop.f32.mrb[86].mxu1 }
 0x508   : > { %v1778_v45 = vpop.f32.mrb[87].mxu1 }
 0x50d   : > { %v1782_v46 = vpop.f32.mrb[88].mxu1 }
 0x50e   : > { %v1784_v6 = vpop.f32.mrb[89].mxu1 }
 0x50f   : > { %v1786_v43 = vpop.f32.mrb[90].mxu1 }
 0x510   : > { %v1788_v9 = vpop.f32.mrb[91].mxu1 }
 0x51a   : > { %v5430_v22 = vpop.f32.mrb[92].mxu1 }
 0x51b   : > { %v5432_v61 = vpop.f32.mrb[93].mxu1 }
 0x51c   : > { %v1796_v54 = vpop.f32.mrb[94].mxu1 }
 0x51d   : > { %3941 = vrcp.f32 %v1796_v54  ;;  %v1798_v20 = vpop.f32.mrb[95].mxu1 }
 0x51e   : > { %3943 = vrcp.f32 %v1798_v20 }
 0x522   : > { %v2531_v56 = vpop.f32.mrb[96].mxu1 }
 0x523   : > { %3560 = vmatmul.mubr.msk.f32.vlgmr.msra.gmra.mrb[126].mxu1 %vm705_vm4, %v2531_v56  ;;  %v3486_v21 = vpop.f32.mrb[97].mxu1 }
 0x524   : > { %3562 = vmatprep.mubr.msk.f32.mxu1 %vm4131_vm6, %v6012_v19 }
 0x526   : > { %v2536_v28 = vpop.f32.mrb[98].mxu1 }
 0x527   : > { %v3942_v27 = vpop.eup %3941  ;;  %3563 = vmatmul.mubr.msk.f32.gmra.mrb[128].mxu1 %vm705_vm4, %v2536_v28  ;;  %v3489_v13 = vpop.f32.mrb[99].mxu1 }
 0x528   : > { %v3944_v53 = vpop.eup %3943  ;;  %v1806_v44 = vrot.slane %v3942_v27, %v1805_v40  ;;  %3565 = vmatprep.mubr.msk.f32.mxu1 %vm4131_vm6, %v6012_v19 }
 0x529   : > { %v1810_v54 = vrot.slane %v3944_v53, %v1805_v40 }
 0x52a   : > { %v2541_v59 = vpop.f32.mrb[100].mxu1  ;;  %v5441_v20 = vmul.f32 %v1806_v44, %v5306_v14  ;;  %v5444_v23 = vmul.f32 %v1806_v44, %v5330_v29  ;;  %v5447_v56 = vmul.f32 %v1806_v44, %v5366_v24  ;;  %v5450_v21 = vmul.f32 %v1806_v44, %v5380_v33 }
 0x52b   : > { %3566 = vmatmul.mubr.msk.f32.gmra.mrb[130].mxu1 %vm705_vm4, %v2541_v59  ;;  %v3492_v13 = vpop.f32.mrb[101].mxu1  ;;  %v5454_v27 = vmul.f32 %v1810_v54, %v5317_v58  ;;  %v5457_v53 = vmul.f32 %v1810_v54, %v5345_v62  ;;  %v5460_v14 = vmul.f32 %v1810_v54, %v5370_v42  ;;  %v5463_v29 = vmul.f32 %v1810_v54, %v5388_v32 }
 0x52c   : > { %3568 = vmatprep.mubr.msk.f32.mxu1 %vm4131_vm6, %v6012_v19  ;;  %v5468_v33 = vmul.f32 %v1806_v44, %v5406_v41  ;;  %v5471_v28 = vmul.f32 %v1810_v54, %v5410_v63  ;;  %v5473_v58 = vmul.f32 %v1806_v44, %v1746_v17  ;;  %v5475_v62 = vmul.f32 %v1810_v54, %v1748_v30 }
 0x52d   : > { %v5478_v40 = vmul.f32 %v1806_v44, %v1752_v48  ;;  %v5480_v32 = vmul.f32 %v1810_v54, %v1754_v26  ;;  %v5482_v59 = vmul.f32 %v1806_v44, %v1756_v7  ;;  %v5484_v13 = vmul.f32 %v1810_v54, %v1758_v15 }
 0x52e   : > { %v2546_v24 = vpop.f32.mrb[102].mxu1  ;;  %v5488_v63 = vmul.f32 %v1806_v44, %v1762_v8  ;;  %v5490_v17 = vmul.f32 %v1810_v54, %v1764_v16  ;;  %v5492_v30 = vmul.f32 %v1806_v44, %v1766_v1  ;;  %v5497_v26 = vmul.f32 %v1806_v44, %v1772_v36 }
 0x52f   : > { %3569 = vmatmul.mubr.msk.f32.gmra.mrb[132].mxu1 %vm705_vm4, %v2546_v24  ;;  %v3495_v42 = vpop.f32.mrb[103].mxu1  ;;  %v5494_v24 = vmul.f32 %v1810_v54, %v1768_v55  ;;  %v5499_v7 = vmul.f32 %v1810_v54, %v1774_v37  ;;  %v5501_v15 = vmul.f32 %v1806_v44, %v1776_v49  ;;  %v5507_v16 = vmul.f32 %v1806_v44, %v1782_v46 }
 0x530   : > { %3571 = vmatprep.mubr.msk.f32.mxu1 %vm4131_vm6, %v6012_v19  ;;  %v5503_v42 = vmul.f32 %v1810_v54, %v1778_v45  ;;  %v5509_v1 = vmul.f32 %v1810_v54, %v1784_v6  ;;  %v5511_v55 = vmul.f32 %v1806_v44, %v1786_v43  ;;  %v5517_v37 = vmul.f32 %v1806_v44, %v5430_v22 }
 0x531   : > { %6022 = vst [vmem:[#allocation52_spill] sm:$0xff] %v5507_v16  ;;  %v5520_v49 = vmul.f32 %v1810_v54, %v5432_v61 }
 0x532   : > { %v2551_v41 = vpop.f32.mrb[104].mxu1  ;;  %6023 = vst [vmem:[#allocation53_spill] sm:$0xff] %v5509_v1  ;;  %6024 = vst [vmem:[#allocation54_spill] sm:$0xff] %v5511_v55  ;;  %v6032_v55 = vmov 0  }
 0x533   : > { %3572 = vmatmul.mubr.msk.f32.gmra.mrb[134].mxu1 %vm705_vm4, %v2551_v41  ;;  %v3498_v48 = vpop.f32.mrb[105].mxu1  ;;  %v5513_v41 = vmul.f32 %v1810_v54, %v1788_v9  ;;  %6026 = vst [vmem:[#allocation56_spill] sm:$0xff] %v5517_v37  ;;  %6027 = vst [vmem:[#allocation57_spill] sm:$0xff] %v5520_v49 }
 0x534   : > { %3574 = vmatprep.mubr.msk.f32.mxu1 %vm4131_vm6, %v6012_v19 }
 0x535   : > { %6025 = vst [vmem:[#allocation55_spill] sm:$0xff] %v5513_v41  ;;  %v2792_v41 = vld [vmem:[#allocation7 + $0x10] sm:$0xff] }
 0x536   : > { %v2556_v8 = vpop.f32.mrb[106].mxu1 }
 0x537   : > { %3575 = vmatmul.mubr.msk.f32.gmra.mrb[136].mxu1 %vm705_vm4, %v2556_v8  ;;  %v3501_v36 = vpop.f32.mrb[107].mxu1 }
 0x538   : > { %3577 = vmatprep.mubr.msk.f32.mxu1 %vm4131_vm6, %v6012_v19 }
 0x53a   : > { %v2561_v45 = vpop.f32.mrb[108].mxu1 }
 0x53b   : > { %3578 = vmatmul.mubr.msk.f32.gmra.mrb[138].mxu1 %vm705_vm4, %v2561_v45  ;;  %v3504_v46 = vpop.f32.mrb[109].mxu1 }
 0x53c   : > { %3580 = vmatprep.mubr.msk.f32.mxu1 %vm4131_vm6, %v6012_v19 }
 0x53e   : > { %v2566_v6 = vpop.f32.mrb[110].mxu1 }
 0x53f   : > { %3581 = vmatmul.mubr.msk.f32.gmra.mrb[140].mxu1 %vm705_vm4, %v2566_v6  ;;  %v3507_v43 = vpop.f32.mrb[111].mxu1 }
 0x540   : > { %3583 = vmatprep.mubr.msk.f32.mxu1 %vm4131_vm6, %v6012_v19 }
 0x542   : > { %v2571_v44 = vpop.f32.mrb[112].mxu1 }
 0x543   : > { %3584 = vmatmul.mubr.msk.f32.gmra.mrb[142].mxu1 %vm705_vm4, %v2571_v44  ;;  %v3510_v9 = vpop.f32.mrb[113].mxu1 }
 0x544   : > { %3586 = vmatprep.mubr.msk.f32.mxu1 %vm4131_vm6, %v6012_v19 }
 0x546   : > { %v2576_v22 = vpop.f32.mrb[114].mxu1 }
 0x547   : > { %3587 = vmatmul.mubr.msk.f32.gmra.mrb[144].mxu1 %vm705_vm4, %v2576_v22  ;;  %v3513_v61 = vpop.f32.mrb[115].mxu1  ;;  %v5550_v22 = vld [vmem:[%s5304_s12 + $0xc0] sm:$0xff] }
 0x548   : > { %3589 = vmatprep.mubr.msk.f32.mxu1 %vm4131_vm6, %v6012_v19  ;;  %6028 = vst [vmem:[#allocation58_spill] sm:$0xff] %v5550_v22  ;;  %v5553_v61 = vld [vmem:[%s5304_s12 + $0xd0] sm:$0xff] }
 0x549   : > { %6029 = vst [vmem:[#allocation20_spill] sm:$0xff] %v5553_v61 }
 0x54a   : > { %v2581_v54 = vpop.f32.mrb[116].mxu1 }
 0x54b   : > { %3590 = vmatmul.mubr.msk.f32.gmra.mrb[146].mxu1 %vm705_vm4, %v2581_v54  ;;  %v3516_v48 = vpop.f32.mrb[117].mxu1  ;;  %v531_v54 = vpack.c.bf16 %v5553_v61, %v5550_v22 }
 0x54c   : > { %3592 = vmatprep.mubr.msk.f32.mxu1 %vm4131_vm6, %v6012_v19  ;;  %v5558_v48 = vld [vmem:[%s5304_s12 + $0xe8] sm:$0xff] }
 0x54d   : > { %2871 = vmatpush1.bf16.msra.mxu0 %v531_v54  ;;  %6030 = vst [vmem:[#allocation21_spill] sm:$0xff] %v5558_v48 }
 0x54e   : > { %v2586_v8 = vpop.f32.mrb[118].mxu1 }
 0x54f   : > { %3593 = vmatmul.mubr.msk.f32.gmra.mrb[148].mxu1 %vm705_vm4, %v2586_v8  ;;  %v3519_v36 = vpop.f32.mrb[119].mxu1  ;;  %v5561_v8 = vld [vmem:[%s5304_s12 + $0xe0] sm:$0xff] }
 0x550   : > { %3595 = vmatprep.mubr.msk.f32.mxu1 %vm4131_vm6, %v6012_v19  ;;  %6031 = vst [vmem:[#allocation22_spill] sm:$0xff] %v5561_v8  ;;  %v534_v36 = vpack.c.bf16 %v5558_v48, %v5558_v48 }
 0x552   : > { %v2591_v45 = vpop.f32.mrb[120].mxu1  ;;  %3421 = vmatprep.subr.msk.bf16.mxu0 %vm571_vm0, %v534_v36 }
 0x553   : > { %3596 = vmatmul.mubr.msk.f32.gmra.mrb[150].mxu1 %vm705_vm4, %v2591_v45  ;;  %v3522_v46 = vpop.f32.mrb[121].mxu1 }
 0x554   : > { %3598 = vmatprep.mubr.msk.f32.mxu1 %vm4131_vm6, %v6012_v19 }
 0x556   : > { %v2596_v6 = vpop.f32.mrb[122].mxu1 }
 0x557   : > { %3599 = vmatmul.mubr.msk.f32.gmra.mrb[152].mxu1 %vm705_vm4, %v2596_v6  ;;  %v3525_v43 = vpop.f32.mrb[123].mxu1 }
 0x558   : > { %3601 = vmatprep.mubr.msk.f32.mxu1 %vm4131_vm6, %v6012_v19  ;;  %v533_v19 = vpack.c.bf16 %v5561_v8, %v5561_v8  ;;  %v2790_v43 = vld [vmem:[#allocation7] sm:$0xff]  ;;  %v2793_v8 = vld [vmem:[#allocation7 + $0x18] sm:$0xff] }
 0x55a   : > { %v2601_v44 = vpop.f32.mrb[124].mxu1  ;;  %v2853_v45 = vsel %vm571_vm0, %v533_v19, 0 }
 0x55b   : > { %3602 = vmatmul.mubr.msk.f32.gmra.mrb[154].mxu1 %vm705_vm4, %v2601_v44  ;;  %v3528_v9 = vpop.f32.mrb[125].mxu1  ;;  %2873 = vmatpush1.bf16.msra.mxu0 %v2853_v45  ;;  %v2791_v44 = vld [vmem:[#allocation7 + $0x8] sm:$0xff] }
 0x5f6   : > { %v2716_v46 = vpop.f32.mrb[126].mxu1 }
 0x5f7   : > { %v3561_v6 = vpop.f32.mrb[127].mxu1  ;;  %v2805_v54 = vmul.f32 %v2790_v43, %v2716_v46  ;;  %v2794_v43 = vld [vmem:[#allocation7 + $0x20] sm:$0xff] }
 0x5fa   : > { %v2721_v9 = vpop.f32.mrb[128].mxu1 }
 0x5fb   : > { %v2806_v49 = vmul.f32 %v2791_v44, %v2721_v9  ;;  %v3564_v37 = vpop.f32.mrb[129].mxu1 }
 0x5fc   : > { %v2795_v37 = vld [vmem:[#allocation7 + $0x28] sm:$0xff] }
 0x5fd   : > { %v2820_v61 = vpack.c.bf16 %v2806_v49, %v2805_v54 }
 0x5fe   : > { %v2726_v22 = vpop.f32.mrb[130].mxu1 }
 0x5ff   : > { %3422 = vmatmul.mubr.msk.bf16.vlgmr.msra.gmra.mrb[44].mxu0 %vm564_vm1, %v2820_v61  ;;  %v3567_v48 = vpop.f32.mrb[131].mxu1  ;;  %v2807_v19 = vmul.f32 %v2792_v41, %v2726_v22  ;;  %v2796_v22 = vld [vmem:[#allocation7 + $0x30] sm:$0xff] }
 0x600   : > { %2900 = vmatprep.mubr.bf16.mxu0 %v6032_v55 }
 0x602   : > { %v2731_v36 = vpop.f32.mrb[132].mxu1 }
 0x603   : > { %v2808_v45 = vmul.f32 %v2793_v8, %v2731_v36  ;;  %v3570_v1 = vpop.f32.mrb[133].mxu1 }
 0x604   : > { %v2797_v1 = vld [vmem:[#allocation7 + $0x38] sm:$0xff] }
 0x605   : > { %v2821_v6 = vpack.c.bf16 %v2808_v45, %v2807_v19 }
 0x606   : > { %v2736_v16 = vpop.f32.mrb[134].mxu1 }
 0x607   : > { %3423 = vmatmul.mubr.msk.bf16.gmra.mrb[48].mxu0 %vm564_vm1, %v2821_v6  ;;  %v3573_v46 = vpop.f32.mrb[135].mxu1  ;;  %v2809_v61 = vmul.f32 %v2794_v43, %v2736_v16  ;;  %v2798_v43 = vld [vmem:[#allocation7 + $0x40] sm:$0xff] }
 0x608   : > { %2910 = vmatprep.mubr.bf16.mxu0 %v6032_v55 }
 0x60a   : > { %v2741_v49 = vpop.f32.mrb[136].mxu1 }
 0x60b   : > { %v2810_v48 = vmul.f32 %v2795_v37, %v2741_v49  ;;  %v3576_v44 = vpop.f32.mrb[137].mxu1  ;;  %v2799_v37 = vld [vmem:[#allocation7 + $0x48] sm:$0xff] }
 0x60d   : > { %v2822_v9 = vpack.c.bf16 %v2810_v48, %v2809_v61 }
 0x60e   : > { %v2746_v54 = vpop.f32.mrb[138].mxu1 }
 0x60f   : > { %3424 = vmatmul.mubr.msk.bf16.gmra.mrb[52].mxu0 %vm564_vm1, %v2822_v9  ;;  %v3579_v41 = vpop.f32.mrb[139].mxu1  ;;  %v2811_v36 = vmul.f32 %v2796_v22, %v2746_v54  ;;  %v2800_v22 = vld [vmem:[#allocation7 + $0x50] sm:$0xff] }
 0x610   : > { %2920 = vmatprep.mubr.bf16.mxu0 %v6032_v55 }
 0x612   : > { %v2751_v8 = vpop.f32.mrb[140].mxu1 }
 0x613   : > { %v2812_v19 = vmul.f32 %v2797_v1, %v2751_v8  ;;  %v3582_v45 = vpop.f32.mrb[141].mxu1  ;;  %v2801_v1 = vld [vmem:[#allocation7 + $0x58] sm:$0xff] }
 0x615   : > { %v2823_v6 = vpack.c.bf16 %v2812_v19, %v2811_v36 }
 0x616   : > { %v2756_v46 = vpop.f32.mrb[142].mxu1 }
 0x617   : > { %3425 = vmatmul.mubr.msk.bf16.gmra.mrb[56].mxu0 %vm564_vm1, %v2823_v6  ;;  %v3585_v16 = vpop.f32.mrb[143].mxu1  ;;  %v2813_v61 = vmul.f32 %v2798_v43, %v2756_v46  ;;  %v2802_v43 = vld [vmem:[#allocation7 + $0x60] sm:$0xff] }
 0x618   : > { %2930 = vmatprep.mubr.bf16.mxu0 %v6032_v55 }
 0x61a   : > { %v2761_v49 = vpop.f32.mrb[144].mxu1 }
 0x61b   : > { %v2814_v48 = vmul.f32 %v2799_v37, %v2761_v49  ;;  %v3588_v44 = vpop.f32.mrb[145].mxu1  ;;  %v2803_v37 = vld [vmem:[#allocation7 + $0x68] sm:$0xff] }
 0x61d   : > { %v2824_v9 = vpack.c.bf16 %v2814_v48, %v2813_v61 }
 0x61e   : > { %v2766_v41 = vpop.f32.mrb[146].mxu1 }
 0x61f   : > { %3426 = vmatmul.mubr.msk.bf16.gmra.mrb[60].mxu0 %vm564_vm1, %v2824_v9  ;;  %v3591_v54 = vpop.f32.mrb[147].mxu1  ;;  %v2815_v36 = vmul.f32 %v2800_v22, %v2766_v41  ;;  %v2804_v9 = vld [vmem:[#allocation7 + $0x70] sm:$0xff] }
 0x620   : > { %2940 = vmatprep.mubr.bf16.mxu0 %v6032_v55 }
 0x622   : > { %v2771_v8 = vpop.f32.mrb[148].mxu1 }
 0x623   : > { %v2816_v19 = vmul.f32 %v2801_v1, %v2771_v8  ;;  %v3594_v45 = vpop.f32.mrb[149].mxu1  ;;  %v5584_v8 = vstv %s441_s25 }
 0x624   : > { %v2970_v45 = vmul.f32 %v5584_v8, %v5441_v20 }
 0x625   : > { %v2825_v6 = vpack.c.bf16 %v2816_v19, %v2815_v36  ;;  %v5586_v36 = vstv %s3298_s28 }
 0x626   : > { %v2776_v16 = vpop.f32.mrb[150].mxu1 }
 0x627   : > { %3427 = vmatmul.mubr.msk.bf16.gmra.mrb[64].mxu0 %vm564_vm1, %v2825_v6  ;;  %v3597_v46 = vpop.f32.mrb[151].mxu1  ;;  %v2817_v61 = vmul.f32 %v2802_v43, %v2776_v16 }
 0x628   : > { %2950 = vmatprep.mubr.bf16.mxu0 %v6032_v55 }
 0x62a   : > { %v2781_v49 = vpop.f32.mrb[152].mxu1 }
 0x62b   : > { %v2818_v48 = vmul.f32 %v2803_v37, %v2781_v49  ;;  %v3600_v44 = vpop.f32.mrb[153].mxu1  ;;  %v2972_v37 = vmul.f32 %v5584_v8, %v5444_v23 }
 0x62d   : > { %v2826_v54 = vpack.c.bf16 %v2818_v48, %v2817_v61  ;;  %v2973_v48 = vmul.f32 %v5584_v8, %v5457_v53 }
 0x62e   : > { %v2786_v39 = vpop.f32.mrb[154].mxu1 }
 0x62f   : > { %3428 = vmatmul.mubr.msk.bf16.gmra.mrb[68].mxu0 %vm564_vm1, %v2826_v54  ;;  %v2819_v41 = vmul.f32 %v2804_v9, %v2786_v39  ;;  %v3603_v22 = vpop.f32.mrb[155].mxu1  ;;  %v3945_v9 = vld [vmem:[%s4350_s11] sm:$0xff] }
 0x630   : > { %2960 = vmatprep.mubr.bf16.mxu0 %v6032_v55  ;;  %v2971_v55 = vmul.f32 %v5584_v8, %v5454_v27 }
 0x631   : > { %v2827_v1 = vpack.c.bf16 %v2819_v41, %v2819_v41  ;;  %v3946_v41 = vld [vmem:[%s4350_s11 + $0x8] sm:$0xff] }
 0x637   : > { %3429 = vmatmul.mubr.msk.bf16.gmra.mrb[72].mxu0 %vm564_vm1, %v2827_v1 }
 0x6d2   : > { %v2892_v19 = vpop.f32.mrb[44].mxu0 }
 0x6d3   : > { %v3001_v39 = vmul.f32 %v5586_v36, %v2892_v19  ;;  %v2894_v6 = vpop.f32.mrb[45].mxu0 }
 0x6d4   : > { %v3002_v16 = vmul.f32 %v5586_v36, %v2894_v6  ;;  %v2896_v46 = vpop.f32.mrb[46].mxu0  ;;  %v3948_v6 = vld [vmem:[%s4350_s11 + $0x18] sm:$0xff] }
 0x6d5   : > { %v3031_v43 = vadd.f32 %v3001_v39, %v2970_v45  ;;  %v3003_v20 = vmul.f32 %v5586_v36, %v2896_v46  ;;  %v2898_v49 = vpop.f32.mrb[47].mxu0  ;;  %v3947_v45 = vld [vmem:[%s4350_s11 + $0x10] sm:$0xff] }
 0x6d6   : > { %v3032_v61 = vadd.f32 %v3002_v16, %v2971_v55  ;;  %v3004_v44 = vmul.f32 %v5586_v36, %v2898_v49  ;;  %v2974_v16 = vmul.f32 %v5584_v8, %v5447_v56  ;;  %v2976_v56 = vmul.f32 %v5584_v8, %v5450_v21 }
 0x6d7   : > { %v3061_v27 = vadd.f32 %v3945_v9, %v3031_v43  ;;  %v3033_v54 = vadd.f32 %v3003_v20, %v2972_v37  ;;  %v2975_v37 = vmul.f32 %v5584_v8, %v5460_v14  ;;  %v3949_v9 = vld [vmem:[%s4350_s11 + $0x20] sm:$0xff] }
 0x6d8   : > { %v3062_v22 = vadd.f32 %v3946_v41, %v3032_v61  ;;  %v3034_v1 = vadd.f32 %v3004_v44, %v2973_v48  ;;  %v3950_v41 = vld [vmem:[%s4350_s11 + $0x28] sm:$0xff] }
 0x6d9   : > { %v3091_v19 = vadd.f32 %v3061_v27, %v5315_v47  ;;  %v3063_v23 = vadd.f32 %v3947_v45, %v3033_v54 }
 0x6da   : > { %v3092_v39 = vadd.f32 %v3062_v22, %v5309_v11  ;;  %v3064_v46 = vadd.f32 %v3948_v6, %v3034_v1  ;;  %v2902_v55 = vpop.f32.mrb[48].mxu0 }
 0x6db   : > { %3121 = vst [vmem:[%s5609_s21] sm:$0xff] %v3091_v19  ;;  %v3093_v53 = vadd.f32 %v3063_v23, %v5322_v25  ;;  %v3005_v47 = vmul.f32 %v5586_v36, %v2902_v55  ;;  %v2904_v43 = vpop.f32.mrb[49].mxu0  ;;  %v3951_v19 = vld [vmem:[%s4350_s11 + $0x30] sm:$0xff]  ;;  %v2978_v55 = vmul.f32 %v5584_v8, %v5468_v33  ;;  %v2980_v33 = vmul.f32 %v5584_v8, %v5473_v58 }
 0x6dc   : > { %3122 = vst [vmem:[%s5609_s21 + $0x8] sm:$0xff] %v3092_v39  ;;  %v3094_v11 = vadd.f32 %v3064_v46, %v5312_v34  ;;  %v3006_v20 = vmul.f32 %v5586_v36, %v2904_v43  ;;  %v2906_v49 = vpop.f32.mrb[50].mxu0  ;;  %v2977_v34 = vmul.f32 %v5584_v8, %v5463_v29  ;;  %v3952_v39 = vld [vmem:[%s4350_s11 + $0x38] sm:$0xff] }
 0x6dd   : > { %3123 = vst [vmem:[%s5609_s21 + $0x10] sm:$0xff] %v3093_v53  ;;  %v3035_v25 = vadd.f32 %v3005_v47, %v2974_v16  ;;  %v3007_v61 = vmul.f32 %v5586_v36, %v2906_v49  ;;  %v2908_v48 = vpop.f32.mrb[51].mxu0  ;;  %v3953_v49 = vld [vmem:[%s4350_s11 + $0x40] sm:$0xff] }
 0x6de   : > { %3124 = vst [vmem:[%s5609_s21 + $0x18] sm:$0xff] %v3094_v11  ;;  %v3036_v44 = vadd.f32 %v3006_v20, %v2975_v37  ;;  %v3008_v14 = vmul.f32 %v5586_v36, %v2908_v48 }
 0x6df   : > { %v3065_v27 = vadd.f32 %v3949_v9, %v3035_v25  ;;  %v3037_v54 = vadd.f32 %v3007_v61, %v2976_v56  ;;  %v3954_v61 = vld [vmem:[%s4350_s11 + $0x48] sm:$0xff] }
 0x6e0   : > { %v3066_v22 = vadd.f32 %v3950_v41, %v3036_v44  ;;  %v3038_v1 = vadd.f32 %v3008_v14, %v2977_v34  ;;  %v3955_v34 = vld [vmem:[%s4350_s11 + $0x50] sm:$0xff] }
 0x6e1   : > { %v3095_v21 = vadd.f32 %v3065_v27, %v5337_v0  ;;  %v3067_v45 = vadd.f32 %v3951_v19, %v3037_v54  ;;  %v3956_v27 = vld [vmem:[%s4350_s11 + $0x58] sm:$0xff] }
 0x6e2   : > { %v3096_v23 = vadd.f32 %v3066_v22, %v5325_v4  ;;  %v3068_v6 = vadd.f32 %v3952_v39, %v3038_v1  ;;  %v2912_v46 = vpop.f32.mrb[52].mxu0  ;;  %v2979_v4 = vmul.f32 %v5584_v8, %v5471_v28  ;;  %v2982_v22 = vmul.f32 %v5584_v8, %v5478_v40 }
 0x6e3   : > { %3125 = vst [vmem:[%s5609_s21 + $0x20] sm:$0xff] %v3095_v21  ;;  %v3097_v29 = vadd.f32 %v3067_v45, %v5340_v2  ;;  %v3009_v53 = vmul.f32 %v5586_v36, %v2912_v46  ;;  %v2914_v16 = vpop.f32.mrb[53].mxu0  ;;  %v2984_v40 = vmul.f32 %v5584_v8, %v5482_v59  ;;  %v3957_v46 = vld [vmem:[%s4350_s11 + $0x60] sm:$0xff] }
 0x6e4   : > { %3126 = vst [vmem:[%s5609_s21 + $0x28] sm:$0xff] %v3096_v23  ;;  %v3098_v0 = vadd.f32 %v3068_v6, %v5328_v10  ;;  %v3010_v47 = vmul.f32 %v5586_v36, %v2914_v16  ;;  %v2916_v43 = vpop.f32.mrb[54].mxu0  ;;  %v2981_v10 = vmul.f32 %v5584_v8, %v5475_v62 }
 0x6e5   : > { %3127 = vst [vmem:[%s5609_s21 + $0x30] sm:$0xff] %v3097_v29  ;;  %v3039_v2 = vadd.f32 %v3009_v53, %v2978_v55  ;;  %v3011_v11 = vmul.f32 %v5586_v36, %v2916_v43  ;;  %v2918_v37 = vpop.f32.mrb[55].mxu0  ;;  %v3958_v53 = vld [vmem:[%s4350_s11 + $0x68] sm:$0xff] }
 0x6e6   : > { %3128 = vst [vmem:[%s5609_s21 + $0x38] sm:$0xff] %v3098_v0  ;;  %v3040_v20 = vadd.f32 %v3010_v47, %v2979_v4  ;;  %v3012_v28 = vmul.f32 %v5586_v36, %v2918_v37  ;;  %v3959_v4 = vld [vmem:[%s4350_s11 + $0x70] sm:$0xff]  ;;  %v2986_v37 = vmul.f32 %v5584_v8, %v5488_v63  ;;  %v2988_v63 = vmul.f32 %v5584_v8, %v5492_v30 }
 0x6e7   : > { %v3069_v25 = vadd.f32 %v3953_v49, %v3039_v2  ;;  %v3041_v56 = vadd.f32 %v3011_v11, %v2980_v33  ;;  %v3960_v2 = vld [vmem:[%s4350_s11 + $0x78] sm:$0xff] }
 0x6e8   : > { %v3070_v48 = vadd.f32 %v3954_v61, %v3040_v20  ;;  %v3042_v44 = vadd.f32 %v3012_v28, %v2981_v10 }
 0x6e9   : > { %v3099_v58 = vadd.f32 %v3069_v25, %v5355_v5  ;;  %v3071_v14 = vadd.f32 %v3955_v34, %v3041_v56  ;;  %v3962_v34 = vld [vmem:[%s4350_s11 + $0x88] sm:$0xff] }
 0x6ea   : > { %v3100_v9 = vadd.f32 %v3070_v48, %v5343_v12  ;;  %v3072_v54 = vadd.f32 %v3956_v27, %v3042_v44  ;;  %v2922_v41 = vpop.f32.mrb[56].mxu0  ;;  %v2983_v12 = vmul.f32 %v5584_v8, %v5480_v32  ;;  %v3961_v48 = vld [vmem:[%s4350_s11 + $0x80] sm:$0xff]  ;;  %v3963_v27 = vld [vmem:[%s4350_s11 + $0x90] sm:$0xff] }
 0x6eb   : > { %3129 = vst [vmem:[%s5609_s21 + $0x40] sm:$0xff] %v3099_v58  ;;  %v3101_v62 = vadd.f32 %v3071_v14, %v5358_v31  ;;  %v3013_v1 = vmul.f32 %v5586_v36, %v2922_v41  ;;  %v2924_v21 = vpop.f32.mrb[57].mxu0 }
 0x6ec   : > { %3130 = vst [vmem:[%s5609_s21 + $0x48] sm:$0xff] %v3100_v9  ;;  %v3102_v5 = vadd.f32 %v3072_v54, %v5348_v38  ;;  %v3014_v19 = vmul.f32 %v5586_v36, %v2924_v21  ;;  %v2926_v45 = vpop.f32.mrb[58].mxu0  ;;  %v2985_v38 = vmul.f32 %v5584_v8, %v5484_v13  ;;  %v2990_v21 = vmul.f32 %v5584_v8, %v5497_v26 }
 0x6ed   : > { %3131 = vst [vmem:[%s5609_s21 + $0x50] sm:$0xff] %v3101_v62  ;;  %v3043_v31 = vadd.f32 %v3013_v1, %v2982_v22  ;;  %v3015_v23 = vmul.f32 %v5586_v36, %v2926_v45  ;;  %v2928_v39 = vpop.f32.mrb[59].mxu0  ;;  %v3964_v62 = vld [vmem:[%s4350_s11 + $0x98] sm:$0xff]  ;;  %v2992_v26 = vmul.f32 %v5584_v8, %v5501_v15  ;;  %v6033_v15 = vld [vmem:[#allocation48_spill] sm:$0xff] }
 0x6ee   : > { %3132 = vst [vmem:[%s5609_s21 + $0x58] sm:$0xff] %v3102_v5  ;;  %v3044_v6 = vadd.f32 %v3014_v19, %v2983_v12  ;;  %v3016_v32 = vmul.f32 %v5586_v36, %v2928_v39  ;;  %v3965_v39 = vld [vmem:[%s4350_s11 + $0xa0] sm:$0xff] }
 0x6ef   : > { %v3073_v29 = vadd.f32 %v3957_v46, %v3043_v31  ;;  %v3045_v55 = vadd.f32 %v3015_v23, %v2984_v40 }
 0x6f0   : > { %v3074_v16 = vadd.f32 %v3958_v53, %v3044_v6  ;;  %v3046_v0 = vadd.f32 %v3016_v32, %v2985_v38  ;;  %v3966_v32 = vld [vmem:[%s4350_s11 + $0xa8] sm:$0xff]  ;;  %v3967_v53 = vld [vmem:[%s4350_s11 + $0xb0] sm:$0xff] }
 0x6f1   : > { %v3103_v59 = vadd.f32 %v3073_v29, %v5375_v60  ;;  %v3075_v47 = vadd.f32 %v3959_v4, %v3045_v55  ;;  %v3968_v4 = vld [vmem:[%s4350_s11 + $0xb8] sm:$0xff] }
 0x6f2   : > { %v3104_v43 = vadd.f32 %v3074_v16, %v5361_v50  ;;  %v3076_v33 = vadd.f32 %v3960_v2, %v3046_v0  ;;  %v2932_v11 = vpop.f32.mrb[60].mxu0  ;;  %v2987_v50 = vmul.f32 %v5584_v8, %v5490_v17  ;;  %v6034_v0 = vld [vmem:[#allocation46_spill] sm:$0xff] }
 0x6f3   : > { %3133 = vst [vmem:[%s5609_s21 + $0x60] sm:$0xff] %v3103_v59  ;;  %v3105_v13 = vadd.f32 %v3075_v47, %v5378_v3  ;;  %v3017_v20 = vmul.f32 %v5586_v36, %v2932_v11  ;;  %v2934_v10 = vpop.f32.mrb[61].mxu0 }
 0x6f4   : > { %3134 = vst [vmem:[%s5609_s21 + $0x68] sm:$0xff] %v3104_v43  ;;  %v3106_v60 = vadd.f32 %v3076_v33, %v5364_v57  ;;  %v3018_v28 = vmul.f32 %v5586_v36, %v2934_v10  ;;  %v2936_v49 = vpop.f32.mrb[62].mxu0  ;;  %v2989_v57 = vmul.f32 %v5584_v8, %v5494_v24  ;;  %v6036_v33 = vld [vmem:[#allocation52_spill] sm:$0xff] }
 0x6f5   : > { %3135 = vst [vmem:[%s5609_s21 + $0x70] sm:$0xff] %v3105_v13  ;;  %v3047_v3 = vadd.f32 %v3017_v20, %v2986_v37  ;;  %v3019_v25 = vmul.f32 %v5586_v36, %v2936_v49  ;;  %v2938_v56 = vpop.f32.mrb[63].mxu0  ;;  %v2994_v11 = vmul.f32 %v5584_v8, %v6036_v33  ;;  %v6037_v20 = vld [vmem:[#allocation47_spill] sm:$0xff] }
 0x6f6   : > { %3136 = vst [vmem:[%s5609_s21 + $0x78] sm:$0xff] %v3106_v60  ;;  %v3048_v61 = vadd.f32 %v3018_v28, %v2987_v50  ;;  %v3020_v17 = vmul.f32 %v5586_v36, %v2938_v56  ;;  %v6038_v60 = vld [vmem:[#allocation53_spill] sm:$0xff] }
 0x6f7   : > { %v3077_v44 = vadd.f32 %v3961_v48, %v3047_v3  ;;  %v3049_v58 = vadd.f32 %v3019_v25, %v2988_v63  ;;  %v2995_v50 = vmul.f32 %v5584_v8, %v6038_v60  ;;  %v6039_v63 = vld [vmem:[#allocation54_spill] sm:$0xff] }
 0x6f8   : > { %v3078_v14 = vadd.f32 %v3962_v34, %v3048_v61  ;;  %v3050_v9 = vadd.f32 %v3020_v17, %v2989_v57  ;;  %v2996_v25 = vmul.f32 %v5584_v8, %v6039_v63  ;;  %v6040_v17 = vld [vmem:[#allocation55_spill] sm:$0xff] }
 0x6f9   : > { %v3107_v30 = vadd.f32 %v3077_v44, %v5395_v18  ;;  %v3079_v54 = vadd.f32 %v3963_v27, %v3049_v58  ;;  %v2997_v48 = vmul.f32 %v5584_v8, %v6040_v17  ;;  %v3969_v58 = vld [vmem:[%s4350_s11 + $0xc0] sm:$0xff] }
 0x6fa   : > { %v3108_v41 = vadd.f32 %v3078_v14, %v5383_v35  ;;  %v3080_v22 = vadd.f32 %v3964_v62, %v3050_v9  ;;  %v2942_v1 = vpop.f32.mrb[64].mxu0  ;;  %v2991_v35 = vmul.f32 %v5584_v8, %v5499_v7  ;;  %v3970_v9 = vld [vmem:[%s4350_s11 + $0xc8] sm:$0xff]  ;;  %v3971_v62 = vld [vmem:[%s4350_s11 + $0xd0] sm:$0xff] }
 0x6fb   : > { %3137 = vst [vmem:[%s5609_s21 + $0x80] sm:$0xff] %v3107_v30  ;;  %v3109_v24 = vadd.f32 %v3079_v54, %v5398_v52  ;;  %v3021_v5 = vmul.f32 %v5586_v36, %v2942_v1  ;;  %v2944_v12 = vpop.f32.mrb[65].mxu0  ;;  %v6041_v54 = vld [vmem:[#allocation58_spill] sm:$0xff] }
 0x6fc   : > { %3138 = vst [vmem:[%s5609_s21 + $0x88] sm:$0xff] %v3108_v41  ;;  %v3110_v18 = vadd.f32 %v3080_v22, %v5386_v51  ;;  %v3022_v19 = vmul.f32 %v5586_v36, %v2944_v12  ;;  %v2946_v45 = vpop.f32.mrb[66].mxu0  ;;  %v2993_v51 = vmul.f32 %v5584_v8, %v5503_v42  ;;  %v6035_v42 = vld [vmem:[#allocation49_spill] sm:$0xff]  ;;  %v6042_v1 = vld [vmem:[#allocation50_spill] sm:$0xff] }
 0x6fd   : > { %3139 = vst [vmem:[%s5609_s21 + $0x90] sm:$0xff] %v3109_v24  ;;  %v3051_v52 = vadd.f32 %v3021_v5, %v2990_v21  ;;  %v3023_v31 = vmul.f32 %v5586_v36, %v2946_v45  ;;  %v2948_v40 = vpop.f32.mrb[67].mxu0  ;;  %v3972_v21 = vld [vmem:[%s4350_s11 + $0xd8] sm:$0xff] }
 0x6fe   : > { %3140 = vst [vmem:[%s5609_s21 + $0x98] sm:$0xff] %v3110_v18  ;;  %v3052_v23 = vadd.f32 %v3022_v19, %v2991_v35  ;;  %v3024_v7 = vmul.f32 %v5586_v36, %v2948_v40  ;;  %v6043_v18 = vld [vmem:[#allocation20_spill] sm:$0xff] }
 0x6ff   : > { %v3081_v6 = vadd.f32 %v3965_v39, %v3051_v52  ;;  %v3053_v38 = vadd.f32 %v3023_v31, %v2992_v26  ;;  %v6044_v19 = vld [vmem:[#allocation56_spill] sm:$0xff]  ;;  %v6045_v31 = vld [vmem:[#allocation51_spill] sm:$0xff] }
 0x700   : > { %v3082_v46 = vadd.f32 %v3966_v32, %v3052_v23  ;;  %v3054_v29 = vadd.f32 %v3024_v7, %v2993_v51  ;;  %v2998_v45 = vmul.f32 %v5584_v8, %v6044_v19  ;;  %v6046_v23 = vld [vmem:[#allocation57_spill] sm:$0xff] }
 0x701   : > { %v3111_v55 = vadd.f32 %v3081_v6, %v6033_v15  ;;  %v3083_v16 = vadd.f32 %v3967_v53, %v3053_v38  ;;  %v2999_v51 = vmul.f32 %v5584_v8, %v6046_v23  ;;  %v3974_v15 = vld [vmem:[%s4350_s11 + $0xe8] sm:$0xff]  ;;  %v6047_v53 = vld [vmem:[#allocation22_spill] sm:$0xff] }
 0x702   : > { %v3112_v59 = vadd.f32 %v3082_v46, %v6034_v0  ;;  %v3084_v47 = vadd.f32 %v3968_v4, %v3054_v29  ;;  %v2952_v43 = vpop.f32.mrb[68].mxu0  ;;  %v3973_v46 = vld [vmem:[%s4350_s11 + $0xe0] sm:$0xff]  ;;  %s4044_s11 = scalar_lea.vmem %s5778_s18, 3840 }
 0x703   : > { %3141 = vst [vmem:[%s5609_s21 + $0xa0] sm:$0xff] %v3111_v55  ;;  %v3113_v2 = vadd.f32 %v3083_v16, %v6035_v42  ;;  %v3025_v13 = vmul.f32 %v5586_v36, %v2952_v43  ;;  %v2954_v37 = vpop.f32.mrb[69].mxu0  ;;  %p4045_p3 = scmp.ne.s32.totalorder %s5778_s18, %s4044_s11  ;;  %p4052_p6 = scmp.lt.s32.totalorder %s4050_s30, %s4044_s11 }
 0x704   : > { %3142 = vst [vmem:[%s5609_s21 + $0xa8] sm:$0xff] %v3112_v59  ;;  %v3114_v10 = vadd.f32 %v3084_v47, %v6037_v20  ;;  %v3026_v28 = vmul.f32 %v5586_v36, %v2954_v37  ;;  %v2956_v49 = vpop.f32.mrb[70].mxu0 }
 0x705   : > { %3143 = vst [vmem:[%s5609_s21 + $0xb0] sm:$0xff] %v3113_v2  ;;  %v3055_v3 = vadd.f32 %v3025_v13, %v2994_v11  ;;  %v3027_v56 = vmul.f32 %v5586_v36, %v2956_v49  ;;  %v2958_v61 = vpop.f32.mrb[71].mxu0  ;;  %p4046_p4 = pnand %p4045_p3, %p4228_p5  ;;  %p4053_p9 = por %p4052_p6, %p4051_p8 }
 0x706   : > { %3144 = vst [vmem:[%s5609_s21 + $0xb8] sm:$0xff] %v3114_v10  ;;  %v3056_v57 = vadd.f32 %v3026_v28, %v2995_v50  ;;  %v3028_v44 = vmul.f32 %v5586_v36, %v2958_v61 }
 0x707   : > { %v3085_v34 = vadd.f32 %v3969_v58, %v3055_v3  ;;  %v3057_v14 = vadd.f32 %v3027_v56, %v2996_v25  ;;  %p4047_p7 = pneg %p4046_p4 }
 0x708   : > { %v3086_v30 = vadd.f32 %v3970_v9, %v3056_v57  ;;  %v3058_v27 = vadd.f32 %v3028_v44, %v2997_v48 }
 0x709   : > { %v3115_v41 = vadd.f32 %v3085_v34, %v6041_v54  ;;  %v3087_v22 = vadd.f32 %v3971_v62, %v3057_v14  ;;  %p4054_p0 = pnand %p4053_p9, %p4047_p7 }
 0x70a   : > { %v3116_v24 = vadd.f32 %v3086_v30, %v6042_v1  ;;  %v3088_v5 = vadd.f32 %v3972_v21, %v3058_v27  ;;  %v2962_v12 = vpop.f32.mrb[72].mxu0 }
 0x70b   : > { %3145 = vst [vmem:[%s5609_s21 + $0xc0] sm:$0xff] %v3115_v41  ;;  %v3117_v35 = vadd.f32 %v3087_v22, %v6043_v18  ;;  %v3029_v52 = vmul.f32 %v5586_v36, %v2962_v12  ;;  %v2964_v26 = vpop.f32.mrb[73].mxu0 }
 0x70c   : > { %3146 = vst [vmem:[%s5609_s21 + $0xc8] sm:$0xff] %v3116_v24  ;;  %v3118_v40 = vadd.f32 %v3088_v5, %v6045_v31  ;;  %v3030_v7 = vmul.f32 %v5586_v36, %v2964_v26  ;;  %v2966_v39 = vpop.f32.mrb[74].mxu0  ;;  %v6048_v36 = vld [vmem:[#allocation21_spill] sm:$0xff] }
 0x70d   : > { %3147 = vst [vmem:[%s5609_s21 + $0xd0] sm:$0xff] %v3117_v35  ;;  %v3059_v6 = vadd.f32 %v3029_v52, %v2998_v45  ;;  %v2967_v38 = vpop.f32.mrb[75].mxu0 }
 0x70e   : > { %3148 = vst [vmem:[%s5609_s21 + $0xd8] sm:$0xff] %v3118_v40  ;;  %v3060_v32 = vadd.f32 %v3030_v7, %v2999_v51 }
 0x70f   : > { %v3089_v29 = vadd.f32 %v3973_v46, %v3059_v6 }
 0x710   : > { %v3090_v55 = vadd.f32 %v3974_v15, %v3060_v32 }
 0x711   : > { %v3119_v8 = vadd.f32 %v3089_v29, %v6047_v53 }
 0x712   : > { %v3120_v16 = vadd.f32 %v3090_v55, %v6048_v36 }
 0x713   : > { %3149 = vst [vmem:[%s5609_s21 + $0xe0] sm:$0xff] %v3119_v8 }
 0x714   : > { %3150 = vst [vmem:[%s5609_s21 + $0xe8] sm:$0xff] %v3120_v16 }
 0x715   : > { %4057 = shalt.err (!%p4054_p0)
}
 0x716   : > { %s4058_s26 = scalar_lea.hbm %s5775_s15, 3840  ;;  %s4062_s28 = scalar_lea.hbm %s5835_s10, 7680 }
 0x717   : > { %p4059_p11 = scmp.ne.s32.totalorder %s5775_s15, %s4058_s26  ;;  %p4063_p2 = scmp.lt.u32.totalorder %s5775_s15, %s5835_s10 }
 0x718   : > { %p4064_p12 = scmp.lt.u32.totalorder %s4062_s28, %s4058_s26  ;;  %p4066_p3 = scmp.lt.u32.totalorder %s4058_s26, %s5775_s15 }
 0x719   : > { %p4060_p13 = pnand %p4059_p11, %p4228_p5 }
 0x71a   : > { %p4065_p10 = por %p4064_p12, %p4063_p2 }
 0x71b   : > { %p4061_p1 = pneg %p4060_p13 }
 0x71c   : > { %p4067_p4 = por %p4066_p3, %p4065_p10 }
 0x71e   : > { %p4068_p7 = pnand %p4067_p4, %p4061_p1 }
 0x720   : > { %4071 = shalt.err (!%p4068_p7)
}
 0x721   : > { %s4133_s21 = smov 256   ;;  %s4134_s22 = smov 16  }
 0x722   : > { %3694 = dma.vmem_to_hbm [thread:$0]  (%p4228_p5), %s5778_s18, 3840, %s5775_s15, %s5784_s17, %s4133_s21, %s4133_s21, %s4134_s22  }
 0x723 PF: > { %s6049_s27 = sld [smem:[#allocation14_spill]]  ;;  %s6050_s13 = sld [smem:[#allocation18_spill]] }
 0x724   : > { %p3716_p8 = scmp.ge.s32.totalorder %s4118_s16, 2 }
 0x729   : > { %s3180_s11 = sand.u32 1, %s6049_s27   ;;  %p6051_p6 = scmp.ne.s32.totalorder %s6050_s13, 0 }
 0x72a   : > { %s3181_s19 = scalar_lea.sflag [#allocation4], %s3180_s11 }
 0x72b   : > { %p3707_p9 = pnand %p3716_p8, %p6051_p6 }
 0x72d   : > { %4101 = dma.done.wait (!%p3707_p9), %s3181_s19, 3840  }
 0x72e   : > { %4103 = vsyncadd (!%p3707_p9), %s3181_s19, 4294963456  ;;  %s6052_s16 = sld [smem:[#allocation16_spill]]  ;;  %s6053_s24 = sld [smem:[#allocation15_spill]] }
 0x72f   : > { %s6054_s15 = sld [smem:[#allocation17_spill]]  ;;  %s6055_s13 = smov %s4110_s14 }
 0x734   : > { %p23_p0 = scmp.ge.s32.totalorder %s6052_s16, 4   ;;  %s6056_s14 = smov %s6053_s24 }
 0x736   :  { %25 = sbr.rel (!%p23_p0) target bundleno = 6 (0x6), region = 115 }
 0x73d   :  { %3186 = vsyncpa [#allocation3], 1 }
 0x73e   :  { %3188 = vsyncpa [#allocation3 + $0x1], 1 }
 0x73f   :  { %3189 = vsyncpa [#allocation8], 1 }
 0x740   :  { %3190 = vsyncpa [#allocation4], 1 }
 0x741   :  { %3192 = vsyncpa [#allocation4 + $0x1], 1 }
 0x742   :  { %3193 = vsyncpa [#allocation5], 1 }
 0x743   :  { %3195 = vsyncpa [#allocation5 + $0x1], 1 }

</bundles_post_ra>
